<compile_context>
chip_gen: v6e
topology: v6e:2x2x1
jax: 0.10.0
libtpu: 0.0.40
codegen_flags: <defaults>
</compile_context>

<pallas_src>
import math

import numpy as np

import jax
import jax.numpy as jnp
from jax.experimental import pallas as pl
from jax.experimental.pallas import tpu as pltpu

# ---- model hyper-parameters (from the PyTorch module) -----------------------
D_VOCAB = 23
D_MODEL = 16
NHEAD = 8                       # nn.Transformer default
HEAD_DIM = D_MODEL // NHEAD     # 2
DIM_FF = 8
N_ENC = 2
N_DEC = 2
BS = 2                          # self.bs
S_SRC = 6                       # src = arange(12).view(6, 2)
S_TGT = 4                       # tgt = arange(8).view(4, 2)
LN_EPS = 1e-5
BN_EPS = 1e-5

LANE = 128                      # lane width of the packed parameter buffer
SRC_ROWS = BS * S_SRC           # 12 stacked src rows (batch-major)
TGT_ROWS = BS * S_TGT           # 8 stacked tgt rows (batch-major)
TGT_ROW_OFF = 16                # tgt block starts at an 8-aligned id row
ID_ROWS = TGT_ROW_OFF + TGT_ROWS  # 24
NEG_INF = -1e9


def _round8(n):
    return (n + 7) // 8 * 8


# ---- static packed-parameter layout (row offsets are trace-time constants) --
def _build_layout():
    offs = {}
    cursor = 0

    def add(name, nrows):
        nonlocal cursor
        offs[name] = cursor
        cursor += _round8(nrows)

    def add_attn(pre):
        add(pre + '.wqkv', 3 * D_MODEL)   # (48,16)  packed q|k|v (PyTorch order)
        add(pre + '.bqkv', 1)             # (1,48)
        add(pre + '.wo', D_MODEL)         # (16,16)
        add(pre + '.bo', 1)               # (1,16)

    def add_ln(pre):
        add(pre + '.w', 1)
        add(pre + '.b', 1)

    def add_ffn(pre):
        add(pre + '.ff1_w', DIM_FF)       # (8,16)
        add(pre + '.ff1_b', 1)
        add(pre + '.ff2_w', D_MODEL)      # (16,8)
        add(pre + '.ff2_b', 1)

    # embedding (stored transposed, vocab on lanes -> lane-dense logits)
    add('embed_T', D_MODEL)               # (16,128), lanes 0:23 used
    add('out_bias', 1)                    # (1,128), lanes 0:23 used
    add('vocab_bias', 1)                  # (1,16) buffer (ones)
    add('long_buffer', 1)                 # (1,16) buffer (zeros)
    add('bn_scale', TGT_ROWS)             # (8,16) per-row eval-BN scale
    add('bn_shift', TGT_ROWS)             # (8,16) per-row eval-BN shift
    # constant attention-structure matrices (built with numpy in the wrapper)
    add('head_mask_src', NHEAD * SRC_ROWS)      # (96,16)
    add('head_mask_tgt', NHEAD * TGT_ROWS)      # (64,16)
    add('rep_src', NHEAD * SRC_ROWS)            # (96,12)
    add('rep_tgt', NHEAD * TGT_ROWS)            # (64,8)
    add('sum_block_src', NHEAD * SRC_ROWS)      # (96,96)
    add('sum_block_tgt', NHEAD * TGT_ROWS)      # (64,64)
    add('amask_enc', SRC_ROWS)                  # (12,96)
    add('amask_dec', TGT_ROWS)                  # (8,64)
    add('amask_cross', TGT_ROWS)                # (8,96)

    for i in range(N_ENC):
        pre = f'enc{i}'
        add_attn(pre + '.sa')
        add_ffn(pre)
        add_ln(pre + '.ln1')
        add_ln(pre + '.ln2')
    add_ln('enc_norm')
    for i in range(N_DEC):
        pre = f'dec{i}'
        add_attn(pre + '.sa')
        add_attn(pre + '.ca')
        add_ffn(pre)
        add_ln(pre + '.ln1')
        add_ln(pre + '.ln2')
        add_ln(pre + '.ln3')
    add_ln('dec_norm')
    return offs, cursor


OFFS, TOTAL_ROWS = _build_layout()


# ---- numpy constant builders (trace-time only, zero runtime cost) -----------
def _np_head_mask(tk):
    """(NHEAD*tk, D_MODEL): 1 where the model dim belongs to the row's head."""
    m = np.zeros((NHEAD * tk, D_MODEL), np.float32)
    for h in range(NHEAD):
        m[h * tk:(h + 1) * tk, h * HEAD_DIM:(h + 1) * HEAD_DIM] = 1.0
    return m


def _np_rep(tk):
    """(NHEAD*tk, tk): replicates K/V rows once per head via one matmul."""
    m = np.zeros((NHEAD * tk, tk), np.float32)
    for h in range(NHEAD):
        m[h * tk:(h + 1) * tk, :] = np.eye(tk, dtype=np.float32)
    return m


def _np_sum_block(tk):
    """(NHEAD*tk, NHEAD*tk): 1 inside each head block (per-head softmax sums)."""
    m = np.zeros((NHEAD * tk, NHEAD * tk), np.float32)
    for h in range(NHEAD):
        m[h * tk:(h + 1) * tk, h * tk:(h + 1) * tk] = 1.0
    return m


def _np_attn_mask(sq, sk):
    """(BS*sq, NHEAD*BS*sk): 0 where query/key batch match, -1e9 elsewhere."""
    tq, tk = BS * sq, BS * sk
    m = np.full((tq, NHEAD * tk), NEG_INF, np.float32)
    for b in range(BS):
        for h in range(NHEAD):
            m[b * sq:(b + 1) * sq, h * tk + b * sk:h * tk + (b + 1) * sk] = 0.0
    return m


# ---- in-kernel helpers -------------------------------------------------------
def _w(pp, name, nrows, ncols):
    """Static slice-load of one packed tensor at its point of use."""
    off = OFFS[name]
    return pp[off:off + nrows, 0:ncols]


def _matT(x, w):
    """x @ w.T (contract dim 1 with dim 1) -> PyTorch Linear convention."""
    return jax.lax.dot_general(x, w, (((1,), (1,)), ((), ())),
                               preferred_element_type=jnp.float32)


def _ln(pp, pre, x):
    w = _w(pp, pre + '.w', 1, D_MODEL)
    b = _w(pp, pre + '.b', 1, D_MODEL)
    mu = jnp.mean(x, axis=-1, keepdims=True)
    var = jnp.mean((x - mu) * (x - mu), axis=-1, keepdims=True)
    return (x - mu) * jax.lax.rsqrt(var + LN_EPS) * w + b


def _mha(pp, pre, q_in, kv_in, rep_name, hm_name, sb_name, am_name):
    """All-head fused nn.MultiheadAttention (eval, no dropout)."""
    tq = q_in.shape[0]
    tk = kv_in.shape[0]
    htk = NHEAD * tk
    woff = OFFS[pre + '.wqkv']
    bqkv = _w(pp, pre + '.bqkv', 1, 3 * D_MODEL)

    if q_in is kv_in:
        # self-attention: one packed QKV projection
        qkv = _matT(q_in, pp[woff:woff + 3 * D_MODEL, 0:D_MODEL]) + bqkv
        q = qkv[:, 0:D_MODEL]
        k = qkv[:, D_MODEL:2 * D_MODEL]
        v = qkv[:, 2 * D_MODEL:3 * D_MODEL]
    else:
        # cross-attention: Q from queries, packed KV from memory
        q = _matT(q_in, pp[woff:woff + D_MODEL, 0:D_MODEL]) + bqkv[:, 0:D_MODEL]
        kv = _matT(kv_in, pp[woff + D_MODEL:woff + 3 * D_MODEL, 0:D_MODEL]) \
            + bqkv[:, D_MODEL:3 * D_MODEL]
        k = kv[:, 0:D_MODEL]
        v = kv[:, D_MODEL:2 * D_MODEL]

    rep = _w(pp, rep_name, htk, tk)          # (htk, tk)  0/1 replication
    hm = _w(pp, hm_name, htk, D_MODEL)       # (htk, 16)  head selector
    kb = jnp.dot(rep, k, preferred_element_type=jnp.float32) * hm
    vb = jnp.dot(rep, v, preferred_element_type=jnp.float32) * hm

    # scores for all heads at once: s[i, h*tk + j] = q_h[i] . k_h[j]
    s = _matT(q, kb) * (1.0 / math.sqrt(HEAD_DIM))
    s = s + _w(pp, am_name, tq, htk)                       # batch block mask
    s = s - jnp.max(s, axis=-1, keepdims=True)             # per-row shift (softmax invariant)
    e = jnp.exp(s)
    denom = jnp.dot(e, _w(pp, sb_name, htk, htk),
                    preferred_element_type=jnp.float32)    # per-head sums, broadcast
    pattn = e * pl.reciprocal(denom, approx=True)
    o = jnp.dot(pattn, vb, preferred_element_type=jnp.float32)   # (tq, D_MODEL), heads interleaved
    return _matT(o, _w(pp, pre + '.wo', D_MODEL, D_MODEL)) + _w(pp, pre + '.bo', 1, D_MODEL)


def _ffn(pp, pre, x):
    h = jnp.maximum(_matT(x, _w(pp, pre + '.ff1_w', DIM_FF, D_MODEL))
                    + _w(pp, pre + '.ff1_b', 1, DIM_FF), 0.0)
    return _matT(h, _w(pp, pre + '.ff2_w', D_MODEL, DIM_FF)) + _w(pp, pre + '.ff2_b', 1, D_MODEL)


def _enc_layer(pp, pre, x):
    a = _mha(pp, pre + '.sa', x, x, 'rep_src', 'head_mask_src', 'sum_block_src', 'amask_enc')
    x = _ln(pp, pre + '.ln1', x + a)
    x = _ln(pp, pre + '.ln2', x + _ffn(pp, pre, x))
    return x


def _dec_layer(pp, pre, x, mem):
    a = _mha(pp, pre + '.sa', x, x, 'rep_tgt', 'head_mask_tgt', 'sum_block_tgt', 'amask_dec')
    x = _ln(pp, pre + '.ln1', x + a)
    c = _mha(pp, pre + '.ca', x, mem, 'rep_src', 'head_mask_src', 'sum_block_src', 'amask_cross')
    x = _ln(pp, pre + '.ln2', x + c)
    x = _ln(pp, pre + '.ln3', x + _ffn(pp, pre, x))
    return x


# ---- the Pallas kernel -------------------------------------------------------
def _transformer_kernel(ids_ref, pp_ref, out_ref):
    pp = pp_ref
    ids = ids_ref[...]                                        # (ID_ROWS, 1) int32

    # one one-hot embedding matmul for all src+tgt tokens (vocab padded to 128)
    oh = (jax.lax.broadcasted_iota(jnp.int32, (ID_ROWS, LANE), 1) == ids).astype(jnp.float32)
    emb = _matT(oh, _w(pp, 'embed_T', D_MODEL, LANE))         # (ID_ROWS, 16)

    src = emb[0:SRC_ROWS, :] \
        + _w(pp, 'vocab_bias', 1, D_MODEL) + _w(pp, 'long_buffer', 1, D_MODEL)
    tgt = emb[TGT_ROW_OFF:TGT_ROW_OFF + TGT_ROWS, :]
    # eval-mode BatchNorm1d(bs): channel == batch index, folded to per-row affine
    tgt = tgt * _w(pp, 'bn_scale', TGT_ROWS, D_MODEL) + _w(pp, 'bn_shift', TGT_ROWS, D_MODEL)

    mem = src
    for i in range(N_ENC):
        mem = _enc_layer(pp, f'enc{i}', mem)
    mem = _ln(pp, 'enc_norm', mem)

    x = tgt
    for i in range(N_DEC):
        x = _dec_layer(pp, f'dec{i}', x, mem)
    x = _ln(pp, 'dec_norm', x)

    # tied output projection, lane-dense (8, 128) store (vocab padded)
    logits = jnp.dot(x, _w(pp, 'embed_T', D_MODEL, LANE),
                     preferred_element_type=jnp.float32) + _w(pp, 'out_bias', 1, LANE)
    out_ref[...] = logits


# ---- parameter construction & packing ---------------------------------------
def init_params(key):
    keys = iter(jax.random.split(key, 64))

    def u(shape, scale=0.1):
        return jax.random.uniform(next(keys), shape, jnp.float32, -scale, scale)

    def attn():
        return {'wqkv': u((3 * D_MODEL, D_MODEL)), 'bqkv': u((3 * D_MODEL,)),
                'wo': u((D_MODEL, D_MODEL)), 'bo': u((D_MODEL,))}

    def ln():
        return {'w': jnp.ones((D_MODEL,), jnp.float32),
                'b': jnp.zeros((D_MODEL,), jnp.float32)}

    def ffn():
        return {'ff1_w': u((DIM_FF, D_MODEL)), 'ff1_b': u((DIM_FF,)),
                'ff2_w': u((D_MODEL, DIM_FF)), 'ff2_b': u((D_MODEL,))}

    params = {
        'embed': u((D_VOCAB, D_MODEL), 0.5),                  # tied with output_proj.weight
        'out_bias': u((D_VOCAB,)),
        'vocab_bias': jnp.ones((D_MODEL,), jnp.float32),      # registered buffer (ones)
        'long_buffer': jnp.zeros((D_MODEL,), jnp.float32),    # registered buffer (zeros)
        'bn_w': jnp.ones((BS,), jnp.float32), 'bn_b': jnp.zeros((BS,), jnp.float32),
        'bn_mean': jnp.zeros((BS,), jnp.float32), 'bn_var': jnp.ones((BS,), jnp.float32),
        'enc': [], 'dec': [], 'enc_norm': ln(), 'dec_norm': ln(),
    }
    for _ in range(N_ENC):
        d = {'sa': attn()}
        d.update(ffn())
        d['ln1'] = ln()
        d['ln2'] = ln()
        params['enc'].append(d)
    for _ in range(N_DEC):
        d = {'sa': attn(), 'ca': attn()}
        d.update(ffn())
        d['ln1'] = ln()
        d['ln2'] = ln()
        d['ln3'] = ln()
        params['dec'].append(d)
    return params


def pack_params(params):
    """Pack every parameter + constant mask into one (TOTAL_ROWS, 128) array."""
    buf = jnp.zeros((TOTAL_ROWS, LANE), jnp.float32)

    def put(buf, name, arr):
        arr = jnp.asarray(arr, jnp.float32)
        if arr.ndim == 1:
            arr = arr[None, :]
        r, c = arr.shape
        off = OFFS[name]
        return buf.at[off:off + r, 0:c].set(arr)

    buf = put(buf, 'embed_T', params['embed'].T)              # (16, 23)
    buf = put(buf, 'out_bias', params['out_bias'])
    buf = put(buf, 'vocab_bias', params['vocab_bias'])
    buf = put(buf, 'long_buffer', params['long_buffer'])

    # eval-mode BatchNorm folded into per-row scale/shift tiles (batch-major rows)
    scale = params['bn_w'] * jax.lax.rsqrt(params['bn_var'] + BN_EPS)
    shift = params['bn_b'] - params['bn_mean'] * scale
    buf = put(buf, 'bn_scale',
              jnp.broadcast_to(jnp.repeat(scale, S_TGT)[:, None], (TGT_ROWS, D_MODEL)))
    buf = put(buf, 'bn_shift',
              jnp.broadcast_to(jnp.repeat(shift, S_TGT)[:, None], (TGT_ROWS, D_MODEL)))

    # constant attention-structure matrices
    buf = put(buf, 'head_mask_src', _np_head_mask(SRC_ROWS))
    buf = put(buf, 'head_mask_tgt', _np_head_mask(TGT_ROWS))
    buf = put(buf, 'rep_src', _np_rep(SRC_ROWS))
    buf = put(buf, 'rep_tgt', _np_rep(TGT_ROWS))
    buf = put(buf, 'sum_block_src', _np_sum_block(SRC_ROWS))
    buf = put(buf, 'sum_block_tgt', _np_sum_block(TGT_ROWS))
    buf = put(buf, 'amask_enc', _np_attn_mask(S_SRC, S_SRC))
    buf = put(buf, 'amask_dec', _np_attn_mask(S_TGT, S_TGT))
    buf = put(buf, 'amask_cross', _np_attn_mask(S_TGT, S_SRC))

    def put_attn(buf, pre, ap):
        buf = put(buf, pre + '.wqkv', ap['wqkv'])
        buf = put(buf, pre + '.bqkv', ap['bqkv'])
        buf = put(buf, pre + '.wo', ap['wo'])
        buf = put(buf, pre + '.bo', ap['bo'])
        return buf

    def put_ln(buf, pre, lp):
        buf = put(buf, pre + '.w', lp['w'])
        buf = put(buf, pre + '.b', lp['b'])
        return buf

    def put_ffn(buf, pre, lp):
        buf = put(buf, pre + '.ff1_w', lp['ff1_w'])
        buf = put(buf, pre + '.ff1_b', lp['ff1_b'])
        buf = put(buf, pre + '.ff2_w', lp['ff2_w'])
        buf = put(buf, pre + '.ff2_b', lp['ff2_b'])
        return buf

    for i in range(N_ENC):
        lp = params['enc'][i]
        pre = f'enc{i}'
        buf = put_attn(buf, pre + '.sa', lp['sa'])
        buf = put_ffn(buf, pre, lp)
        buf = put_ln(buf, pre + '.ln1', lp['ln1'])
        buf = put_ln(buf, pre + '.ln2', lp['ln2'])
    buf = put_ln(buf, 'enc_norm', params['enc_norm'])
    for i in range(N_DEC):
        lp = params['dec'][i]
        pre = f'dec{i}'
        buf = put_attn(buf, pre + '.sa', lp['sa'])
        buf = put_attn(buf, pre + '.ca', lp['ca'])
        buf = put_ffn(buf, pre, lp)
        buf = put_ln(buf, pre + '.ln1', lp['ln1'])
        buf = put_ln(buf, pre + '.ln2', lp['ln2'])
        buf = put_ln(buf, pre + '.ln3', lp['ln3'])
    buf = put_ln(buf, 'dec_norm', params['dec_norm'])
    return buf


# ---- wrapper -----------------------------------------------------------------
@jax.jit
def transformer_forward(src_ids, tgt_ids, packed):
    # flatten ids batch-major into one (ID_ROWS, 1) column for the kernel
    src_flat = jnp.transpose(src_ids).reshape(SRC_ROWS).astype(jnp.int32)
    tgt_flat = jnp.transpose(tgt_ids).reshape(TGT_ROWS).astype(jnp.int32)
    ids = jnp.zeros((ID_ROWS,), jnp.int32)
    ids = ids.at[0:SRC_ROWS].set(src_flat)
    ids = ids.at[TGT_ROW_OFF:TGT_ROW_OFF + TGT_ROWS].set(tgt_flat)
    ids = ids.reshape(ID_ROWS, 1)

    out = pl.pallas_call(
        _transformer_kernel,
        out_shape=jax.ShapeDtypeStruct((TGT_ROWS, LANE), jnp.float32),
        in_specs=[pl.BlockSpec(memory_space=pltpu.MemorySpace.VMEM),
                  pl.BlockSpec(memory_space=pltpu.MemorySpace.VMEM)],
        out_specs=pl.BlockSpec(memory_space=pltpu.MemorySpace.VMEM),
    )(ids, packed)

    # (batch-major rows, padded lanes) -> (tgt_seq, batch, vocab) like PyTorch
    logits = out[:, :D_VOCAB].reshape(BS, S_TGT, D_VOCAB)
    return jnp.transpose(logits, (1, 0, 2))


if __name__ == "__main__":
    key = jax.random.PRNGKey(0)
    params = init_params(key)
    packed = pack_params(params)

    # exactly the module's get_input(): src=arange(12).view(6,2), tgt=arange(8).view(4,2)
    src_ids = jnp.arange(12, dtype=jnp.int32).reshape(S_SRC, BS)
    tgt_ids = jnp.arange(BS * 4, dtype=jnp.int32).reshape(S_TGT, BS)

    out = transformer_forward(src_ids, tgt_ids, packed)
    out = jax.block_until_ready(out)
    assert out.shape == (S_TGT, BS, D_VOCAB), out.shape
    assert bool(jnp.all(jnp.isfinite(out)))
    print("KERNEL_OK")
</pallas_src>

<mosaic_0001>
module attributes {stable_mosaic.version = 11 : i64} {
  func.func @_transformer_kernel(%arg0: memref<24x1xi32, #tpu.memory_space<vmem>>, %arg1: memref<1400x128xf32, #tpu.memory_space<vmem>>, %arg2: memref<8x128xf32, #tpu.memory_space<vmem>>) attributes {dimension_semantics = [], scalar_prefetch = 0 : i64, scratch_operands = 0 : i64, tpu.core_type = #tpu.core_type<tc>} {
    %c0 = arith.constant 0 : index
    %c0_0 = arith.constant 0 : index
    %0 = vector.load %arg0[%c0, %c0_0] : memref<24x1xi32, #tpu.memory_space<vmem>>, vector<24x1xi32>
    %1 = tpu.iota {dimensions = array<i32: 1>} : vector<24x128xi32>
    %2 = vector.broadcast %0 : vector<24x1xi32> to vector<24x128xi32>
    %3 = arith.cmpi eq, %1, %2 : vector<24x128xi32>
    %4 = arith.extui %3 : vector<24x128xi1> to vector<24x128xi32>
    %5 = arith.sitofp %4 : vector<24x128xi32> to vector<24x128xf32>
    %c0_1 = arith.constant 0 : index
    %c0_2 = arith.constant 0 : index
    %6 = vector.load %arg1[%c0_1, %c0_2] : memref<1400x128xf32, #tpu.memory_space<vmem>>, vector<16x128xf32>
    %cst = arith.constant dense<0.000000e+00> : vector<24x16xf32>
    %7 = tpu.matmul %5, %6, %cst {dimension_numbers = #tpu.dot_dimension_numbers<[1], [1], [0], [0], [0, 0, 1, 0], [], []>} : vector<24x128xf32>, vector<16x128xf32>, vector<24x16xf32> -> vector<24x16xf32>
    %8 = vector.extract_strided_slice %7 {offsets = [0, 0], sizes = [12, 16], strides = [1, 1]} : vector<24x16xf32> to vector<12x16xf32>
    %c24 = arith.constant 24 : index
    %c0_3 = arith.constant 0 : index
    %9 = vector.load %arg1[%c24, %c0_3] : memref<1400x128xf32, #tpu.memory_space<vmem>>, vector<1x16xf32>
    %10 = vector.broadcast %9 : vector<1x16xf32> to vector<12x16xf32>
    %11 = arith.addf %8, %10 : vector<12x16xf32>
    %c32 = arith.constant 32 : index
    %c0_4 = arith.constant 0 : index
    %12 = vector.load %arg1[%c32, %c0_4] : memref<1400x128xf32, #tpu.memory_space<vmem>>, vector<1x16xf32>
    %13 = vector.broadcast %12 : vector<1x16xf32> to vector<12x16xf32>
    %14 = arith.addf %11, %13 : vector<12x16xf32>
    %15 = vector.extract_strided_slice %7 {offsets = [16, 0], sizes = [8, 16], strides = [1, 1]} : vector<24x16xf32> to vector<8x16xf32>
    %c40 = arith.constant 40 : index
    %c0_5 = arith.constant 0 : index
    %16 = vector.load %arg1[%c40, %c0_5] : memref<1400x128xf32, #tpu.memory_space<vmem>>, vector<8x16xf32>
    %17 = arith.mulf %15, %16 : vector<8x16xf32>
    %c48 = arith.constant 48 : index
    %c0_6 = arith.constant 0 : index
    %18 = vector.load %arg1[%c48, %c0_6] : memref<1400x128xf32, #tpu.memory_space<vmem>>, vector<8x16xf32>
    %19 = arith.addf %17, %18 : vector<8x16xf32>
    %c616 = arith.constant 616 : index
    %c0_7 = arith.constant 0 : index
    %20 = vector.load %arg1[%c616, %c0_7] : memref<1400x128xf32, #tpu.memory_space<vmem>>, vector<1x48xf32>
    %c568 = arith.constant 568 : index
    %c0_8 = arith.constant 0 : index
    %21 = vector.load %arg1[%c568, %c0_8] : memref<1400x128xf32, #tpu.memory_space<vmem>>, vector<48x16xf32>
    %cst_9 = arith.constant dense<0.000000e+00> : vector<12x48xf32>
    %22 = tpu.matmul %14, %21, %cst_9 {dimension_numbers = #tpu.dot_dimension_numbers<[1], [1], [0], [0], [0, 0, 1, 0], [], []>} : vector<12x16xf32>, vector<48x16xf32>, vector<12x48xf32> -> vector<12x48xf32>
    %23 = vector.broadcast %20 : vector<1x48xf32> to vector<12x48xf32>
    %24 = arith.addf %22, %23 : vector<12x48xf32>
    %25 = vector.extract_strided_slice %24 {offsets = [0, 0], sizes = [12, 16], strides = [1, 1]} : vector<12x48xf32> to vector<12x16xf32>
    %26 = vector.extract_strided_slice %24 {offsets = [0, 16], sizes = [12, 16], strides = [1, 1]} : vector<12x48xf32> to vector<12x16xf32>
    %27 = vector.extract_strided_slice %24 {offsets = [0, 32], sizes = [12, 16], strides = [1, 1]} : vector<12x48xf32> to vector<12x16xf32>
    %c216 = arith.constant 216 : index
    %c0_10 = arith.constant 0 : index
    %28 = vector.load %arg1[%c216, %c0_10] : memref<1400x128xf32, #tpu.memory_space<vmem>>, vector<96x12xf32>
    %c56 = arith.constant 56 : index
    %c0_11 = arith.constant 0 : index
    %29 = vector.load %arg1[%c56, %c0_11] : memref<1400x128xf32, #tpu.memory_space<vmem>>, vector<96x16xf32>
    %cst_12 = arith.constant dense<0.000000e+00> : vector<96x16xf32>
    %30 = tpu.matmul %28, %26, %cst_12 {dimension_numbers = #tpu.dot_dimension_numbers<[1], [0], [0], [1], [0, 0, 1, 1], [], []>} : vector<96x12xf32>, vector<12x16xf32>, vector<96x16xf32> -> vector<96x16xf32>
    %31 = arith.mulf %30, %29 : vector<96x16xf32>
    %cst_13 = arith.constant dense<0.000000e+00> : vector<96x16xf32>
    %32 = tpu.matmul %28, %27, %cst_13 {dimension_numbers = #tpu.dot_dimension_numbers<[1], [0], [0], [1], [0, 0, 1, 1], [], []>} : vector<96x12xf32>, vector<12x16xf32>, vector<96x16xf32> -> vector<96x16xf32>
    %33 = arith.mulf %32, %29 : vector<96x16xf32>
    %cst_14 = arith.constant dense<0.000000e+00> : vector<12x96xf32>
    %34 = tpu.matmul %25, %31, %cst_14 {dimension_numbers = #tpu.dot_dimension_numbers<[1], [1], [0], [0], [0, 0, 1, 0], [], []>} : vector<12x16xf32>, vector<96x16xf32>, vector<12x96xf32> -> vector<12x96xf32>
    %cst_15 = arith.constant 0.707106769 : f32
    %35 = vector.broadcast %cst_15 : f32 to vector<12x96xf32>
    %36 = arith.mulf %34, %35 : vector<12x96xf32>
    %c536 = arith.constant 536 : index
    %c0_16 = arith.constant 0 : index
    %37 = vector.load %arg1[%c536, %c0_16] : memref<1400x128xf32, #tpu.memory_space<vmem>>, vector<12x96xf32>
    %38 = arith.addf %36, %37 : vector<12x96xf32>
    %cst_17 = arith.constant dense<0xFF800000> : vector<12xf32>
    %39 = vector.multi_reduction <maximumf>, %38, %cst_17 [1] : vector<12x96xf32> to vector<12xf32>
    %40 = vector.shape_cast %39 : vector<12xf32> to vector<12x1xf32>
    %41 = vector.broadcast %40 : vector<12x1xf32> to vector<12x96xf32>
    %42 = arith.subf %38, %41 : vector<12x96xf32>
    %43 = math.exp %42 : vector<12x96xf32>
    %c376 = arith.constant 376 : index
    %c0_18 = arith.constant 0 : index
    %44 = vector.load %arg1[%c376, %c0_18] : memref<1400x128xf32, #tpu.memory_space<vmem>>, vector<96x96xf32>
    %cst_19 = arith.constant dense<0.000000e+00> : vector<12x96xf32>
    %45 = tpu.matmul %43, %44, %cst_19 {dimension_numbers = #tpu.dot_dimension_numbers<[1], [0], [0], [1], [0, 0, 1, 1], [], []>} : vector<12x96xf32>, vector<96x96xf32>, vector<12x96xf32> -> vector<12x96xf32>
    %46 = tpu.reciprocal %45 {approx = true} : vector<12x96xf32> -> vector<12x96xf32>
    %47 = arith.mulf %43, %46 : vector<12x96xf32>
    %cst_20 = arith.constant dense<0.000000e+00> : vector<12x16xf32>
    %48 = tpu.matmul %47, %33, %cst_20 {dimension_numbers = #tpu.dot_dimension_numbers<[1], [0], [0], [1], [0, 0, 1, 1], [], []>} : vector<12x96xf32>, vector<96x16xf32>, vector<12x16xf32> -> vector<12x16xf32>
    %c624 = arith.constant 624 : index
    %c0_21 = arith.constant 0 : index
    %49 = vector.load %arg1[%c624, %c0_21] : memref<1400x128xf32, #tpu.memory_space<vmem>>, vector<16x16xf32>
    %cst_22 = arith.constant dense<0.000000e+00> : vector<12x16xf32>
    %50 = tpu.matmul %48, %49, %cst_22 {dimension_numbers = #tpu.dot_dimension_numbers<[1], [1], [0], [0], [0, 0, 1, 0], [], []>} : vector<12x16xf32>, vector<16x16xf32>, vector<12x16xf32> -> vector<12x16xf32>
    %c640 = arith.constant 640 : index
    %c0_23 = arith.constant 0 : index
    %51 = vector.load %arg1[%c640, %c0_23] : memref<1400x128xf32, #tpu.memory_space<vmem>>, vector<1x16xf32>
    %52 = vector.broadcast %51 : vector<1x16xf32> to vector<12x16xf32>
    %53 = arith.addf %50, %52 : vector<12x16xf32>
    %54 = arith.addf %14, %53 : vector<12x16xf32>
    %c688 = arith.constant 688 : index
    %c0_24 = arith.constant 0 : index
    %55 = vector.load %arg1[%c688, %c0_24] : memref<1400x128xf32, #tpu.memory_space<vmem>>, vector<1x16xf32>
    %c696 = arith.constant 696 : index
    %c0_25 = arith.constant 0 : index
    %56 = vector.load %arg1[%c696, %c0_25] : memref<1400x128xf32, #tpu.memory_space<vmem>>, vector<1x16xf32>
    %cst_26 = arith.constant dense<0.000000e+00> : vector<12xf32>
    %57 = vector.multi_reduction <add>, %54, %cst_26 [1] : vector<12x16xf32> to vector<12xf32>
    %58 = vector.shape_cast %57 : vector<12xf32> to vector<12x1xf32>
    %cst_27 = arith.constant 1.600000e+01 : f32
    %59 = vector.broadcast %cst_27 : f32 to vector<12x1xf32>
    %60 = arith.divf %58, %59 : vector<12x1xf32>
    %61 = vector.broadcast %60 : vector<12x1xf32> to vector<12x16xf32>
    %62 = arith.subf %54, %61 : vector<12x16xf32>
    %63 = vector.broadcast %60 : vector<12x1xf32> to vector<12x16xf32>
    %64 = arith.subf %54, %63 : vector<12x16xf32>
    %65 = arith.mulf %62, %64 : vector<12x16xf32>
    %cst_28 = arith.constant dense<0.000000e+00> : vector<12xf32>
    %66 = vector.multi_reduction <add>, %65, %cst_28 [1] : vector<12x16xf32> to vector<12xf32>
    %67 = vector.shape_cast %66 : vector<12xf32> to vector<12x1xf32>
    %cst_29 = arith.constant 1.600000e+01 : f32
    %68 = vector.broadcast %cst_29 : f32 to vector<12x1xf32>
    %69 = arith.divf %67, %68 : vector<12x1xf32>
    %70 = vector.broadcast %60 : vector<12x1xf32> to vector<12x16xf32>
    %71 = arith.subf %54, %70 : vector<12x16xf32>
    %cst_30 = arith.constant 9.99999974E-6 : f32
    %72 = vector.broadcast %cst_30 : f32 to vector<12x1xf32>
    %73 = arith.addf %69, %72 : vector<12x1xf32>
    %74 = math.rsqrt %73 : vector<12x1xf32>
    %75 = vector.broadcast %74 : vector<12x1xf32> to vector<12x16xf32>
    %76 = arith.mulf %71, %75 : vector<12x16xf32>
    %77 = vector.broadcast %55 : vector<1x16xf32> to vector<12x16xf32>
    %78 = arith.mulf %76, %77 : vector<12x16xf32>
    %79 = vector.broadcast %56 : vector<1x16xf32> to vector<12x16xf32>
    %80 = arith.addf %78, %79 : vector<12x16xf32>
    %c648 = arith.constant 648 : index
    %c0_31 = arith.constant 0 : index
    %81 = vector.load %arg1[%c648, %c0_31] : memref<1400x128xf32, #tpu.memory_space<vmem>>, vector<8x16xf32>
    %cst_32 = arith.constant dense<0.000000e+00> : vector<12x8xf32>
    %82 = tpu.matmul %80, %81, %cst_32 {dimension_numbers = #tpu.dot_dimension_numbers<[1], [1], [0], [0], [0, 0, 1, 0], [], []>} : vector<12x16xf32>, vector<8x16xf32>, vector<12x8xf32> -> vector<12x8xf32>
    %c656 = arith.constant 656 : index
    %c0_33 = arith.constant 0 : index
    %83 = vector.load %arg1[%c656, %c0_33] : memref<1400x128xf32, #tpu.memory_space<vmem>>, vector<1x8xf32>
    %84 = vector.broadcast %83 : vector<1x8xf32> to vector<12x8xf32>
    %85 = arith.addf %82, %84 : vector<12x8xf32>
    %cst_34 = arith.constant 0.000000e+00 : f32
    %86 = vector.broadcast %cst_34 : f32 to vector<12x8xf32>
    %87 = arith.maximumf %85, %86 : vector<12x8xf32>
    %c664 = arith.constant 664 : index
    %c0_35 = arith.constant 0 : index
    %88 = vector.load %arg1[%c664, %c0_35] : memref<1400x128xf32, #tpu.memory_space<vmem>>, vector<16x8xf32>
    %cst_36 = arith.constant dense<0.000000e+00> : vector<12x16xf32>
    %89 = tpu.matmul %87, %88, %cst_36 {dimension_numbers = #tpu.dot_dimension_numbers<[1], [1], [0], [0], [0, 0, 1, 0], [], []>} : vector<12x8xf32>, vector<16x8xf32>, vector<12x16xf32> -> vector<12x16xf32>
    %c680 = arith.constant 680 : index
    %c0_37 = arith.constant 0 : index
    %90 = vector.load %arg1[%c680, %c0_37] : memref<1400x128xf32, #tpu.memory_space<vmem>>, vector<1x16xf32>
    %91 = vector.broadcast %90 : vector<1x16xf32> to vector<12x16xf32>
    %92 = arith.addf %89, %91 : vector<12x16xf32>
    %93 = arith.addf %80, %92 : vector<12x16xf32>
    %c704 = arith.constant 704 : index
    %c0_38 = arith.constant 0 : index
    %94 = vector.load %arg1[%c704, %c0_38] : memref<1400x128xf32, #tpu.memory_space<vmem>>, vector<1x16xf32>
    %c712 = arith.constant 712 : index
    %c0_39 = arith.constant 0 : index
    %95 = vector.load %arg1[%c712, %c0_39] : memref<1400x128xf32, #tpu.memory_space<vmem>>, vector<1x16xf32>
    %cst_40 = arith.constant dense<0.000000e+00> : vector<12xf32>
    %96 = vector.multi_reduction <add>, %93, %cst_40 [1] : vector<12x16xf32> to vector<12xf32>
    %97 = vector.shape_cast %96 : vector<12xf32> to vector<12x1xf32>
    %cst_41 = arith.constant 1.600000e+01 : f32
    %98 = vector.broadcast %cst_41 : f32 to vector<12x1xf32>
    %99 = arith.divf %97, %98 : vector<12x1xf32>
    %100 = vector.broadcast %99 : vector<12x1xf32> to vector<12x16xf32>
    %101 = arith.subf %93, %100 : vector<12x16xf32>
    %102 = vector.broadcast %99 : vector<12x1xf32> to vector<12x16xf32>
    %103 = arith.subf %93, %102 : vector<12x16xf32>
    %104 = arith.mulf %101, %103 : vector<12x16xf32>
    %cst_42 = arith.constant dense<0.000000e+00> : vector<12xf32>
    %105 = vector.multi_reduction <add>, %104, %cst_42 [1] : vector<12x16xf32> to vector<12xf32>
    %106 = vector.shape_cast %105 : vector<12xf32> to vector<12x1xf32>
    %cst_43 = arith.constant 1.600000e+01 : f32
    %107 = vector.broadcast %cst_43 : f32 to vector<12x1xf32>
    %108 = arith.divf %106, %107 : vector<12x1xf32>
    %109 = vector.broadcast %99 : vector<12x1xf32> to vector<12x16xf32>
    %110 = arith.subf %93, %109 : vector<12x16xf32>
    %cst_44 = arith.constant 9.99999974E-6 : f32
    %111 = vector.broadcast %cst_44 : f32 to vector<12x1xf32>
    %112 = arith.addf %108, %111 : vector<12x1xf32>
    %113 = math.rsqrt %112 : vector<12x1xf32>
    %114 = vector.broadcast %113 : vector<12x1xf32> to vector<12x16xf32>
    %115 = arith.mulf %110, %114 : vector<12x16xf32>
    %116 = vector.broadcast %94 : vector<1x16xf32> to vector<12x16xf32>
    %117 = arith.mulf %115, %116 : vector<12x16xf32>
    %118 = vector.broadcast %95 : vector<1x16xf32> to vector<12x16xf32>
    %119 = arith.addf %117, %118 : vector<12x16xf32>
    %c768 = arith.constant 768 : index
    %c0_45 = arith.constant 0 : index
    %120 = vector.load %arg1[%c768, %c0_45] : memref<1400x128xf32, #tpu.memory_space<vmem>>, vector<1x48xf32>
    %c720 = arith.constant 720 : index
    %c0_46 = arith.constant 0 : index
    %121 = vector.load %arg1[%c720, %c0_46] : memref<1400x128xf32, #tpu.memory_space<vmem>>, vector<48x16xf32>
    %cst_47 = arith.constant dense<0.000000e+00> : vector<12x48xf32>
    %122 = tpu.matmul %119, %121, %cst_47 {dimension_numbers = #tpu.dot_dimension_numbers<[1], [1], [0], [0], [0, 0, 1, 0], [], []>} : vector<12x16xf32>, vector<48x16xf32>, vector<12x48xf32> -> vector<12x48xf32>
    %123 = vector.broadcast %120 : vector<1x48xf32> to vector<12x48xf32>
    %124 = arith.addf %122, %123 : vector<12x48xf32>
    %125 = vector.extract_strided_slice %124 {offsets = [0, 0], sizes = [12, 16], strides = [1, 1]} : vector<12x48xf32> to vector<12x16xf32>
    %126 = vector.extract_strided_slice %124 {offsets = [0, 16], sizes = [12, 16], strides = [1, 1]} : vector<12x48xf32> to vector<12x16xf32>
    %127 = vector.extract_strided_slice %124 {offsets = [0, 32], sizes = [12, 16], strides = [1, 1]} : vector<12x48xf32> to vector<12x16xf32>
    %c216_48 = arith.constant 216 : index
    %c0_49 = arith.constant 0 : index
    %128 = vector.load %arg1[%c216_48, %c0_49] : memref<1400x128xf32, #tpu.memory_space<vmem>>, vector<96x12xf32>
    %c56_50 = arith.constant 56 : index
    %c0_51 = arith.constant 0 : index
    %129 = vector.load %arg1[%c56_50, %c0_51] : memref<1400x128xf32, #tpu.memory_space<vmem>>, vector<96x16xf32>
    %cst_52 = arith.constant dense<0.000000e+00> : vector<96x16xf32>
    %130 = tpu.matmul %128, %126, %cst_52 {dimension_numbers = #tpu.dot_dimension_numbers<[1], [0], [0], [1], [0, 0, 1, 1], [], []>} : vector<96x12xf32>, vector<12x16xf32>, vector<96x16xf32> -> vector<96x16xf32>
    %131 = arith.mulf %130, %129 : vector<96x16xf32>
    %cst_53 = arith.constant dense<0.000000e+00> : vector<96x16xf32>
    %132 = tpu.matmul %128, %127, %cst_53 {dimension_numbers = #tpu.dot_dimension_numbers<[1], [0], [0], [1], [0, 0, 1, 1], [], []>} : vector<96x12xf32>, vector<12x16xf32>, vector<96x16xf32> -> vector<96x16xf32>
    %133 = arith.mulf %132, %129 : vector<96x16xf32>
    %cst_54 = arith.constant dense<0.000000e+00> : vector<12x96xf32>
    %134 = tpu.matmul %125, %131, %cst_54 {dimension_numbers = #tpu.dot_dimension_numbers<[1], [1], [0], [0], [0, 0, 1, 0], [], []>} : vector<12x16xf32>, vector<96x16xf32>, vector<12x96xf32> -> vector<12x96xf32>
    %cst_55 = arith.constant 0.707106769 : f32
    %135 = vector.broadcast %cst_55 : f32 to vector<12x96xf32>
    %136 = arith.mulf %134, %135 : vector<12x96xf32>
    %c536_56 = arith.constant 536 : index
    %c0_57 = arith.constant 0 : index
    %137 = vector.load %arg1[%c536_56, %c0_57] : memref<1400x128xf32, #tpu.memory_space<vmem>>, vector<12x96xf32>
    %138 = arith.addf %136, %137 : vector<12x96xf32>
    %cst_58 = arith.constant dense<0xFF800000> : vector<12xf32>
    %139 = vector.multi_reduction <maximumf>, %138, %cst_58 [1] : vector<12x96xf32> to vector<12xf32>
    %140 = vector.shape_cast %139 : vector<12xf32> to vector<12x1xf32>
    %141 = vector.broadcast %140 : vector<12x1xf32> to vector<12x96xf32>
    %142 = arith.subf %138, %141 : vector<12x96xf32>
    %143 = math.exp %142 : vector<12x96xf32>
    %c376_59 = arith.constant 376 : index
    %c0_60 = arith.constant 0 : index
    %144 = vector.load %arg1[%c376_59, %c0_60] : memref<1400x128xf32, #tpu.memory_space<vmem>>, vector<96x96xf32>
    %cst_61 = arith.constant dense<0.000000e+00> : vector<12x96xf32>
    %145 = tpu.matmul %143, %144, %cst_61 {dimension_numbers = #tpu.dot_dimension_numbers<[1], [0], [0], [1], [0, 0, 1, 1], [], []>} : vector<12x96xf32>, vector<96x96xf32>, vector<12x96xf32> -> vector<12x96xf32>
    %146 = tpu.reciprocal %145 {approx = true} : vector<12x96xf32> -> vector<12x96xf32>
    %147 = arith.mulf %143, %146 : vector<12x96xf32>
    %cst_62 = arith.constant dense<0.000000e+00> : vector<12x16xf32>
    %148 = tpu.matmul %147, %133, %cst_62 {dimension_numbers = #tpu.dot_dimension_numbers<[1], [0], [0], [1], [0, 0, 1, 1], [], []>} : vector<12x96xf32>, vector<96x16xf32>, vector<12x16xf32> -> vector<12x16xf32>
    %c776 = arith.constant 776 : index
    %c0_63 = arith.constant 0 : index
    %149 = vector.load %arg1[%c776, %c0_63] : memref<1400x128xf32, #tpu.memory_space<vmem>>, vector<16x16xf32>
    %cst_64 = arith.constant dense<0.000000e+00> : vector<12x16xf32>
    %150 = tpu.matmul %148, %149, %cst_64 {dimension_numbers = #tpu.dot_dimension_numbers<[1], [1], [0], [0], [0, 0, 1, 0], [], []>} : vector<12x16xf32>, vector<16x16xf32>, vector<12x16xf32> -> vector<12x16xf32>
    %c792 = arith.constant 792 : index
    %c0_65 = arith.constant 0 : index
    %151 = vector.load %arg1[%c792, %c0_65] : memref<1400x128xf32, #tpu.memory_space<vmem>>, vector<1x16xf32>
    %152 = vector.broadcast %151 : vector<1x16xf32> to vector<12x16xf32>
    %153 = arith.addf %150, %152 : vector<12x16xf32>
    %154 = arith.addf %119, %153 : vector<12x16xf32>
    %c840 = arith.constant 840 : index
    %c0_66 = arith.constant 0 : index
    %155 = vector.load %arg1[%c840, %c0_66] : memref<1400x128xf32, #tpu.memory_space<vmem>>, vector<1x16xf32>
    %c848 = arith.constant 848 : index
    %c0_67 = arith.constant 0 : index
    %156 = vector.load %arg1[%c848, %c0_67] : memref<1400x128xf32, #tpu.memory_space<vmem>>, vector<1x16xf32>
    %cst_68 = arith.constant dense<0.000000e+00> : vector<12xf32>
    %157 = vector.multi_reduction <add>, %154, %cst_68 [1] : vector<12x16xf32> to vector<12xf32>
    %158 = vector.shape_cast %157 : vector<12xf32> to vector<12x1xf32>
    %cst_69 = arith.constant 1.600000e+01 : f32
    %159 = vector.broadcast %cst_69 : f32 to vector<12x1xf32>
    %160 = arith.divf %158, %159 : vector<12x1xf32>
    %161 = vector.broadcast %160 : vector<12x1xf32> to vector<12x16xf32>
    %162 = arith.subf %154, %161 : vector<12x16xf32>
    %163 = vector.broadcast %160 : vector<12x1xf32> to vector<12x16xf32>
    %164 = arith.subf %154, %163 : vector<12x16xf32>
    %165 = arith.mulf %162, %164 : vector<12x16xf32>
    %cst_70 = arith.constant dense<0.000000e+00> : vector<12xf32>
    %166 = vector.multi_reduction <add>, %165, %cst_70 [1] : vector<12x16xf32> to vector<12xf32>
    %167 = vector.shape_cast %166 : vector<12xf32> to vector<12x1xf32>
    %cst_71 = arith.constant 1.600000e+01 : f32
    %168 = vector.broadcast %cst_71 : f32 to vector<12x1xf32>
    %169 = arith.divf %167, %168 : vector<12x1xf32>
    %170 = vector.broadcast %160 : vector<12x1xf32> to vector<12x16xf32>
    %171 = arith.subf %154, %170 : vector<12x16xf32>
    %cst_72 = arith.constant 9.99999974E-6 : f32
    %172 = vector.broadcast %cst_72 : f32 to vector<12x1xf32>
    %173 = arith.addf %169, %172 : vector<12x1xf32>
    %174 = math.rsqrt %173 : vector<12x1xf32>
    %175 = vector.broadcast %174 : vector<12x1xf32> to vector<12x16xf32>
    %176 = arith.mulf %171, %175 : vector<12x16xf32>
    %177 = vector.broadcast %155 : vector<1x16xf32> to vector<12x16xf32>
    %178 = arith.mulf %176, %177 : vector<12x16xf32>
    %179 = vector.broadcast %156 : vector<1x16xf32> to vector<12x16xf32>
    %180 = arith.addf %178, %179 : vector<12x16xf32>
    %c800 = arith.constant 800 : index
    %c0_73 = arith.constant 0 : index
    %181 = vector.load %arg1[%c800, %c0_73] : memref<1400x128xf32, #tpu.memory_space<vmem>>, vector<8x16xf32>
    %cst_74 = arith.constant dense<0.000000e+00> : vector<12x8xf32>
    %182 = tpu.matmul %180, %181, %cst_74 {dimension_numbers = #tpu.dot_dimension_numbers<[1], [1], [0], [0], [0, 0, 1, 0], [], []>} : vector<12x16xf32>, vector<8x16xf32>, vector<12x8xf32> -> vector<12x8xf32>
    %c808 = arith.constant 808 : index
    %c0_75 = arith.constant 0 : index
    %183 = vector.load %arg1[%c808, %c0_75] : memref<1400x128xf32, #tpu.memory_space<vmem>>, vector<1x8xf32>
    %184 = vector.broadcast %183 : vector<1x8xf32> to vector<12x8xf32>
    %185 = arith.addf %182, %184 : vector<12x8xf32>
    %cst_76 = arith.constant 0.000000e+00 : f32
    %186 = vector.broadcast %cst_76 : f32 to vector<12x8xf32>
    %187 = arith.maximumf %185, %186 : vector<12x8xf32>
    %c816 = arith.constant 816 : index
    %c0_77 = arith.constant 0 : index
    %188 = vector.load %arg1[%c816, %c0_77] : memref<1400x128xf32, #tpu.memory_space<vmem>>, vector<16x8xf32>
    %cst_78 = arith.constant dense<0.000000e+00> : vector<12x16xf32>
    %189 = tpu.matmul %187, %188, %cst_78 {dimension_numbers = #tpu.dot_dimension_numbers<[1], [1], [0], [0], [0, 0, 1, 0], [], []>} : vector<12x8xf32>, vector<16x8xf32>, vector<12x16xf32> -> vector<12x16xf32>
    %c832 = arith.constant 832 : index
    %c0_79 = arith.constant 0 : index
    %190 = vector.load %arg1[%c832, %c0_79] : memref<1400x128xf32, #tpu.memory_space<vmem>>, vector<1x16xf32>
    %191 = vector.broadcast %190 : vector<1x16xf32> to vector<12x16xf32>
    %192 = arith.addf %189, %191 : vector<12x16xf32>
    %193 = arith.addf %180, %192 : vector<12x16xf32>
    %c856 = arith.constant 856 : index
    %c0_80 = arith.constant 0 : index
    %194 = vector.load %arg1[%c856, %c0_80] : memref<1400x128xf32, #tpu.memory_space<vmem>>, vector<1x16xf32>
    %c864 = arith.constant 864 : index
    %c0_81 = arith.constant 0 : index
    %195 = vector.load %arg1[%c864, %c0_81] : memref<1400x128xf32, #tpu.memory_space<vmem>>, vector<1x16xf32>
    %cst_82 = arith.constant dense<0.000000e+00> : vector<12xf32>
    %196 = vector.multi_reduction <add>, %193, %cst_82 [1] : vector<12x16xf32> to vector<12xf32>
    %197 = vector.shape_cast %196 : vector<12xf32> to vector<12x1xf32>
    %cst_83 = arith.constant 1.600000e+01 : f32
    %198 = vector.broadcast %cst_83 : f32 to vector<12x1xf32>
    %199 = arith.divf %197, %198 : vector<12x1xf32>
    %200 = vector.broadcast %199 : vector<12x1xf32> to vector<12x16xf32>
    %201 = arith.subf %193, %200 : vector<12x16xf32>
    %202 = vector.broadcast %199 : vector<12x1xf32> to vector<12x16xf32>
    %203 = arith.subf %193, %202 : vector<12x16xf32>
    %204 = arith.mulf %201, %203 : vector<12x16xf32>
    %cst_84 = arith.constant dense<0.000000e+00> : vector<12xf32>
    %205 = vector.multi_reduction <add>, %204, %cst_84 [1] : vector<12x16xf32> to vector<12xf32>
    %206 = vector.shape_cast %205 : vector<12xf32> to vector<12x1xf32>
    %cst_85 = arith.constant 1.600000e+01 : f32
    %207 = vector.broadcast %cst_85 : f32 to vector<12x1xf32>
    %208 = arith.divf %206, %207 : vector<12x1xf32>
    %209 = vector.broadcast %199 : vector<12x1xf32> to vector<12x16xf32>
    %210 = arith.subf %193, %209 : vector<12x16xf32>
    %cst_86 = arith.constant 9.99999974E-6 : f32
    %211 = vector.broadcast %cst_86 : f32 to vector<12x1xf32>
    %212 = arith.addf %208, %211 : vector<12x1xf32>
    %213 = math.rsqrt %212 : vector<12x1xf32>
    %214 = vector.broadcast %213 : vector<12x1xf32> to vector<12x16xf32>
    %215 = arith.mulf %210, %214 : vector<12x16xf32>
    %216 = vector.broadcast %194 : vector<1x16xf32> to vector<12x16xf32>
    %217 = arith.mulf %215, %216 : vector<12x16xf32>
    %218 = vector.broadcast %195 : vector<1x16xf32> to vector<12x16xf32>
    %219 = arith.addf %217, %218 : vector<12x16xf32>
    %c872 = arith.constant 872 : index
    %c0_87 = arith.constant 0 : index
    %220 = vector.load %arg1[%c872, %c0_87] : memref<1400x128xf32, #tpu.memory_space<vmem>>, vector<1x16xf32>
    %c880 = arith.constant 880 : index
    %c0_88 = arith.constant 0 : index
    %221 = vector.load %arg1[%c880, %c0_88] : memref<1400x128xf32, #tpu.memory_space<vmem>>, vector<1x16xf32>
    %cst_89 = arith.constant dense<0.000000e+00> : vector<12xf32>
    %222 = vector.multi_reduction <add>, %219, %cst_89 [1] : vector<12x16xf32> to vector<12xf32>
    %223 = vector.shape_cast %222 : vector<12xf32> to vector<12x1xf32>
    %cst_90 = arith.constant 1.600000e+01 : f32
    %224 = vector.broadcast %cst_90 : f32 to vector<12x1xf32>
    %225 = arith.divf %223, %224 : vector<12x1xf32>
    %226 = vector.broadcast %225 : vector<12x1xf32> to vector<12x16xf32>
    %227 = arith.subf %219, %226 : vector<12x16xf32>
    %228 = vector.broadcast %225 : vector<12x1xf32> to vector<12x16xf32>
    %229 = arith.subf %219, %228 : vector<12x16xf32>
    %230 = arith.mulf %227, %229 : vector<12x16xf32>
    %cst_91 = arith.constant dense<0.000000e+00> : vector<12xf32>
    %231 = vector.multi_reduction <add>, %230, %cst_91 [1] : vector<12x16xf32> to vector<12xf32>
    %232 = vector.shape_cast %231 : vector<12xf32> to vector<12x1xf32>
    %cst_92 = arith.constant 1.600000e+01 : f32
    %233 = vector.broadcast %cst_92 : f32 to vector<12x1xf32>
    %234 = arith.divf %232, %233 : vector<12x1xf32>
    %235 = vector.broadcast %225 : vector<12x1xf32> to vector<12x16xf32>
    %236 = arith.subf %219, %235 : vector<12x16xf32>
    %cst_93 = arith.constant 9.99999974E-6 : f32
    %237 = vector.broadcast %cst_93 : f32 to vector<12x1xf32>
    %238 = arith.addf %234, %237 : vector<12x1xf32>
    %239 = math.rsqrt %238 : vector<12x1xf32>
    %240 = vector.broadcast %239 : vector<12x1xf32> to vector<12x16xf32>
    %241 = arith.mulf %236, %240 : vector<12x16xf32>
    %242 = vector.broadcast %220 : vector<1x16xf32> to vector<12x16xf32>
    %243 = arith.mulf %241, %242 : vector<12x16xf32>
    %244 = vector.broadcast %221 : vector<1x16xf32> to vector<12x16xf32>
    %245 = arith.addf %243, %244 : vector<12x16xf32>
    %c936 = arith.constant 936 : index
    %c0_94 = arith.constant 0 : index
    %246 = vector.load %arg1[%c936, %c0_94] : memref<1400x128xf32, #tpu.memory_space<vmem>>, vector<1x48xf32>
    %c888 = arith.constant 888 : index
    %c0_95 = arith.constant 0 : index
    %247 = vector.load %arg1[%c888, %c0_95] : memref<1400x128xf32, #tpu.memory_space<vmem>>, vector<48x16xf32>
    %cst_96 = arith.constant dense<0.000000e+00> : vector<8x48xf32>
    %248 = tpu.matmul %19, %247, %cst_96 {dimension_numbers = #tpu.dot_dimension_numbers<[1], [1], [0], [0], [0, 0, 1, 0], [], []>} : vector<8x16xf32>, vector<48x16xf32>, vector<8x48xf32> -> vector<8x48xf32>
    %249 = vector.broadcast %246 : vector<1x48xf32> to vector<8x48xf32>
    %250 = arith.addf %248, %249 : vector<8x48xf32>
    %251 = vector.extract_strided_slice %250 {offsets = [0, 0], sizes = [8, 16], strides = [1, 1]} : vector<8x48xf32> to vector<8x16xf32>
    %252 = vector.extract_strided_slice %250 {offsets = [0, 16], sizes = [8, 16], strides = [1, 1]} : vector<8x48xf32> to vector<8x16xf32>
    %253 = vector.extract_strided_slice %250 {offsets = [0, 32], sizes = [8, 16], strides = [1, 1]} : vector<8x48xf32> to vector<8x16xf32>
    %c312 = arith.constant 312 : index
    %c0_97 = arith.constant 0 : index
    %254 = vector.load %arg1[%c312, %c0_97] : memref<1400x128xf32, #tpu.memory_space<vmem>>, vector<64x8xf32>
    %c152 = arith.constant 152 : index
    %c0_98 = arith.constant 0 : index
    %255 = vector.load %arg1[%c152, %c0_98] : memref<1400x128xf32, #tpu.memory_space<vmem>>, vector<64x16xf32>
    %cst_99 = arith.constant dense<0.000000e+00> : vector<64x16xf32>
    %256 = tpu.matmul %254, %252, %cst_99 {dimension_numbers = #tpu.dot_dimension_numbers<[1], [0], [0], [1], [0, 0, 1, 1], [], []>} : vector<64x8xf32>, vector<8x16xf32>, vector<64x16xf32> -> vector<64x16xf32>
    %257 = arith.mulf %256, %255 : vector<64x16xf32>
    %cst_100 = arith.constant dense<0.000000e+00> : vector<64x16xf32>
    %258 = tpu.matmul %254, %253, %cst_100 {dimension_numbers = #tpu.dot_dimension_numbers<[1], [0], [0], [1], [0, 0, 1, 1], [], []>} : vector<64x8xf32>, vector<8x16xf32>, vector<64x16xf32> -> vector<64x16xf32>
    %259 = arith.mulf %258, %255 : vector<64x16xf32>
    %cst_101 = arith.constant dense<0.000000e+00> : vector<8x64xf32>
    %260 = tpu.matmul %251, %257, %cst_101 {dimension_numbers = #tpu.dot_dimension_numbers<[1], [1], [0], [0], [0, 0, 1, 0], [], []>} : vector<8x16xf32>, vector<64x16xf32>, vector<8x64xf32> -> vector<8x64xf32>
    %cst_102 = arith.constant 0.707106769 : f32
    %261 = vector.broadcast %cst_102 : f32 to vector<8x64xf32>
    %262 = arith.mulf %260, %261 : vector<8x64xf32>
    %c552 = arith.constant 552 : index
    %c0_103 = arith.constant 0 : index
    %263 = vector.load %arg1[%c552, %c0_103] : memref<1400x128xf32, #tpu.memory_space<vmem>>, vector<8x64xf32>
    %264 = arith.addf %262, %263 : vector<8x64xf32>
    %cst_104 = arith.constant dense<0xFF800000> : vector<8xf32>
    %265 = vector.multi_reduction <maximumf>, %264, %cst_104 [1] : vector<8x64xf32> to vector<8xf32>
    %266 = vector.shape_cast %265 : vector<8xf32> to vector<8x1xf32>
    %267 = vector.broadcast %266 : vector<8x1xf32> to vector<8x64xf32>
    %268 = arith.subf %264, %267 : vector<8x64xf32>
    %269 = math.exp %268 : vector<8x64xf32>
    %c472 = arith.constant 472 : index
    %c0_105 = arith.constant 0 : index
    %270 = vector.load %arg1[%c472, %c0_105] : memref<1400x128xf32, #tpu.memory_space<vmem>>, vector<64x64xf32>
    %cst_106 = arith.constant dense<0.000000e+00> : vector<8x64xf32>
    %271 = tpu.matmul %269, %270, %cst_106 {dimension_numbers = #tpu.dot_dimension_numbers<[1], [0], [0], [1], [0, 0, 1, 1], [], []>} : vector<8x64xf32>, vector<64x64xf32>, vector<8x64xf32> -> vector<8x64xf32>
    %272 = tpu.reciprocal %271 {approx = true} : vector<8x64xf32> -> vector<8x64xf32>
    %273 = arith.mulf %269, %272 : vector<8x64xf32>
    %cst_107 = arith.constant dense<0.000000e+00> : vector<8x16xf32>
    %274 = tpu.matmul %273, %259, %cst_107 {dimension_numbers = #tpu.dot_dimension_numbers<[1], [0], [0], [1], [0, 0, 1, 1], [], []>} : vector<8x64xf32>, vector<64x16xf32>, vector<8x16xf32> -> vector<8x16xf32>
    %c944 = arith.constant 944 : index
    %c0_108 = arith.constant 0 : index
    %275 = vector.load %arg1[%c944, %c0_108] : memref<1400x128xf32, #tpu.memory_space<vmem>>, vector<16x16xf32>
    %cst_109 = arith.constant dense<0.000000e+00> : vector<8x16xf32>
    %276 = tpu.matmul %274, %275, %cst_109 {dimension_numbers = #tpu.dot_dimension_numbers<[1], [1], [0], [0], [0, 0, 1, 0], [], []>} : vector<8x16xf32>, vector<16x16xf32>, vector<8x16xf32> -> vector<8x16xf32>
    %c960 = arith.constant 960 : index
    %c0_110 = arith.constant 0 : index
    %277 = vector.load %arg1[%c960, %c0_110] : memref<1400x128xf32, #tpu.memory_space<vmem>>, vector<1x16xf32>
    %278 = vector.broadcast %277 : vector<1x16xf32> to vector<8x16xf32>
    %279 = arith.addf %276, %278 : vector<8x16xf32>
    %280 = arith.addf %19, %279 : vector<8x16xf32>
    %c1088 = arith.constant 1088 : index
    %c0_111 = arith.constant 0 : index
    %281 = vector.load %arg1[%c1088, %c0_111] : memref<1400x128xf32, #tpu.memory_space<vmem>>, vector<1x16xf32>
    %c1096 = arith.constant 1096 : index
    %c0_112 = arith.constant 0 : index
    %282 = vector.load %arg1[%c1096, %c0_112] : memref<1400x128xf32, #tpu.memory_space<vmem>>, vector<1x16xf32>
    %cst_113 = arith.constant dense<0.000000e+00> : vector<8xf32>
    %283 = vector.multi_reduction <add>, %280, %cst_113 [1] : vector<8x16xf32> to vector<8xf32>
    %284 = vector.shape_cast %283 : vector<8xf32> to vector<8x1xf32>
    %cst_114 = arith.constant 1.600000e+01 : f32
    %285 = vector.broadcast %cst_114 : f32 to vector<8x1xf32>
    %286 = arith.divf %284, %285 : vector<8x1xf32>
    %287 = vector.broadcast %286 : vector<8x1xf32> to vector<8x16xf32>
    %288 = arith.subf %280, %287 : vector<8x16xf32>
    %289 = vector.broadcast %286 : vector<8x1xf32> to vector<8x16xf32>
    %290 = arith.subf %280, %289 : vector<8x16xf32>
    %291 = arith.mulf %288, %290 : vector<8x16xf32>
    %cst_115 = arith.constant dense<0.000000e+00> : vector<8xf32>
    %292 = vector.multi_reduction <add>, %291, %cst_115 [1] : vector<8x16xf32> to vector<8xf32>
    %293 = vector.shape_cast %292 : vector<8xf32> to vector<8x1xf32>
    %cst_116 = arith.constant 1.600000e+01 : f32
    %294 = vector.broadcast %cst_116 : f32 to vector<8x1xf32>
    %295 = arith.divf %293, %294 : vector<8x1xf32>
    %296 = vector.broadcast %286 : vector<8x1xf32> to vector<8x16xf32>
    %297 = arith.subf %280, %296 : vector<8x16xf32>
    %cst_117 = arith.constant 9.99999974E-6 : f32
    %298 = vector.broadcast %cst_117 : f32 to vector<8x1xf32>
    %299 = arith.addf %295, %298 : vector<8x1xf32>
    %300 = math.rsqrt %299 : vector<8x1xf32>
    %301 = vector.broadcast %300 : vector<8x1xf32> to vector<8x16xf32>
    %302 = arith.mulf %297, %301 : vector<8x16xf32>
    %303 = vector.broadcast %281 : vector<1x16xf32> to vector<8x16xf32>
    %304 = arith.mulf %302, %303 : vector<8x16xf32>
    %305 = vector.broadcast %282 : vector<1x16xf32> to vector<8x16xf32>
    %306 = arith.addf %304, %305 : vector<8x16xf32>
    %c1016 = arith.constant 1016 : index
    %c0_118 = arith.constant 0 : index
    %307 = vector.load %arg1[%c1016, %c0_118] : memref<1400x128xf32, #tpu.memory_space<vmem>>, vector<1x48xf32>
    %c968 = arith.constant 968 : index
    %c0_119 = arith.constant 0 : index
    %308 = vector.load %arg1[%c968, %c0_119] : memref<1400x128xf32, #tpu.memory_space<vmem>>, vector<16x16xf32>
    %cst_120 = arith.constant dense<0.000000e+00> : vector<8x16xf32>
    %309 = tpu.matmul %306, %308, %cst_120 {dimension_numbers = #tpu.dot_dimension_numbers<[1], [1], [0], [0], [0, 0, 1, 0], [], []>} : vector<8x16xf32>, vector<16x16xf32>, vector<8x16xf32> -> vector<8x16xf32>
    %310 = vector.extract_strided_slice %307 {offsets = [0, 0], sizes = [1, 16], strides = [1, 1]} : vector<1x48xf32> to vector<1x16xf32>
    %311 = vector.broadcast %310 : vector<1x16xf32> to vector<8x16xf32>
    %312 = arith.addf %309, %311 : vector<8x16xf32>
    %c984 = arith.constant 984 : index
    %c0_121 = arith.constant 0 : index
    %313 = vector.load %arg1[%c984, %c0_121] : memref<1400x128xf32, #tpu.memory_space<vmem>>, vector<32x16xf32>
    %cst_122 = arith.constant dense<0.000000e+00> : vector<12x32xf32>
    %314 = tpu.matmul %245, %313, %cst_122 {dimension_numbers = #tpu.dot_dimension_numbers<[1], [1], [0], [0], [0, 0, 1, 0], [], []>} : vector<12x16xf32>, vector<32x16xf32>, vector<12x32xf32> -> vector<12x32xf32>
    %315 = vector.extract_strided_slice %307 {offsets = [0, 16], sizes = [1, 32], strides = [1, 1]} : vector<1x48xf32> to vector<1x32xf32>
    %316 = vector.broadcast %315 : vector<1x32xf32> to vector<12x32xf32>
    %317 = arith.addf %314, %316 : vector<12x32xf32>
    %318 = vector.extract_strided_slice %317 {offsets = [0, 0], sizes = [12, 16], strides = [1, 1]} : vector<12x32xf32> to vector<12x16xf32>
    %319 = vector.extract_strided_slice %317 {offsets = [0, 16], sizes = [12, 16], strides = [1, 1]} : vector<12x32xf32> to vector<12x16xf32>
    %c216_123 = arith.constant 216 : index
    %c0_124 = arith.constant 0 : index
    %320 = vector.load %arg1[%c216_123, %c0_124] : memref<1400x128xf32, #tpu.memory_space<vmem>>, vector<96x12xf32>
    %c56_125 = arith.constant 56 : index
    %c0_126 = arith.constant 0 : index
    %321 = vector.load %arg1[%c56_125, %c0_126] : memref<1400x128xf32, #tpu.memory_space<vmem>>, vector<96x16xf32>
    %cst_127 = arith.constant dense<0.000000e+00> : vector<96x16xf32>
    %322 = tpu.matmul %320, %318, %cst_127 {dimension_numbers = #tpu.dot_dimension_numbers<[1], [0], [0], [1], [0, 0, 1, 1], [], []>} : vector<96x12xf32>, vector<12x16xf32>, vector<96x16xf32> -> vector<96x16xf32>
    %323 = arith.mulf %322, %321 : vector<96x16xf32>
    %cst_128 = arith.constant dense<0.000000e+00> : vector<96x16xf32>
    %324 = tpu.matmul %320, %319, %cst_128 {dimension_numbers = #tpu.dot_dimension_numbers<[1], [0], [0], [1], [0, 0, 1, 1], [], []>} : vector<96x12xf32>, vector<12x16xf32>, vector<96x16xf32> -> vector<96x16xf32>
    %325 = arith.mulf %324, %321 : vector<96x16xf32>
    %cst_129 = arith.constant dense<0.000000e+00> : vector<8x96xf32>
    %326 = tpu.matmul %312, %323, %cst_129 {dimension_numbers = #tpu.dot_dimension_numbers<[1], [1], [0], [0], [0, 0, 1, 0], [], []>} : vector<8x16xf32>, vector<96x16xf32>, vector<8x96xf32> -> vector<8x96xf32>
    %cst_130 = arith.constant 0.707106769 : f32
    %327 = vector.broadcast %cst_130 : f32 to vector<8x96xf32>
    %328 = arith.mulf %326, %327 : vector<8x96xf32>
    %c560 = arith.constant 560 : index
    %c0_131 = arith.constant 0 : index
    %329 = vector.load %arg1[%c560, %c0_131] : memref<1400x128xf32, #tpu.memory_space<vmem>>, vector<8x96xf32>
    %330 = arith.addf %328, %329 : vector<8x96xf32>
    %cst_132 = arith.constant dense<0xFF800000> : vector<8xf32>
    %331 = vector.multi_reduction <maximumf>, %330, %cst_132 [1] : vector<8x96xf32> to vector<8xf32>
    %332 = vector.shape_cast %331 : vector<8xf32> to vector<8x1xf32>
    %333 = vector.broadcast %332 : vector<8x1xf32> to vector<8x96xf32>
    %334 = arith.subf %330, %333 : vector<8x96xf32>
    %335 = math.exp %334 : vector<8x96xf32>
    %c376_133 = arith.constant 376 : index
    %c0_134 = arith.constant 0 : index
    %336 = vector.load %arg1[%c376_133, %c0_134] : memref<1400x128xf32, #tpu.memory_space<vmem>>, vector<96x96xf32>
    %cst_135 = arith.constant dense<0.000000e+00> : vector<8x96xf32>
    %337 = tpu.matmul %335, %336, %cst_135 {dimension_numbers = #tpu.dot_dimension_numbers<[1], [0], [0], [1], [0, 0, 1, 1], [], []>} : vector<8x96xf32>, vector<96x96xf32>, vector<8x96xf32> -> vector<8x96xf32>
    %338 = tpu.reciprocal %337 {approx = true} : vector<8x96xf32> -> vector<8x96xf32>
    %339 = arith.mulf %335, %338 : vector<8x96xf32>
    %cst_136 = arith.constant dense<0.000000e+00> : vector<8x16xf32>
    %340 = tpu.matmul %339, %325, %cst_136 {dimension_numbers = #tpu.dot_dimension_numbers<[1], [0], [0], [1], [0, 0, 1, 1], [], []>} : vector<8x96xf32>, vector<96x16xf32>, vector<8x16xf32> -> vector<8x16xf32>
    %c1024 = arith.constant 1024 : index
    %c0_137 = arith.constant 0 : index
    %341 = vector.load %arg1[%c1024, %c0_137] : memref<1400x128xf32, #tpu.memory_space<vmem>>, vector<16x16xf32>
    %cst_138 = arith.constant dense<0.000000e+00> : vector<8x16xf32>
    %342 = tpu.matmul %340, %341, %cst_138 {dimension_numbers = #tpu.dot_dimension_numbers<[1], [1], [0], [0], [0, 0, 1, 0], [], []>} : vector<8x16xf32>, vector<16x16xf32>, vector<8x16xf32> -> vector<8x16xf32>
    %c1040 = arith.constant 1040 : index
    %c0_139 = arith.constant 0 : index
    %343 = vector.load %arg1[%c1040, %c0_139] : memref<1400x128xf32, #tpu.memory_space<vmem>>, vector<1x16xf32>
    %344 = vector.broadcast %343 : vector<1x16xf32> to vector<8x16xf32>
    %345 = arith.addf %342, %344 : vector<8x16xf32>
    %346 = arith.addf %306, %345 : vector<8x16xf32>
    %c1104 = arith.constant 1104 : index
    %c0_140 = arith.constant 0 : index
    %347 = vector.load %arg1[%c1104, %c0_140] : memref<1400x128xf32, #tpu.memory_space<vmem>>, vector<1x16xf32>
    %c1112 = arith.constant 1112 : index
    %c0_141 = arith.constant 0 : index
    %348 = vector.load %arg1[%c1112, %c0_141] : memref<1400x128xf32, #tpu.memory_space<vmem>>, vector<1x16xf32>
    %cst_142 = arith.constant dense<0.000000e+00> : vector<8xf32>
    %349 = vector.multi_reduction <add>, %346, %cst_142 [1] : vector<8x16xf32> to vector<8xf32>
    %350 = vector.shape_cast %349 : vector<8xf32> to vector<8x1xf32>
    %cst_143 = arith.constant 1.600000e+01 : f32
    %351 = vector.broadcast %cst_143 : f32 to vector<8x1xf32>
    %352 = arith.divf %350, %351 : vector<8x1xf32>
    %353 = vector.broadcast %352 : vector<8x1xf32> to vector<8x16xf32>
    %354 = arith.subf %346, %353 : vector<8x16xf32>
    %355 = vector.broadcast %352 : vector<8x1xf32> to vector<8x16xf32>
    %356 = arith.subf %346, %355 : vector<8x16xf32>
    %357 = arith.mulf %354, %356 : vector<8x16xf32>
    %cst_144 = arith.constant dense<0.000000e+00> : vector<8xf32>
    %358 = vector.multi_reduction <add>, %357, %cst_144 [1] : vector<8x16xf32> to vector<8xf32>
    %359 = vector.shape_cast %358 : vector<8xf32> to vector<8x1xf32>
    %cst_145 = arith.constant 1.600000e+01 : f32
    %360 = vector.broadcast %cst_145 : f32 to vector<8x1xf32>
    %361 = arith.divf %359, %360 : vector<8x1xf32>
    %362 = vector.broadcast %352 : vector<8x1xf32> to vector<8x16xf32>
    %363 = arith.subf %346, %362 : vector<8x16xf32>
    %cst_146 = arith.constant 9.99999974E-6 : f32
    %364 = vector.broadcast %cst_146 : f32 to vector<8x1xf32>
    %365 = arith.addf %361, %364 : vector<8x1xf32>
    %366 = math.rsqrt %365 : vector<8x1xf32>
    %367 = vector.broadcast %366 : vector<8x1xf32> to vector<8x16xf32>
    %368 = arith.mulf %363, %367 : vector<8x16xf32>
    %369 = vector.broadcast %347 : vector<1x16xf32> to vector<8x16xf32>
    %370 = arith.mulf %368, %369 : vector<8x16xf32>
    %371 = vector.broadcast %348 : vector<1x16xf32> to vector<8x16xf32>
    %372 = arith.addf %370, %371 : vector<8x16xf32>
    %c1048 = arith.constant 1048 : index
    %c0_147 = arith.constant 0 : index
    %373 = vector.load %arg1[%c1048, %c0_147] : memref<1400x128xf32, #tpu.memory_space<vmem>>, vector<8x16xf32>
    %cst_148 = arith.constant dense<0.000000e+00> : vector<8x8xf32>
    %374 = tpu.matmul %372, %373, %cst_148 {dimension_numbers = #tpu.dot_dimension_numbers<[1], [1], [0], [0], [0, 0, 1, 0], [], []>} : vector<8x16xf32>, vector<8x16xf32>, vector<8x8xf32> -> vector<8x8xf32>
    %c1056 = arith.constant 1056 : index
    %c0_149 = arith.constant 0 : index
    %375 = vector.load %arg1[%c1056, %c0_149] : memref<1400x128xf32, #tpu.memory_space<vmem>>, vector<1x8xf32>
    %376 = vector.broadcast %375 : vector<1x8xf32> to vector<8x8xf32>
    %377 = arith.addf %374, %376 : vector<8x8xf32>
    %cst_150 = arith.constant 0.000000e+00 : f32
    %378 = vector.broadcast %cst_150 : f32 to vector<8x8xf32>
    %379 = arith.maximumf %377, %378 : vector<8x8xf32>
    %c1064 = arith.constant 1064 : index
    %c0_151 = arith.constant 0 : index
    %380 = vector.load %arg1[%c1064, %c0_151] : memref<1400x128xf32, #tpu.memory_space<vmem>>, vector<16x8xf32>
    %cst_152 = arith.constant dense<0.000000e+00> : vector<8x16xf32>
    %381 = tpu.matmul %379, %380, %cst_152 {dimension_numbers = #tpu.dot_dimension_numbers<[1], [1], [0], [0], [0, 0, 1, 0], [], []>} : vector<8x8xf32>, vector<16x8xf32>, vector<8x16xf32> -> vector<8x16xf32>
    %c1080 = arith.constant 1080 : index
    %c0_153 = arith.constant 0 : index
    %382 = vector.load %arg1[%c1080, %c0_153] : memref<1400x128xf32, #tpu.memory_space<vmem>>, vector<1x16xf32>
    %383 = vector.broadcast %382 : vector<1x16xf32> to vector<8x16xf32>
    %384 = arith.addf %381, %383 : vector<8x16xf32>
    %385 = arith.addf %372, %384 : vector<8x16xf32>
    %c1120 = arith.constant 1120 : index
    %c0_154 = arith.constant 0 : index
    %386 = vector.load %arg1[%c1120, %c0_154] : memref<1400x128xf32, #tpu.memory_space<vmem>>, vector<1x16xf32>
    %c1128 = arith.constant 1128 : index
    %c0_155 = arith.constant 0 : index
    %387 = vector.load %arg1[%c1128, %c0_155] : memref<1400x128xf32, #tpu.memory_space<vmem>>, vector<1x16xf32>
    %cst_156 = arith.constant dense<0.000000e+00> : vector<8xf32>
    %388 = vector.multi_reduction <add>, %385, %cst_156 [1] : vector<8x16xf32> to vector<8xf32>
    %389 = vector.shape_cast %388 : vector<8xf32> to vector<8x1xf32>
    %cst_157 = arith.constant 1.600000e+01 : f32
    %390 = vector.broadcast %cst_157 : f32 to vector<8x1xf32>
    %391 = arith.divf %389, %390 : vector<8x1xf32>
    %392 = vector.broadcast %391 : vector<8x1xf32> to vector<8x16xf32>
    %393 = arith.subf %385, %392 : vector<8x16xf32>
    %394 = vector.broadcast %391 : vector<8x1xf32> to vector<8x16xf32>
    %395 = arith.subf %385, %394 : vector<8x16xf32>
    %396 = arith.mulf %393, %395 : vector<8x16xf32>
    %cst_158 = arith.constant dense<0.000000e+00> : vector<8xf32>
    %397 = vector.multi_reduction <add>, %396, %cst_158 [1] : vector<8x16xf32> to vector<8xf32>
    %398 = vector.shape_cast %397 : vector<8xf32> to vector<8x1xf32>
    %cst_159 = arith.constant 1.600000e+01 : f32
    %399 = vector.broadcast %cst_159 : f32 to vector<8x1xf32>
    %400 = arith.divf %398, %399 : vector<8x1xf32>
    %401 = vector.broadcast %391 : vector<8x1xf32> to vector<8x16xf32>
    %402 = arith.subf %385, %401 : vector<8x16xf32>
    %cst_160 = arith.constant 9.99999974E-6 : f32
    %403 = vector.broadcast %cst_160 : f32 to vector<8x1xf32>
    %404 = arith.addf %400, %403 : vector<8x1xf32>
    %405 = math.rsqrt %404 : vector<8x1xf32>
    %406 = vector.broadcast %405 : vector<8x1xf32> to vector<8x16xf32>
    %407 = arith.mulf %402, %406 : vector<8x16xf32>
    %408 = vector.broadcast %386 : vector<1x16xf32> to vector<8x16xf32>
    %409 = arith.mulf %407, %408 : vector<8x16xf32>
    %410 = vector.broadcast %387 : vector<1x16xf32> to vector<8x16xf32>
    %411 = arith.addf %409, %410 : vector<8x16xf32>
    %c1184 = arith.constant 1184 : index
    %c0_161 = arith.constant 0 : index
    %412 = vector.load %arg1[%c1184, %c0_161] : memref<1400x128xf32, #tpu.memory_space<vmem>>, vector<1x48xf32>
    %c1136 = arith.constant 1136 : index
    %c0_162 = arith.constant 0 : index
    %413 = vector.load %arg1[%c1136, %c0_162] : memref<1400x128xf32, #tpu.memory_space<vmem>>, vector<48x16xf32>
    %cst_163 = arith.constant dense<0.000000e+00> : vector<8x48xf32>
    %414 = tpu.matmul %411, %413, %cst_163 {dimension_numbers = #tpu.dot_dimension_numbers<[1], [1], [0], [0], [0, 0, 1, 0], [], []>} : vector<8x16xf32>, vector<48x16xf32>, vector<8x48xf32> -> vector<8x48xf32>
    %415 = vector.broadcast %412 : vector<1x48xf32> to vector<8x48xf32>
    %416 = arith.addf %414, %415 : vector<8x48xf32>
    %417 = vector.extract_strided_slice %416 {offsets = [0, 0], sizes = [8, 16], strides = [1, 1]} : vector<8x48xf32> to vector<8x16xf32>
    %418 = vector.extract_strided_slice %416 {offsets = [0, 16], sizes = [8, 16], strides = [1, 1]} : vector<8x48xf32> to vector<8x16xf32>
    %419 = vector.extract_strided_slice %416 {offsets = [0, 32], sizes = [8, 16], strides = [1, 1]} : vector<8x48xf32> to vector<8x16xf32>
    %c312_164 = arith.constant 312 : index
    %c0_165 = arith.constant 0 : index
    %420 = vector.load %arg1[%c312_164, %c0_165] : memref<1400x128xf32, #tpu.memory_space<vmem>>, vector<64x8xf32>
    %c152_166 = arith.constant 152 : index
    %c0_167 = arith.constant 0 : index
    %421 = vector.load %arg1[%c152_166, %c0_167] : memref<1400x128xf32, #tpu.memory_space<vmem>>, vector<64x16xf32>
    %cst_168 = arith.constant dense<0.000000e+00> : vector<64x16xf32>
    %422 = tpu.matmul %420, %418, %cst_168 {dimension_numbers = #tpu.dot_dimension_numbers<[1], [0], [0], [1], [0, 0, 1, 1], [], []>} : vector<64x8xf32>, vector<8x16xf32>, vector<64x16xf32> -> vector<64x16xf32>
    %423 = arith.mulf %422, %421 : vector<64x16xf32>
    %cst_169 = arith.constant dense<0.000000e+00> : vector<64x16xf32>
    %424 = tpu.matmul %420, %419, %cst_169 {dimension_numbers = #tpu.dot_dimension_numbers<[1], [0], [0], [1], [0, 0, 1, 1], [], []>} : vector<64x8xf32>, vector<8x16xf32>, vector<64x16xf32> -> vector<64x16xf32>
    %425 = arith.mulf %424, %421 : vector<64x16xf32>
    %cst_170 = arith.constant dense<0.000000e+00> : vector<8x64xf32>
    %426 = tpu.matmul %417, %423, %cst_170 {dimension_numbers = #tpu.dot_dimension_numbers<[1], [1], [0], [0], [0, 0, 1, 0], [], []>} : vector<8x16xf32>, vector<64x16xf32>, vector<8x64xf32> -> vector<8x64xf32>
    %cst_171 = arith.constant 0.707106769 : f32
    %427 = vector.broadcast %cst_171 : f32 to vector<8x64xf32>
    %428 = arith.mulf %426, %427 : vector<8x64xf32>
    %c552_172 = arith.constant 552 : index
    %c0_173 = arith.constant 0 : index
    %429 = vector.load %arg1[%c552_172, %c0_173] : memref<1400x128xf32, #tpu.memory_space<vmem>>, vector<8x64xf32>
    %430 = arith.addf %428, %429 : vector<8x64xf32>
    %cst_174 = arith.constant dense<0xFF800000> : vector<8xf32>
    %431 = vector.multi_reduction <maximumf>, %430, %cst_174 [1] : vector<8x64xf32> to vector<8xf32>
    %432 = vector.shape_cast %431 : vector<8xf32> to vector<8x1xf32>
    %433 = vector.broadcast %432 : vector<8x1xf32> to vector<8x64xf32>
    %434 = arith.subf %430, %433 : vector<8x64xf32>
    %435 = math.exp %434 : vector<8x64xf32>
    %c472_175 = arith.constant 472 : index
    %c0_176 = arith.constant 0 : index
    %436 = vector.load %arg1[%c472_175, %c0_176] : memref<1400x128xf32, #tpu.memory_space<vmem>>, vector<64x64xf32>
    %cst_177 = arith.constant dense<0.000000e+00> : vector<8x64xf32>
    %437 = tpu.matmul %435, %436, %cst_177 {dimension_numbers = #tpu.dot_dimension_numbers<[1], [0], [0], [1], [0, 0, 1, 1], [], []>} : vector<8x64xf32>, vector<64x64xf32>, vector<8x64xf32> -> vector<8x64xf32>
    %438 = tpu.reciprocal %437 {approx = true} : vector<8x64xf32> -> vector<8x64xf32>
    %439 = arith.mulf %435, %438 : vector<8x64xf32>
    %cst_178 = arith.constant dense<0.000000e+00> : vector<8x16xf32>
    %440 = tpu.matmul %439, %425, %cst_178 {dimension_numbers = #tpu.dot_dimension_numbers<[1], [0], [0], [1], [0, 0, 1, 1], [], []>} : vector<8x64xf32>, vector<64x16xf32>, vector<8x16xf32> -> vector<8x16xf32>
    %c1192 = arith.constant 1192 : index
    %c0_179 = arith.constant 0 : index
    %441 = vector.load %arg1[%c1192, %c0_179] : memref<1400x128xf32, #tpu.memory_space<vmem>>, vector<16x16xf32>
    %cst_180 = arith.constant dense<0.000000e+00> : vector<8x16xf32>
    %442 = tpu.matmul %440, %441, %cst_180 {dimension_numbers = #tpu.dot_dimension_numbers<[1], [1], [0], [0], [0, 0, 1, 0], [], []>} : vector<8x16xf32>, vector<16x16xf32>, vector<8x16xf32> -> vector<8x16xf32>
    %c1208 = arith.constant 1208 : index
    %c0_181 = arith.constant 0 : index
    %443 = vector.load %arg1[%c1208, %c0_181] : memref<1400x128xf32, #tpu.memory_space<vmem>>, vector<1x16xf32>
    %444 = vector.broadcast %443 : vector<1x16xf32> to vector<8x16xf32>
    %445 = arith.addf %442, %444 : vector<8x16xf32>
    %446 = arith.addf %411, %445 : vector<8x16xf32>
    %c1336 = arith.constant 1336 : index
    %c0_182 = arith.constant 0 : index
    %447 = vector.load %arg1[%c1336, %c0_182] : memref<1400x128xf32, #tpu.memory_space<vmem>>, vector<1x16xf32>
    %c1344 = arith.constant 1344 : index
    %c0_183 = arith.constant 0 : index
    %448 = vector.load %arg1[%c1344, %c0_183] : memref<1400x128xf32, #tpu.memory_space<vmem>>, vector<1x16xf32>
    %cst_184 = arith.constant dense<0.000000e+00> : vector<8xf32>
    %449 = vector.multi_reduction <add>, %446, %cst_184 [1] : vector<8x16xf32> to vector<8xf32>
    %450 = vector.shape_cast %449 : vector<8xf32> to vector<8x1xf32>
    %cst_185 = arith.constant 1.600000e+01 : f32
    %451 = vector.broadcast %cst_185 : f32 to vector<8x1xf32>
    %452 = arith.divf %450, %451 : vector<8x1xf32>
    %453 = vector.broadcast %452 : vector<8x1xf32> to vector<8x16xf32>
    %454 = arith.subf %446, %453 : vector<8x16xf32>
    %455 = vector.broadcast %452 : vector<8x1xf32> to vector<8x16xf32>
    %456 = arith.subf %446, %455 : vector<8x16xf32>
    %457 = arith.mulf %454, %456 : vector<8x16xf32>
    %cst_186 = arith.constant dense<0.000000e+00> : vector<8xf32>
    %458 = vector.multi_reduction <add>, %457, %cst_186 [1] : vector<8x16xf32> to vector<8xf32>
    %459 = vector.shape_cast %458 : vector<8xf32> to vector<8x1xf32>
    %cst_187 = arith.constant 1.600000e+01 : f32
    %460 = vector.broadcast %cst_187 : f32 to vector<8x1xf32>
    %461 = arith.divf %459, %460 : vector<8x1xf32>
    %462 = vector.broadcast %452 : vector<8x1xf32> to vector<8x16xf32>
    %463 = arith.subf %446, %462 : vector<8x16xf32>
    %cst_188 = arith.constant 9.99999974E-6 : f32
    %464 = vector.broadcast %cst_188 : f32 to vector<8x1xf32>
    %465 = arith.addf %461, %464 : vector<8x1xf32>
    %466 = math.rsqrt %465 : vector<8x1xf32>
    %467 = vector.broadcast %466 : vector<8x1xf32> to vector<8x16xf32>
    %468 = arith.mulf %463, %467 : vector<8x16xf32>
    %469 = vector.broadcast %447 : vector<1x16xf32> to vector<8x16xf32>
    %470 = arith.mulf %468, %469 : vector<8x16xf32>
    %471 = vector.broadcast %448 : vector<1x16xf32> to vector<8x16xf32>
    %472 = arith.addf %470, %471 : vector<8x16xf32>
    %c1264 = arith.constant 1264 : index
    %c0_189 = arith.constant 0 : index
    %473 = vector.load %arg1[%c1264, %c0_189] : memref<1400x128xf32, #tpu.memory_space<vmem>>, vector<1x48xf32>
    %c1216 = arith.constant 1216 : index
    %c0_190 = arith.constant 0 : index
    %474 = vector.load %arg1[%c1216, %c0_190] : memref<1400x128xf32, #tpu.memory_space<vmem>>, vector<16x16xf32>
    %cst_191 = arith.constant dense<0.000000e+00> : vector<8x16xf32>
    %475 = tpu.matmul %472, %474, %cst_191 {dimension_numbers = #tpu.dot_dimension_numbers<[1], [1], [0], [0], [0, 0, 1, 0], [], []>} : vector<8x16xf32>, vector<16x16xf32>, vector<8x16xf32> -> vector<8x16xf32>
    %476 = vector.extract_strided_slice %473 {offsets = [0, 0], sizes = [1, 16], strides = [1, 1]} : vector<1x48xf32> to vector<1x16xf32>
    %477 = vector.broadcast %476 : vector<1x16xf32> to vector<8x16xf32>
    %478 = arith.addf %475, %477 : vector<8x16xf32>
    %c1232 = arith.constant 1232 : index
    %c0_192 = arith.constant 0 : index
    %479 = vector.load %arg1[%c1232, %c0_192] : memref<1400x128xf32, #tpu.memory_space<vmem>>, vector<32x16xf32>
    %cst_193 = arith.constant dense<0.000000e+00> : vector<12x32xf32>
    %480 = tpu.matmul %245, %479, %cst_193 {dimension_numbers = #tpu.dot_dimension_numbers<[1], [1], [0], [0], [0, 0, 1, 0], [], []>} : vector<12x16xf32>, vector<32x16xf32>, vector<12x32xf32> -> vector<12x32xf32>
    %481 = vector.extract_strided_slice %473 {offsets = [0, 16], sizes = [1, 32], strides = [1, 1]} : vector<1x48xf32> to vector<1x32xf32>
    %482 = vector.broadcast %481 : vector<1x32xf32> to vector<12x32xf32>
    %483 = arith.addf %480, %482 : vector<12x32xf32>
    %484 = vector.extract_strided_slice %483 {offsets = [0, 0], sizes = [12, 16], strides = [1, 1]} : vector<12x32xf32> to vector<12x16xf32>
    %485 = vector.extract_strided_slice %483 {offsets = [0, 16], sizes = [12, 16], strides = [1, 1]} : vector<12x32xf32> to vector<12x16xf32>
    %c216_194 = arith.constant 216 : index
    %c0_195 = arith.constant 0 : index
    %486 = vector.load %arg1[%c216_194, %c0_195] : memref<1400x128xf32, #tpu.memory_space<vmem>>, vector<96x12xf32>
    %c56_196 = arith.constant 56 : index
    %c0_197 = arith.constant 0 : index
    %487 = vector.load %arg1[%c56_196, %c0_197] : memref<1400x128xf32, #tpu.memory_space<vmem>>, vector<96x16xf32>
    %cst_198 = arith.constant dense<0.000000e+00> : vector<96x16xf32>
    %488 = tpu.matmul %486, %484, %cst_198 {dimension_numbers = #tpu.dot_dimension_numbers<[1], [0], [0], [1], [0, 0, 1, 1], [], []>} : vector<96x12xf32>, vector<12x16xf32>, vector<96x16xf32> -> vector<96x16xf32>
    %489 = arith.mulf %488, %487 : vector<96x16xf32>
    %cst_199 = arith.constant dense<0.000000e+00> : vector<96x16xf32>
    %490 = tpu.matmul %486, %485, %cst_199 {dimension_numbers = #tpu.dot_dimension_numbers<[1], [0], [0], [1], [0, 0, 1, 1], [], []>} : vector<96x12xf32>, vector<12x16xf32>, vector<96x16xf32> -> vector<96x16xf32>
    %491 = arith.mulf %490, %487 : vector<96x16xf32>
    %cst_200 = arith.constant dense<0.000000e+00> : vector<8x96xf32>
    %492 = tpu.matmul %478, %489, %cst_200 {dimension_numbers = #tpu.dot_dimension_numbers<[1], [1], [0], [0], [0, 0, 1, 0], [], []>} : vector<8x16xf32>, vector<96x16xf32>, vector<8x96xf32> -> vector<8x96xf32>
    %cst_201 = arith.constant 0.707106769 : f32
    %493 = vector.broadcast %cst_201 : f32 to vector<8x96xf32>
    %494 = arith.mulf %492, %493 : vector<8x96xf32>
    %c560_202 = arith.constant 560 : index
    %c0_203 = arith.constant 0 : index
    %495 = vector.load %arg1[%c560_202, %c0_203] : memref<1400x128xf32, #tpu.memory_space<vmem>>, vector<8x96xf32>
    %496 = arith.addf %494, %495 : vector<8x96xf32>
    %cst_204 = arith.constant dense<0xFF800000> : vector<8xf32>
    %497 = vector.multi_reduction <maximumf>, %496, %cst_204 [1] : vector<8x96xf32> to vector<8xf32>
    %498 = vector.shape_cast %497 : vector<8xf32> to vector<8x1xf32>
    %499 = vector.broadcast %498 : vector<8x1xf32> to vector<8x96xf32>
    %500 = arith.subf %496, %499 : vector<8x96xf32>
    %501 = math.exp %500 : vector<8x96xf32>
    %c376_205 = arith.constant 376 : index
    %c0_206 = arith.constant 0 : index
    %502 = vector.load %arg1[%c376_205, %c0_206] : memref<1400x128xf32, #tpu.memory_space<vmem>>, vector<96x96xf32>
    %cst_207 = arith.constant dense<0.000000e+00> : vector<8x96xf32>
    %503 = tpu.matmul %501, %502, %cst_207 {dimension_numbers = #tpu.dot_dimension_numbers<[1], [0], [0], [1], [0, 0, 1, 1], [], []>} : vector<8x96xf32>, vector<96x96xf32>, vector<8x96xf32> -> vector<8x96xf32>
    %504 = tpu.reciprocal %503 {approx = true} : vector<8x96xf32> -> vector<8x96xf32>
    %505 = arith.mulf %501, %504 : vector<8x96xf32>
    %cst_208 = arith.constant dense<0.000000e+00> : vector<8x16xf32>
    %506 = tpu.matmul %505, %491, %cst_208 {dimension_numbers = #tpu.dot_dimension_numbers<[1], [0], [0], [1], [0, 0, 1, 1], [], []>} : vector<8x96xf32>, vector<96x16xf32>, vector<8x16xf32> -> vector<8x16xf32>
    %c1272 = arith.constant 1272 : index
    %c0_209 = arith.constant 0 : index
    %507 = vector.load %arg1[%c1272, %c0_209] : memref<1400x128xf32, #tpu.memory_space<vmem>>, vector<16x16xf32>
    %cst_210 = arith.constant dense<0.000000e+00> : vector<8x16xf32>
    %508 = tpu.matmul %506, %507, %cst_210 {dimension_numbers = #tpu.dot_dimension_numbers<[1], [1], [0], [0], [0, 0, 1, 0], [], []>} : vector<8x16xf32>, vector<16x16xf32>, vector<8x16xf32> -> vector<8x16xf32>
    %c1288 = arith.constant 1288 : index
    %c0_211 = arith.constant 0 : index
    %509 = vector.load %arg1[%c1288, %c0_211] : memref<1400x128xf32, #tpu.memory_space<vmem>>, vector<1x16xf32>
    %510 = vector.broadcast %509 : vector<1x16xf32> to vector<8x16xf32>
    %511 = arith.addf %508, %510 : vector<8x16xf32>
    %512 = arith.addf %472, %511 : vector<8x16xf32>
    %c1352 = arith.constant 1352 : index
    %c0_212 = arith.constant 0 : index
    %513 = vector.load %arg1[%c1352, %c0_212] : memref<1400x128xf32, #tpu.memory_space<vmem>>, vector<1x16xf32>
    %c1360 = arith.constant 1360 : index
    %c0_213 = arith.constant 0 : index
    %514 = vector.load %arg1[%c1360, %c0_213] : memref<1400x128xf32, #tpu.memory_space<vmem>>, vector<1x16xf32>
    %cst_214 = arith.constant dense<0.000000e+00> : vector<8xf32>
    %515 = vector.multi_reduction <add>, %512, %cst_214 [1] : vector<8x16xf32> to vector<8xf32>
    %516 = vector.shape_cast %515 : vector<8xf32> to vector<8x1xf32>
    %cst_215 = arith.constant 1.600000e+01 : f32
    %517 = vector.broadcast %cst_215 : f32 to vector<8x1xf32>
    %518 = arith.divf %516, %517 : vector<8x1xf32>
    %519 = vector.broadcast %518 : vector<8x1xf32> to vector<8x16xf32>
    %520 = arith.subf %512, %519 : vector<8x16xf32>
    %521 = vector.broadcast %518 : vector<8x1xf32> to vector<8x16xf32>
    %522 = arith.subf %512, %521 : vector<8x16xf32>
    %523 = arith.mulf %520, %522 : vector<8x16xf32>
    %cst_216 = arith.constant dense<0.000000e+00> : vector<8xf32>
    %524 = vector.multi_reduction <add>, %523, %cst_216 [1] : vector<8x16xf32> to vector<8xf32>
    %525 = vector.shape_cast %524 : vector<8xf32> to vector<8x1xf32>
    %cst_217 = arith.constant 1.600000e+01 : f32
    %526 = vector.broadcast %cst_217 : f32 to vector<8x1xf32>
    %527 = arith.divf %525, %526 : vector<8x1xf32>
    %528 = vector.broadcast %518 : vector<8x1xf32> to vector<8x16xf32>
    %529 = arith.subf %512, %528 : vector<8x16xf32>
    %cst_218 = arith.constant 9.99999974E-6 : f32
    %530 = vector.broadcast %cst_218 : f32 to vector<8x1xf32>
    %531 = arith.addf %527, %530 : vector<8x1xf32>
    %532 = math.rsqrt %531 : vector<8x1xf32>
    %533 = vector.broadcast %532 : vector<8x1xf32> to vector<8x16xf32>
    %534 = arith.mulf %529, %533 : vector<8x16xf32>
    %535 = vector.broadcast %513 : vector<1x16xf32> to vector<8x16xf32>
    %536 = arith.mulf %534, %535 : vector<8x16xf32>
    %537 = vector.broadcast %514 : vector<1x16xf32> to vector<8x16xf32>
    %538 = arith.addf %536, %537 : vector<8x16xf32>
    %c1296 = arith.constant 1296 : index
    %c0_219 = arith.constant 0 : index
    %539 = vector.load %arg1[%c1296, %c0_219] : memref<1400x128xf32, #tpu.memory_space<vmem>>, vector<8x16xf32>
    %cst_220 = arith.constant dense<0.000000e+00> : vector<8x8xf32>
    %540 = tpu.matmul %538, %539, %cst_220 {dimension_numbers = #tpu.dot_dimension_numbers<[1], [1], [0], [0], [0, 0, 1, 0], [], []>} : vector<8x16xf32>, vector<8x16xf32>, vector<8x8xf32> -> vector<8x8xf32>
    %c1304 = arith.constant 1304 : index
    %c0_221 = arith.constant 0 : index
    %541 = vector.load %arg1[%c1304, %c0_221] : memref<1400x128xf32, #tpu.memory_space<vmem>>, vector<1x8xf32>
    %542 = vector.broadcast %541 : vector<1x8xf32> to vector<8x8xf32>
    %543 = arith.addf %540, %542 : vector<8x8xf32>
    %cst_222 = arith.constant 0.000000e+00 : f32
    %544 = vector.broadcast %cst_222 : f32 to vector<8x8xf32>
    %545 = arith.maximumf %543, %544 : vector<8x8xf32>
    %c1312 = arith.constant 1312 : index
    %c0_223 = arith.constant 0 : index
    %546 = vector.load %arg1[%c1312, %c0_223] : memref<1400x128xf32, #tpu.memory_space<vmem>>, vector<16x8xf32>
    %cst_224 = arith.constant dense<0.000000e+00> : vector<8x16xf32>
    %547 = tpu.matmul %545, %546, %cst_224 {dimension_numbers = #tpu.dot_dimension_numbers<[1], [1], [0], [0], [0, 0, 1, 0], [], []>} : vector<8x8xf32>, vector<16x8xf32>, vector<8x16xf32> -> vector<8x16xf32>
    %c1328 = arith.constant 1328 : index
    %c0_225 = arith.constant 0 : index
    %548 = vector.load %arg1[%c1328, %c0_225] : memref<1400x128xf32, #tpu.memory_space<vmem>>, vector<1x16xf32>
    %549 = vector.broadcast %548 : vector<1x16xf32> to vector<8x16xf32>
    %550 = arith.addf %547, %549 : vector<8x16xf32>
    %551 = arith.addf %538, %550 : vector<8x16xf32>
    %c1368 = arith.constant 1368 : index
    %c0_226 = arith.constant 0 : index
    %552 = vector.load %arg1[%c1368, %c0_226] : memref<1400x128xf32, #tpu.memory_space<vmem>>, vector<1x16xf32>
    %c1376 = arith.constant 1376 : index
    %c0_227 = arith.constant 0 : index
    %553 = vector.load %arg1[%c1376, %c0_227] : memref<1400x128xf32, #tpu.memory_space<vmem>>, vector<1x16xf32>
    %cst_228 = arith.constant dense<0.000000e+00> : vector<8xf32>
    %554 = vector.multi_reduction <add>, %551, %cst_228 [1] : vector<8x16xf32> to vector<8xf32>
    %555 = vector.shape_cast %554 : vector<8xf32> to vector<8x1xf32>
    %cst_229 = arith.constant 1.600000e+01 : f32
    %556 = vector.broadcast %cst_229 : f32 to vector<8x1xf32>
    %557 = arith.divf %555, %556 : vector<8x1xf32>
    %558 = vector.broadcast %557 : vector<8x1xf32> to vector<8x16xf32>
    %559 = arith.subf %551, %558 : vector<8x16xf32>
    %560 = vector.broadcast %557 : vector<8x1xf32> to vector<8x16xf32>
    %561 = arith.subf %551, %560 : vector<8x16xf32>
    %562 = arith.mulf %559, %561 : vector<8x16xf32>
    %cst_230 = arith.constant dense<0.000000e+00> : vector<8xf32>
    %563 = vector.multi_reduction <add>, %562, %cst_230 [1] : vector<8x16xf32> to vector<8xf32>
    %564 = vector.shape_cast %563 : vector<8xf32> to vector<8x1xf32>
    %cst_231 = arith.constant 1.600000e+01 : f32
    %565 = vector.broadcast %cst_231 : f32 to vector<8x1xf32>
    %566 = arith.divf %564, %565 : vector<8x1xf32>
    %567 = vector.broadcast %557 : vector<8x1xf32> to vector<8x16xf32>
    %568 = arith.subf %551, %567 : vector<8x16xf32>
    %cst_232 = arith.constant 9.99999974E-6 : f32
    %569 = vector.broadcast %cst_232 : f32 to vector<8x1xf32>
    %570 = arith.addf %566, %569 : vector<8x1xf32>
    %571 = math.rsqrt %570 : vector<8x1xf32>
    %572 = vector.broadcast %571 : vector<8x1xf32> to vector<8x16xf32>
    %573 = arith.mulf %568, %572 : vector<8x16xf32>
    %574 = vector.broadcast %552 : vector<1x16xf32> to vector<8x16xf32>
    %575 = arith.mulf %573, %574 : vector<8x16xf32>
    %576 = vector.broadcast %553 : vector<1x16xf32> to vector<8x16xf32>
    %577 = arith.addf %575, %576 : vector<8x16xf32>
    %c1384 = arith.constant 1384 : index
    %c0_233 = arith.constant 0 : index
    %578 = vector.load %arg1[%c1384, %c0_233] : memref<1400x128xf32, #tpu.memory_space<vmem>>, vector<1x16xf32>
    %c1392 = arith.constant 1392 : index
    %c0_234 = arith.constant 0 : index
    %579 = vector.load %arg1[%c1392, %c0_234] : memref<1400x128xf32, #tpu.memory_space<vmem>>, vector<1x16xf32>
    %cst_235 = arith.constant dense<0.000000e+00> : vector<8xf32>
    %580 = vector.multi_reduction <add>, %577, %cst_235 [1] : vector<8x16xf32> to vector<8xf32>
    %581 = vector.shape_cast %580 : vector<8xf32> to vector<8x1xf32>
    %cst_236 = arith.constant 1.600000e+01 : f32
    %582 = vector.broadcast %cst_236 : f32 to vector<8x1xf32>
    %583 = arith.divf %581, %582 : vector<8x1xf32>
    %584 = vector.broadcast %583 : vector<8x1xf32> to vector<8x16xf32>
    %585 = arith.subf %577, %584 : vector<8x16xf32>
    %586 = vector.broadcast %583 : vector<8x1xf32> to vector<8x16xf32>
    %587 = arith.subf %577, %586 : vector<8x16xf32>
    %588 = arith.mulf %585, %587 : vector<8x16xf32>
    %cst_237 = arith.constant dense<0.000000e+00> : vector<8xf32>
    %589 = vector.multi_reduction <add>, %588, %cst_237 [1] : vector<8x16xf32> to vector<8xf32>
    %590 = vector.shape_cast %589 : vector<8xf32> to vector<8x1xf32>
    %cst_238 = arith.constant 1.600000e+01 : f32
    %591 = vector.broadcast %cst_238 : f32 to vector<8x1xf32>
    %592 = arith.divf %590, %591 : vector<8x1xf32>
    %593 = vector.broadcast %583 : vector<8x1xf32> to vector<8x16xf32>
    %594 = arith.subf %577, %593 : vector<8x16xf32>
    %cst_239 = arith.constant 9.99999974E-6 : f32
    %595 = vector.broadcast %cst_239 : f32 to vector<8x1xf32>
    %596 = arith.addf %592, %595 : vector<8x1xf32>
    %597 = math.rsqrt %596 : vector<8x1xf32>
    %598 = vector.broadcast %597 : vector<8x1xf32> to vector<8x16xf32>
    %599 = arith.mulf %594, %598 : vector<8x16xf32>
    %600 = vector.broadcast %578 : vector<1x16xf32> to vector<8x16xf32>
    %601 = arith.mulf %599, %600 : vector<8x16xf32>
    %602 = vector.broadcast %579 : vector<1x16xf32> to vector<8x16xf32>
    %603 = arith.addf %601, %602 : vector<8x16xf32>
    %c0_240 = arith.constant 0 : index
    %c0_241 = arith.constant 0 : index
    %604 = vector.load %arg1[%c0_240, %c0_241] : memref<1400x128xf32, #tpu.memory_space<vmem>>, vector<16x128xf32>
    %cst_242 = arith.constant dense<0.000000e+00> : vector<8x128xf32>
    %605 = tpu.matmul %603, %604, %cst_242 {dimension_numbers = #tpu.dot_dimension_numbers<[1], [0], [0], [1], [0, 0, 1, 1], [], []>} : vector<8x16xf32>, vector<16x128xf32>, vector<8x128xf32> -> vector<8x128xf32>
    %c16 = arith.constant 16 : index
    %c0_243 = arith.constant 0 : index
    %606 = vector.load %arg1[%c16, %c0_243] : memref<1400x128xf32, #tpu.memory_space<vmem>>, vector<1x128xf32>
    %607 = vector.broadcast %606 : vector<1x128xf32> to vector<8x128xf32>
    %608 = arith.addf %605, %607 : vector<8x128xf32>
    %c0_244 = arith.constant 0 : index
    %c0_245 = arith.constant 0 : index
    %609 = vector.load %arg2[%c0_244, %c0_245] : memref<8x128xf32, #tpu.memory_space<vmem>>, vector<8x128xf32>
    tpu.vector_store %arg2[%c0_244, %c0_245], %608 {strides = array<i32>} : memref<8x128xf32, #tpu.memory_space<vmem>>, vector<8x128xf32>,
    return
  }
}

</mosaic_0001>

<bundles_post_ra>
// kernel: transformer_forward.1
= control target key start
LH: loop header
LB: loop body
LE: loop exit
PB: predicated region body
PF: predicated region fallthrough
CT: control target
= control target key end

     0   :  { %7 = vsyncpa [#allocation3], 0  ;;  %s7916_s9 = smov [#allocation2]   ;;  %s9224_s0 = inlined_call_operand.vmem [shape: s32[24,1], index: 0, kind: input, shape index: {}]   ;;  %s9225_s1 = inlined_call_operand.hbm [shape: f32[1400,128], index: 1, kind: input, shape index: {}]   ;;  %s9226_s2 = inlined_call_operand.vmem [shape: f32[8,128], index: 2, kind: output, shape index: {}]  }
   0x1   :  { %s15_s10 = sshll.u32 %s7916_s9, 4  ;;  %s16_s10 = int_to_ptr.vmem [resolvable:$true] %s15_s10 }
   0x2   :  { %s7902_s11 = scalar_lea.vmem %s16_s10, 22400  ;;  %p7907_p1 = scmp.lt.s32.totalorder %s16_s10, %s16_s10 }
   0x3   :  { %p7903_p0 = scmp.ne.s32.totalorder %s16_s10, %s7902_s11  ;;  %p7908_p2 = scmp.lt.s32.totalorder %s7902_s11, %s7902_s11 }
   0x5   :  { %p7909_p3 = por %p7908_p2, %p7907_p1 }
   0x7   :  { %p7910_p4 = pnand %p7909_p3, %p7903_p0 }
   0x9   :  { %7913 = shalt.err (!%p7910_p4)
}
   0xa   :  { %s7917_s12 = smov 128   ;;  %s7918_s13 = smov 8  }
   0xb   :  { %21 = dma.hbm_to_vmem [thread:$0]  %s9225_s1, 22400, %s16_s10, [#allocation3], %s7917_s12, %s7917_s12, %s7918_s13  }
   0xc   :  { %7914 = dma.done.wait [#allocation3], 22400  }
   0xd   :  { %7915 = vsyncadd [#allocation3], 4294944896  ;;  %v7919_v0 = vmov 0   ;;  %v7920_v1 = vmov 0.0   ;;  %vm7921_vm0 = vmmov 0   ;;  %v25_v2 = vld [vmem:[%s9224_s0] sm:$0xff]  ;;  %v28_v10 = vlaneseq }
   0xe   :  { %7751 = vset.pattern.permute.xlu0 %v7919_v0  ;;  %6866 = vmatprep.subr.mxu0 %v7920_v1  ;;  %v49_v3 = vld [vmem:[#allocation2 + $0x8] sm:$0xff]  ;;  %v48_v5 = vld [vmem:[#allocation2] sm:$0xff]  ;;  %vm159_vm1 = vcmask 130048   ;;  %v153_v7 = vld [vmem:[#allocation2 + $0x258] sm:$0xff]  ;;  %v7922_v13 = vmov 1.0   ;;  %vm290_vm5 = vcmask 97280  }
   0xf   :  { %7752 = vset.pattern.permute.xlu1 %v7919_v0  ;;  %6870 = vmatprep.mubr.msk.f32.mxu0 %vm7921_vm0, %v7920_v1  ;;  %v26_v4 = vld [vmem:[%s9224_s0 + $0x8] sm:$0xff]  ;;  %v154_v6 = vld [vmem:[#allocation2 + $0x260] sm:$0xff]  ;;  %v152_v8 = vld [vmem:[#allocation2 + $0x250] sm:$0xff]  ;;  %v29_v11 = vand.u32 127, %v28_v10  ;;  %s7924_s21 = smov 96   ;;  %vm327_vm6 = vcmask 1043456  }
  0x10   :  { %31 = vperm.xlu0 %7751, %v25_v2   ;;  %6867 = vmatpush3.xpose.msra.mxu0 %v49_v3  ;;  %v151_v9 = vld [vmem:[#allocation2 + $0x248] sm:$0xff]  ;;  %v150_v15 = vld [vmem:[#allocation2 + $0x240] sm:$0xff]  ;;  %v149_v16 = vld [vmem:[#allocation2 + $0x238] sm:$0xff]  ;;  %vm736_vm7 = vcmask 781312   ;;  %vm732_vm8 = vcmask 785408   ;;  %vm1025_vm9 = vcmask 125952  }
  0x11   :  { %6868 = vmatprep.subr.mxu0 %v7920_v1  ;;  %6879 = vmatprep.subr.msk.mxu1 %vm159_vm1, %v154_v6  ;;  %v27_v17 = vld [vmem:[%s9224_s0 + $0x10] sm:$0xff]  ;;  %v6038_v18 = vld [vmem:[#allocation2 + $0x18] ss:$0 sm:$0xff]  ;;  %v6039_v20 = vld [vmem:[#allocation2 + $0x20] ss:$0 sm:$0xff]  ;;  %s7923_s0 = smov 112  }
  0x12   :  { %6880 = vmatpush3.xpose.msk.msra.mxu1 %vm159_vm1, %v154_v6  ;;  %37 = vperm.xlu1 %7752, %v27_v17   ;;  %v7980_v29 = vld [vmem:[#allocation2 + $0xd8] sm:$0xff]  ;;  %v6040_v30 = vld [vmem:[#allocation2 + $0x268] ss:$0 sm:$0xff]  ;;  %v8000_v39 = vld [vmem:[#allocation2 + $0xe0] sm:$0xff]  ;;  %vm1161_vm10 = vcmask 64512   ;;  %vm2866_vm11 = vcmask 523264  }
  0x13   :  { %6881 = vmatprep.subr.msk.mxu1 %vm159_vm1, %v153_v7  ;;  %v8002_v40 = vld [vmem:[#allocation2 + $0xe8] sm:$0xff]  ;;  %v8010_v42 = vld [vmem:[#allocation2 + $0xf0] sm:$0xff]  ;;  %v8012_v43 = vld [vmem:[#allocation2 + $0xf8] sm:$0xff] }
  0x14   :  { %34 = vperm.xlu0 %7751, %v26_v4   ;;  %6869 = vmatpush3.xpose.msra.mxu0 %v48_v5  ;;  %v8018_v44 = vld [vmem:[#allocation2 + $0x100] sm:$0xff]  ;;  %v8020_v45 = vld [vmem:[#allocation2 + $0x108] sm:$0xff]  ;;  %v8026_v46 = vld [vmem:[#allocation2 + $0x110] sm:$0xff] }
  0x15   :  { %v8028_v47 = vld [vmem:[#allocation2 + $0x118] sm:$0xff]  ;;  %v8034_v48 = vld [vmem:[#allocation2 + $0x120] sm:$0xff]  ;;  %v8036_v49 = vld [vmem:[#allocation2 + $0x128] sm:$0xff] }
  0x16   :  { %6882 = vmatpush3.xpose.msk.msra.mxu1 %vm159_vm1, %v153_v7  ;;  %v8042_v50 = vld [vmem:[#allocation2 + $0x130] sm:$0xff]  ;;  %v8050_v63 = vld [vmem:[#allocation2 + $0x88] sm:$0xff]  ;;  %v8055_v4 = vld [vmem:[#allocation2 + $0x80] sm:$0xff] }
  0x17   :  { %6883 = vmatprep.subr.msk.mxu1 %vm159_vm1, %v152_v8  ;;  %v8048_v61 = vld [vmem:[#allocation2 + $0x90] sm:$0xff]  ;;  %v8060_v6 = vld [vmem:[#allocation2 + $0x78] sm:$0xff]  ;;  %v8070_v10 = vld [vmem:[#allocation2 + $0x68] sm:$0xff] }
  0x1a   :  { %6884 = vmatpush3.xpose.msk.msra.mxu1 %vm159_vm1, %v152_v8  ;;  %v8065_v8 = vld [vmem:[#allocation2 + $0x70] sm:$0xff] }
  0x1b   :  { %6885 = vmatprep.subr.msk.mxu1 %vm159_vm1, %v151_v9 }
  0x1e   :  { %6886 = vmatpush3.xpose.msk.msra.mxu1 %vm159_vm1, %v151_v9 }
  0x1f   :  { %6887 = vmatprep.subr.msk.mxu1 %vm159_vm1, %v150_v15 }
  0x22   :  { %6888 = vmatpush3.xpose.msk.msra.mxu1 %vm159_vm1, %v150_v15 }
  0x23   :  { %6889 = vmatprep.subr.msk.mxu1 %vm159_vm1, %v149_v16 }
  0x26   :  { %6890 = vmatpush3.xpose.msk.msra.mxu1 %vm159_vm1, %v149_v16  ;;  %v8085_v16 = vld [vmem:[#allocation2 + $0x50] sm:$0xff] }
  0x8b   :  { %v32_v12 = vpop.permute.xlu0 %31 }
  0x8c   :  { %vm39_vm2 = vcmp.eq.s32.totalorder %v29_v11, %v32_v12  ;;  %v8075_v12 = vld [vmem:[#allocation2 + $0x60] sm:$0xff] }
  0x8d   :  { %6871 = vmatmul.mubr.msk.f32.vlgmr.msra.gmra.mxu0 %vm39_vm2, %v7922_v13  ;;  %v38_v28 = vpop.permute.xlu1 %37 }
  0x8e   :  { %6873 = vmatprep.mubr.msk.f32.mxu0 %vm7921_vm0, %v7920_v1  ;;  %vm41_vm4 = vcmp.eq.s32.totalorder %v29_v11, %v38_v28 }
  0x8f   :  { %v35_v14 = vpop.permute.xlu0 %34 }
  0x90   :  { %vm40_vm3 = vcmp.eq.s32.totalorder %v29_v11, %v35_v14  ;;  %v8080_v14 = vld [vmem:[#allocation2 + $0x58] sm:$0xff] }
  0x91   :  { %6874 = vmatmul.mubr.msk.f32.gmra.mxu0 %vm40_vm3, %v7922_v13 }
  0x92   :  { %6876 = vmatprep.mubr.msk.f32.mxu0 %vm7921_vm0, %v7920_v1 }
  0x95   :  { %6877 = vmatmul.mubr.msk.f32.gmra.mxu0 %vm41_vm4, %v7922_v13 }
  0x96   :  { %6898 = vmatprep.mubr.msk.f32.mxu0 %vm290_vm5, %v7980_v29 }
 0x14d   :  { %v116_v19 = vpop.f32.mrf.mxu0 }
 0x14e   :  { %v135_v21 = vadd.f32 %v6038_v18, %v116_v19 }
 0x14f   :  { %v6872_v22 = vpop.f32.mrf.mxu0 }
 0x150   :  { %v7972_v23 = vadd.f32 %v6039_v20, %v135_v21  ;;  %v8100_v22 = vld [vmem:[#allocation2 + $0x38] sm:$0xff] }
 0x151   :  { %v121_v24 = vpop.f32.mrf.mxu0 }
 0x152   :  { %v136_v25 = vadd.f32 %v6038_v18, %v121_v24  ;;  %6891 = vmatprep.mubr.msk.f32.mxu1 %vm159_vm1, %v7972_v23  ;;  %v8090_v18 = vld [vmem:[#allocation2 + $0x48] sm:$0xff] }
 0x153   :  { %v6875_v26 = vpop.f32.mrf.mxu0 }
 0x154   :  { %v7976_v27 = vadd.f32 %v6039_v20, %v136_v25  ;;  %v8095_v20 = vld [vmem:[#allocation2 + $0x40] sm:$0xff] }
 0x155   :  { %v7996_v35 = vpop.f32.mrf.mxu0  ;;  %v8110_v26 = vld [vmem:[#allocation2 + $0x220] sm:$0xf] }
 0x156   :  { %6892 = vmatmul.mubr.msk.f32.vlgmr.msra.gmra.mxu1 %vm159_vm1, %v7976_v27 }
 0x157   :  { %6920 = vmatprep.mubr.msk.f32.mxu1 %vm290_vm5, %v7980_v29  ;;  %v6878_v36 = vpop.f32.mrf.mxu0 }
 0x216   :  { %v6893_v31 = vpop.f32.mrf.mxu1 }
 0x217   :  { %v7986_v32 = vadd.f32 %v6893_v31, %v6040_v30  ;;  %v8112_v31 = vld [vmem:[#allocation2 + $0x218] sm:$0xff] }
 0x218   :  { %v250_v33 = vpop.f32.mrf.mxu1 }
 0x219   :  { %v7988_v34 = vadd.f32 %v6040_v30, %v250_v33  ;;  %287 = vrot.lane.b32.xlu1 %v7986_v32, %s7923_s0 }
 0x21b   :  { %285 = vrot.lane.b32.xlu0 %v7988_v34, %s7923_s0 }
 0x21d   :  { %469 = vrot.lane.b32.xlu1 %v7986_v32, %s7924_s21 }
 0x28b   :  { %v288_v37 = vpop.permute.xlu1 %287 }
 0x28c   :  { %6894 = vmatprep.subr.msk.mxu0 %vm327_vm6, %v288_v37 }
 0x28d   :  { %6895 = vmatpush3.msk.msra.mxu0 %vm327_vm6, %v288_v37  ;;  %v286_v38 = vpop.permute.xlu0 %285 }
 0x28e   :  { %6896 = vmatprep.subr.mxu0 %v286_v38 }
 0x28f   :  { %v470_v41 = vpop.permute.xlu1 %469  ;;  %6897 = vmatpush3.msra.mxu0 %v286_v38 }
 0x290   :  { %6899 = vmatmul.mubr.msk.f32.vlgmr.msra.gmra.mxu0 %vm290_vm5, %v8000_v39  ;;  %6916 = vmatprep.subr.msk.mxu1 %vm327_vm6, %v470_v41 }
 0x291   :  { %6917 = vmatpush3.msk.msra.mxu1 %vm327_vm6, %v470_v41  ;;  %6901 = vmatprep.mubr.msk.f32.mxu0 %vm290_vm5, %v8002_v40 }
 0x294   :  { %6902 = vmatmul.mubr.msk.f32.gmra.mxu0 %vm290_vm5, %v8010_v42 }
 0x295   :  { %6904 = vmatprep.mubr.msk.f32.mxu0 %vm290_vm5, %v8012_v43 }
 0x298   :  { %6905 = vmatmul.mubr.msk.f32.gmra.mxu0 %vm290_vm5, %v8018_v44 }
 0x299   :  { %6907 = vmatprep.mubr.msk.f32.mxu0 %vm290_vm5, %v8020_v45 }
 0x29c   :  { %6908 = vmatmul.mubr.msk.f32.gmra.mxu0 %vm290_vm5, %v8026_v46 }
 0x29d   :  { %6910 = vmatprep.mubr.msk.f32.mxu0 %vm290_vm5, %v8028_v47 }
 0x2a0   :  { %6911 = vmatmul.mubr.msk.f32.gmra.mxu0 %vm290_vm5, %v8034_v48 }
 0x2a1   :  { %6913 = vmatprep.mubr.msk.f32.mxu0 %vm290_vm5, %v8036_v49 }
 0x2a4   :  { %6914 = vmatmul.mubr.msk.f32.gmra.mxu0 %vm290_vm5, %v8042_v50 }
 0x2a5   :  { %6962 = vmatprep.mubr.msk.f32.mxu0 %vm159_vm1, %v7988_v34 }
 0x350   :  { %v6900_v51 = vpop.f32.mrf.mxu0 }
 0x351   :  { %v456_v21 = vmul.f32 %v6900_v51, %v8095_v20 }
 0x352   :  { %v396_v52 = vpop.f32.mrf.mxu0 }
 0x353   :  { %v455_v24 = vmul.f32 %v396_v52, %v8100_v22  ;;  %v8120_v52 = vld [vmem:[#allocation2 + $0x1d0] sm:$0xff] }
 0x354   :  { %v6903_v53 = vpop.f32.mrf.mxu0 }
 0x355   :  { %v458_v17 = vmul.f32 %v6903_v53, %v8085_v16 }
 0x356   :  { %v406_v54 = vpop.f32.mrf.mxu0 }
 0x357   :  { %v457_v19 = vmul.f32 %v406_v54, %v8090_v18 }
 0x358   :  { %v6906_v55 = vpop.f32.mrf.mxu0 }
 0x359   :  { %v460_v13 = vmul.f32 %v6906_v55, %v8075_v12  ;;  %v8122_v55 = vld [vmem:[#allocation2 + $0x1c8] sm:$0xff] }
 0x35a   :  { %v416_v56 = vpop.f32.mrf.mxu0 }
 0x35b   :  { %v459_v15 = vmul.f32 %v416_v56, %v8080_v14 }
 0x35c   :  { %v6909_v57 = vpop.f32.mrf.mxu0 }
 0x35d   :  { %v462_v9 = vmul.f32 %v6909_v57, %v8065_v8 }
 0x35e   :  { %v426_v58 = vpop.f32.mrf.mxu0 }
 0x35f   :  { %v461_v11 = vmul.f32 %v426_v58, %v8070_v10  ;;  %v8134_v58 = vld [vmem:[#allocation2 + $0x1b8] sm:$0xff] }
 0x360   :  { %v6912_v59 = vpop.f32.mrf.mxu0 }
 0x361   :  { %v464_v5 = vmul.f32 %v6912_v59, %v8055_v4  ;;  %v8142_v59 = vld [vmem:[#allocation2 + $0x1b0] sm:$0xff] }
 0x362   :  { %v436_v60 = vpop.f32.mrf.mxu0 }
 0x363   :  { %v463_v7 = vmul.f32 %v436_v60, %v8060_v6 }
 0x364   :  { %v6915_v62 = vpop.f32.mrf.mxu0 }
 0x365   :  { %v466_v0 = vmul.f32 %v6915_v62, %v8048_v61  ;;  %v8146_v62 = vld [vmem:[#allocation2 + $0x1a8] sm:$0xff] }
 0x366   :  { %v446_v2 = vpop.f32.mrf.mxu0 }
 0x367   :  { %v465_v3 = vmul.f32 %v446_v2, %v8050_v63  ;;  %6938 = vmatprep.subr.msk.mxu0 %vm159_vm1, %v466_v0  ;;  %v8158_v2 = vld [vmem:[#allocation2 + $0x198] sm:$0xff] }
 0x368   :  { %6939 = vmatpush3.xpose.msk.msra.mxu0 %vm159_vm1, %v466_v0  ;;  %v8154_v0 = vld [vmem:[#allocation2 + $0x1a0] sm:$0xff] }
 0x369   :  { %6940 = vmatprep.subr.msk.mxu0 %vm159_vm1, %v465_v3 }
 0x36c   :  { %6941 = vmatpush3.xpose.msk.msra.mxu0 %vm159_vm1, %v465_v3  ;;  %v8166_v3 = vld [vmem:[#allocation2 + $0x190] sm:$0xff] }
 0x36d   :  { %6942 = vmatprep.subr.msk.mxu0 %vm159_vm1, %v464_v5 }
 0x370   :  { %6943 = vmatpush3.xpose.msk.msra.mxu0 %vm159_vm1, %v464_v5  ;;  %v8170_v5 = vld [vmem:[#allocation2 + $0x188] sm:$0xff] }
 0x371   :  { %6944 = vmatprep.subr.msk.mxu0 %vm159_vm1, %v463_v7 }
 0x374   :  { %6945 = vmatpush3.xpose.msk.msra.mxu0 %vm159_vm1, %v463_v7  ;;  %v8178_v7 = vld [vmem:[#allocation2 + $0x180] sm:$0xff] }
 0x375   :  { %6946 = vmatprep.subr.msk.mxu0 %vm159_vm1, %v462_v9 }
 0x378   :  { %6947 = vmatpush3.xpose.msk.msra.mxu0 %vm159_vm1, %v462_v9  ;;  %v8182_v9 = vld [vmem:[#allocation2 + $0x178] sm:$0xff] }
 0x379   :  { %6948 = vmatprep.subr.msk.mxu0 %vm159_vm1, %v461_v11 }
 0x37c   :  { %6949 = vmatpush3.xpose.msk.msra.mxu0 %vm159_vm1, %v461_v11 }
 0x37d   :  { %6950 = vmatprep.subr.msk.mxu0 %vm159_vm1, %v460_v13 }
 0x380   :  { %6951 = vmatpush3.xpose.msk.msra.mxu0 %vm159_vm1, %v460_v13 }
 0x381   :  { %6952 = vmatprep.subr.msk.mxu0 %vm159_vm1, %v459_v15 }
 0x384   :  { %6953 = vmatpush3.xpose.msk.msra.mxu0 %vm159_vm1, %v459_v15  ;;  %v925_v15 = vld [vmem:[#allocation2 + $0x278] sm:$0xff] }
 0x385   :  { %6954 = vmatprep.subr.msk.mxu0 %vm159_vm1, %v458_v17 }
 0x388   :  { %6955 = vmatpush3.xpose.msk.msra.mxu0 %vm159_vm1, %v458_v17 }
 0x389   :  { %6956 = vmatprep.subr.msk.mxu0 %vm159_vm1, %v457_v19 }
 0x38c   :  { %6957 = vmatpush3.xpose.msk.msra.mxu0 %vm159_vm1, %v457_v19 }
 0x38d   :  { %6958 = vmatprep.subr.msk.mxu0 %vm159_vm1, %v456_v21 }
 0x390   :  { %6959 = vmatpush3.xpose.msk.msra.mxu0 %vm159_vm1, %v456_v21 }
 0x391   :  { %6960 = vmatprep.subr.msk.mxu0 %vm159_vm1, %v455_v24 }
 0x394   :  { %6961 = vmatpush3.xpose.msk.msra.mxu0 %vm159_vm1, %v455_v24 }
 0x395   :  { %7019 = vmatprep.subr.msk.mxu0 %vm159_vm1, %v925_v15 }
 0x397   :  { %6963 = vmatmul.mubr.msk.f32.vlgmr.msra.gmra.mxu0 %vm159_vm1, %v7986_v32 }
 0x398   :  { %7020 = vmatpush3.xpose.msk.msra.mxu0 %vm159_vm1, %v925_v15 }
 0x457   :  { %v6964_v25 = vpop.f32.mrf.mxu0 }
 0x458   :  { %v727_v28 = vmul.f32 0.70710677, %v6964_v25 }
 0x459   :  { %v717_v30 = vpop.f32.mrf.mxu0 }
 0x45a   :  { %v726_v33 = vmul.f32 0.70710677, %v717_v30  ;;  %v731_v36 = vadd.f32 %v8110_v26, %v727_v28 }
 0x45c   :  { %v737_v37 = vsel %vm736_vm7, %v731_v36, -inf  ;;  %v730_v38 = vadd.f32 %v8112_v31, %v726_v33 }
 0x45d   :  { %738 = vmax.xlane.f32.xlu1 %v737_v37 }
 0x45e   :  { %v733_v41 = vsel %vm732_vm8, %v730_v38, -inf }
 0x45f   :  { %734 = vmax.xlane.f32.xlu0 %v733_v41 }
 0x475   :  { %467 = vrot.lane.b32.xlu0 %v7988_v34, %s7924_s21  ;;  %v8130_v34 = vld [vmem:[#allocation2 + $0x1c0] sm:$0xff] }
 0x4e6   :  { %v739_v53 = vpop.xlane.xlu1 %738 }
 0x4e7   :  { %v741_v56 = vsub.f32 %v731_v36, %v739_v53 }
 0x4e8   :  { %v735_v32 = vpop.xlane.xlu0 %734 }
 0x4e9   :  { %v740_v54 = vsub.f32 %v730_v38, %v735_v32  ;;  %v744_v60 = vmul.f32 1.442695, %v741_v56 }
 0x4eb   :  { %v742_v57 = vmul.f32 1.442695, %v740_v54 }
 0x4ec   :  { %v468_v51 = vpop.permute.xlu0 %467 }
 0x4ed   :  { %6918 = vmatprep.subr.mxu1 %v468_v51  ;;  %7753 = vpow2.f32 %v742_v57 }
 0x4ee   :  { %6919 = vmatpush3.msra.mxu1 %v468_v51  ;;  %7755 = vpow2.f32 %v744_v60 }
 0x4ef   :  { %6921 = vmatmul.mubr.msk.f32.vlgmr.msra.gmra.mxu1 %vm290_vm5, %v8000_v39  ;;  %6965 = vmatprep.subr.mxu1 %v8120_v52 }
 0x4f0   :  { %6966 = vmatpush3.msra.mxu1 %v8120_v52  ;;  %6923 = vmatprep.mubr.msk.f32.mxu1 %vm290_vm5, %v8002_v40 }
 0x4f1   :  { %6967 = vmatprep.subr.mxu1 %v8122_v55 }
 0x4f2   :  { %6968 = vmatpush3.msra.mxu1 %v8122_v55 }
 0x4f3   :  { %6924 = vmatmul.mubr.msk.f32.gmra.mxu1 %vm290_vm5, %v8010_v42  ;;  %6969 = vmatprep.subr.mxu1 %v8130_v34 }
 0x4f4   :  { %6970 = vmatpush3.msra.mxu1 %v8130_v34  ;;  %6926 = vmatprep.mubr.msk.f32.mxu1 %vm290_vm5, %v8012_v43 }
 0x4f5   :  { %6971 = vmatprep.subr.mxu1 %v8134_v58 }
 0x4f6   :  { %6972 = vmatpush3.msra.mxu1 %v8134_v58 }
 0x4f7   :  { %6927 = vmatmul.mubr.msk.f32.gmra.mxu1 %vm290_vm5, %v8018_v44  ;;  %6973 = vmatprep.subr.mxu1 %v8142_v59 }
 0x4f8   :  { %6974 = vmatpush3.msra.mxu1 %v8142_v59  ;;  %6929 = vmatprep.mubr.msk.f32.mxu1 %vm290_vm5, %v8020_v45 }
 0x4f9   :  { %6975 = vmatprep.subr.mxu1 %v8146_v62 }
 0x4fa   :  { %6976 = vmatpush3.msra.mxu1 %v8146_v62  ;;  %v7754_v11 = vpop.eup %7753 }
 0x4fb   :  { %6930 = vmatmul.mubr.msk.f32.gmra.mxu1 %vm290_vm5, %v8026_v46  ;;  %6977 = vmatprep.subr.mxu1 %v8154_v0  ;;  %v7756_v13 = vpop.eup %7755 }
 0x4fc   :  { %6978 = vmatpush3.msra.mxu1 %v8154_v0  ;;  %6932 = vmatprep.mubr.msk.f32.mxu1 %vm290_vm5, %v8028_v47 }
 0x4fd   :  { %6979 = vmatprep.subr.mxu1 %v8158_v2 }
 0x4fe   :  { %6980 = vmatpush3.msra.mxu1 %v8158_v2 }
 0x4ff   :  { %6933 = vmatmul.mubr.msk.f32.gmra.mxu1 %vm290_vm5, %v8034_v48  ;;  %6981 = vmatprep.subr.mxu1 %v8166_v3 }
 0x500   :  { %6982 = vmatpush3.msra.mxu1 %v8166_v3  ;;  %6935 = vmatprep.mubr.msk.f32.mxu1 %vm290_vm5, %v8036_v49 }
 0x501   :  { %6983 = vmatprep.subr.mxu1 %v8170_v5 }
 0x502   :  { %6984 = vmatpush3.msra.mxu1 %v8170_v5 }
 0x503   :  { %6936 = vmatmul.mubr.msk.f32.gmra.mxu1 %vm290_vm5, %v8042_v50  ;;  %6985 = vmatprep.subr.mxu1 %v8178_v7 }
 0x504   :  { %6986 = vmatpush3.msra.mxu1 %v8178_v7  ;;  %6989 = vmatprep.mubr.msk.f32.mxu1 %vm732_vm8, %v7754_v11 }
 0x505   :  { %6987 = vmatprep.subr.mxu1 %v8182_v9 }
 0x506   :  { %6988 = vmatpush3.msra.mxu1 %v8182_v9 }
 0x507   :  { %6990 = vmatmul.mubr.msk.f32.vlgmr.msra.gmra.mxu1 %vm732_vm8, %v7756_v13 }
 0x5af   :  { %v6922_v17 = vpop.f32.mrf.mxu1 }
 0x5b1   :  { %v540_v19 = vpop.f32.mrf.mxu1 }
 0x5b3   :  { %v6925_v21 = vpop.f32.mrf.mxu1 }
 0x5b5   :  { %v550_v24 = vpop.f32.mrf.mxu1 }
 0x5b7   :  { %v6928_v25 = vpop.f32.mrf.mxu1 }
 0x5b9   :  { %v560_v28 = vpop.f32.mrf.mxu1 }
 0x5bb   :  { %v6931_v30 = vpop.f32.mrf.mxu1 }
 0x5bc   :  { %v606_v60 = vmul.f32 %v6931_v30, %v8065_v8  ;;  %v601_v30 = vmul.f32 %v550_v24, %v8090_v18  ;;  %v924_v24 = vld [vmem:[#allocation2 + $0x270] sm:$0xff] }
 0x5bd   :  { %v570_v33 = vpop.f32.mrf.mxu1  ;;  %7021 = vmatprep.subr.msk.mxu0 %vm159_vm1, %v924_v24 }
 0x5be   :  { %v605_v15 = vmul.f32 %v570_v33, %v8070_v10  ;;  %v600_v33 = vmul.f32 %v6922_v17, %v8095_v20  ;;  %7022 = vmatpush3.xpose.msk.msra.mxu0 %vm159_vm1, %v924_v24 }
 0x5bf   :  { %v6934_v36 = vpop.f32.mrf.mxu1 }
 0x5c0   :  { %v608_v54 = vmul.f32 %v6934_v36, %v8055_v4  ;;  %v603_v36 = vmul.f32 %v560_v28, %v8080_v14  ;;  %v6093_v28 = vld [vmem:[#allocation2 + $0x280] ss:$0 sm:$0xff] }
 0x5c1   :  { %v580_v37 = vpop.f32.mrf.mxu1 }
 0x5c2   :  { %v607_v57 = vmul.f32 %v580_v37, %v8060_v6  ;;  %v602_v37 = vmul.f32 %v6925_v21, %v8085_v16 }
 0x5c3   :  { %v6937_v38 = vpop.f32.mrf.mxu1 }
 0x5c4   :  { %v610_v41 = vmul.f32 %v6937_v38, %v8048_v61  ;;  %v604_v38 = vmul.f32 %v6928_v25, %v8075_v12 }
 0x5c5   :  { %v590_v32 = vpop.f32.mrf.mxu1 }
 0x5c6   :  { %v609_v51 = vmul.f32 %v590_v32, %v8050_v63  ;;  %6992 = vmatprep.subr.mxu1 %v610_v41 }
 0x5c7   :  { %v6991_v53 = vpop.f32.mrf.mxu1  ;;  %6993 = vmatpush3.msra.mxu1 %v610_v41 }
 0x5c8   :  { %6994 = vmatprep.subr.mxu1 %v609_v51 }
 0x5c9   :  { %v830_v56 = vpop.f32.mrf.mxu1  ;;  %6995 = vmatpush3.msra.mxu1 %v609_v51  ;;  %v599_v51 = vmul.f32 %v540_v19, %v8100_v22 }
 0x5ca   :  { %7757 = vrcp.f32 %v830_v56  ;;  %6996 = vmatprep.subr.mxu1 %v608_v54 }
 0x5cb   :  { %6997 = vmatpush3.msra.mxu1 %v608_v54  ;;  %7759 = vrcp.f32 %v6991_v53 }
 0x5cc   :  { %6998 = vmatprep.subr.mxu1 %v607_v57 }
 0x5cd   :  { %6999 = vmatpush3.msra.mxu1 %v607_v57 }
 0x5ce   :  { %7000 = vmatprep.subr.mxu1 %v606_v60 }
 0x5cf   :  { %7001 = vmatpush3.msra.mxu1 %v606_v60 }
 0x5d0   :  { %7002 = vmatprep.subr.mxu1 %v605_v15 }
 0x5d1   :  { %7003 = vmatpush3.msra.mxu1 %v605_v15 }
 0x5d2   :  { %7004 = vmatprep.subr.mxu1 %v604_v38 }
 0x5d3   :  { %7005 = vmatpush3.msra.mxu1 %v604_v38 }
 0x5d4   :  { %7006 = vmatprep.subr.mxu1 %v603_v36 }
 0x5d5   :  { %7007 = vmatpush3.msra.mxu1 %v603_v36 }
 0x5d6   :  { %7008 = vmatprep.subr.mxu1 %v602_v37 }
 0x5d7   :  { %v7758_v41 = vpop.eup %7757  ;;  %7009 = vmatpush3.msra.mxu1 %v602_v37 }
 0x5d8   :  { %7010 = vmatprep.subr.mxu1 %v601_v30  ;;  %v841_v32 = vmul.f32 %v7758_v41, %v7754_v11  ;;  %v7760_v25 = vpop.eup %7759 }
 0x5d9   :  { %7011 = vmatpush3.msra.mxu1 %v601_v30  ;;  %v842_v21 = vmul.f32 %v7760_v25, %v7756_v13 }
 0x5da   :  { %7012 = vmatprep.subr.mxu1 %v600_v33  ;;  %7016 = vmatprep.mubr.msk.f32.mxu1 %vm732_vm8, %v841_v32 }
 0x5db   :  { %7013 = vmatpush3.msra.mxu1 %v600_v33 }
 0x5dc   :  { %7014 = vmatprep.subr.mxu1 %v599_v51 }
 0x5dd   :  { %7015 = vmatpush3.msra.mxu1 %v599_v51 }
 0x5de   :  { %7017 = vmatmul.mubr.msk.f32.vlgmr.msra.gmra.mxu1 %vm732_vm8, %v842_v21 }
 0x69e   :  { %v7018_v17 = vpop.f32.mrf.mxu1 }
 0x6a0   :  { %v915_v11 = vpop.f32.mrf.mxu1 }
 0x6a1   :  { %7023 = vmatprep.mubr.msk.f32.mxu0 %vm159_vm1, %v915_v11 }
 0x6a2   :  { %7024 = vmatmul.mubr.msk.f32.vlgmr.msra.gmra.mxu0 %vm159_vm1, %v7018_v17 }
 0x762   :  { %v7025_v19 = vpop.f32.mrf.mxu0 }
 0x763   :  { %v1015_v54 = vadd.f32 %v7025_v19, %v6093_v28 }
 0x764   :  { %v1009_v53 = vpop.f32.mrf.mxu0 }
 0x765   :  { %v1010_v56 = vadd.f32 %v6093_v28, %v1009_v53  ;;  %v1019_v60 = vadd.f32 %v1015_v54, %v7976_v27  ;;  %v1062_v27 = vld [vmem:[#allocation2 + $0x288] sm:$0xff]  ;;  %v6098_v54 = vld [vmem:[#allocation2 + $0x2b0] ss:$0 sm:$0xff] }
 0x766   :  { %7026 = vmatprep.subr.msk.mxu0 %vm159_vm1, %v1062_v27 }
 0x767   :  { %v1018_v13 = vadd.f32 %v1010_v56, %v7972_v23  ;;  %v1026_v15 = vsel %vm1025_vm9, %v1019_v60, 0.0  ;;  %7027 = vmatpush3.xpose.msk.msra.mxu0 %vm159_vm1, %v1062_v27 }
 0x769   :  { %v1022_v57 = vsel %vm159_vm1, %v1018_v13, 0.0 }
 0x76a   :  { %1023 = vadd.xlane.f32.xlu1 %v1022_v57 }
 0x76e   :  { %1027 = vadd.xlane.f32.xlu1 %v1026_v15 }
 0x7f3   :  { %v1024_v38 = vpop.xlane.xlu1 %1023 }
 0x7f4   :  { %v1030_v36 = vmul.f32 0.0625, %v1024_v38 }
 0x7f6   :  { %v1032_v37 = vsub.f32 %v1018_v13, %v1030_v36  ;;  %v6099_v13 = vld [vmem:[#allocation2 + $0x2b8] ss:$0 sm:$0xff] }
 0x7f7   :  { %v1028_v30 = vpop.xlane.xlu1 %1027 }
 0x7f8   :  { %v1031_v41 = vmul.f32 0.0625, %v1028_v30  ;;  %v1034_v33 = vmul.f32 %v1032_v37, %v1032_v37 }
 0x7fa   :  { %v1033_v32 = vsub.f32 %v1019_v60, %v1031_v41  ;;  %v1036_v25 = vsel %vm159_vm1, %v1034_v33, 0.0  ;;  %v1155_v41 = vld [vmem:[#allocation2 + $0x2a0] sm:$0xff]  ;;  %v1154_v33 = vld [vmem:[#allocation2 + $0x298] sm:$0xff] }
 0x7fb   :  { %1037 = vadd.xlane.f32.xlu1 %v1036_v25  ;;  %7031 = vmatprep.subr.msk.mxu1 %vm1161_vm10, %v1155_v41 }
 0x7fc   :  { %v1035_v23 = vmul.f32 %v1033_v32, %v1033_v32  ;;  %7032 = vmatpush3.xpose.msk.msra.mxu1 %vm1161_vm10, %v1155_v41 }
 0x7fd   :  { %7033 = vmatprep.subr.msk.mxu1 %vm1161_vm10, %v1154_v33 }
 0x7fe   :  { %v1039_v51 = vsel %vm1025_vm9, %v1035_v23, 0.0 }
 0x7ff   :  { %1040 = vadd.xlane.f32.xlu1 %v1039_v51 }
 0x800   :  { %7034 = vmatpush3.xpose.msk.msra.mxu1 %vm1161_vm10, %v1154_v33 }
 0x884   :  { %v1038_v21 = vpop.xlane.xlu1 %1037 }
 0x885   :  { %v1042_v24 = vmul.f32 0.0625, %v1038_v21 }
 0x887   :  { %v1044_v17 = vadd.f32 1e-05, %v1042_v24  ;;  %v6104_v24 = vld [vmem:[#allocation2 + $0x2a8] ss:$0 sm:$0xff] }
 0x888   :  { %v1041_v11 = vpop.xlane.xlu1 %1040 }
 0x889   :  { %7761 = vrsqrt.f32 %v1044_v17  ;;  %v1043_v19 = vmul.f32 0.0625, %v1041_v11 }
 0x88b   :  { %v1045_v28 = vadd.f32 1e-05, %v1043_v19 }
 0x88d   :  { %7763 = vrsqrt.f32 %v1045_v28 }
 0x896   :  { %v7762_v53 = vpop.eup %7761 }
 0x897   :  { %v1048_v56 = vmul.f32 %v7762_v53, %v1032_v37  ;;  %v6100_v37 = vld [vmem:[#allocation2 + $0x290] ss:$0 sm:$0xff] }
 0x899   :  { %v1054_v57 = vmul.f32 %v6098_v54, %v1048_v56 }
 0x89a   :  { %v7764_v60 = vpop.eup %7763 }
 0x89b   :  { %v1049_v15 = vmul.f32 %v7764_v60, %v1033_v32  ;;  %v1060_v38 = vadd.f32 %v6099_v13, %v1054_v57 }
 0x89d   :  { %v1055_v36 = vmul.f32 %v6098_v54, %v1049_v15  ;;  %7028 = vmatprep.mubr.msk.f32.mxu0 %vm159_vm1, %v1060_v38 }
 0x89f   :  { %v1061_v30 = vadd.f32 %v6099_v13, %v1055_v36 }
 0x8a1   :  { %7029 = vmatmul.mubr.msk.f32.vlgmr.msra.gmra.mxu0 %vm159_vm1, %v1061_v30 }
 0x961   :  { %v7030_v32 = vpop.f32.mrf.mxu0 }
 0x962   :  { %v1149_v25 = vadd.f32 %v7030_v32, %v6100_v37 }
 0x963   :  { %v1143_v23 = vpop.f32.mrf.mxu0 }
 0x964   :  { %v1144_v51 = vadd.f32 %v6100_v37, %v1143_v23  ;;  %v1153_v21 = vmax.f32 %v1149_v25, 0.0  ;;  %v1297_v23 = vld [vmem:[#allocation2 + $0x2f8] sm:$0xff] }
 0x965   :  { %7038 = vmatprep.subr.msk.mxu0 %vm159_vm1, %v1297_v23 }
 0x966   :  { %v1152_v27 = vmax.f32 %v1144_v51, 0.0  ;;  %7039 = vmatpush3.xpose.msk.msra.mxu0 %vm159_vm1, %v1297_v23  ;;  %v1295_v51 = vld [vmem:[#allocation2 + $0x2e8] sm:$0xff]  ;;  %v6111_v23 = vld [vmem:[#allocation2 + $0x300] ss:$0 sm:$0xff] }
 0x968   :  { %7035 = vmatprep.mubr.msk.f32.mxu1 %vm1161_vm10, %v1152_v27  ;;  %v1294_v27 = vld [vmem:[#allocation2 + $0x2e0] sm:$0xff] }
 0x969   :  { %7036 = vmatmul.mubr.msk.f32.vlgmr.msra.gmra.mxu1 %vm1161_vm10, %v1153_v21  ;;  %v1293_v21 = vld [vmem:[#allocation2 + $0x2d8] sm:$0xff] }
 0x96a   :  { %7057 = vmatprep.mubr.msk.f32.mxu1 %vm290_vm5, %v7980_v29 }
 0xa29   :  { %v7037_v17 = vpop.f32.mrf.mxu1 }
 0xa2a   :  { %v1246_v11 = vadd.f32 %v7037_v17, %v6104_v24 }
 0xa2b   :  { %v1240_v19 = vpop.f32.mrf.mxu1 }
 0xa2c   :  { %v1241_v28 = vadd.f32 %v6104_v24, %v1240_v19  ;;  %v1250_v53 = vadd.f32 %v1246_v11, %v1061_v30  ;;  %v1292_v24 = vld [vmem:[#allocation2 + $0x2d0] sm:$0xff] }
 0xa2e   :  { %v1256_v54 = vsel %vm1025_vm9, %v1250_v53, 0.0  ;;  %v1249_v56 = vadd.f32 %v1241_v28, %v1060_v38  ;;  %v1296_v38 = vld [vmem:[#allocation2 + $0x2f0] sm:$0xff] }
 0xa2f   :  { %1257 = vadd.xlane.f32.xlu0 %v1256_v54  ;;  %7040 = vmatprep.subr.msk.mxu0 %vm159_vm1, %v1296_v38 }
 0xa30   :  { %v1253_v13 = vsel %vm159_vm1, %v1249_v56, 0.0  ;;  %7041 = vmatpush3.xpose.msk.msra.mxu0 %vm159_vm1, %v1296_v38 }
 0xa31   :  { %1254 = vadd.xlane.f32.xlu1 %v1253_v13  ;;  %7042 = vmatprep.subr.msk.mxu0 %vm159_vm1, %v1295_v51  ;;  %v6109_v13 = vld [vmem:[#allocation2 + $0x2c0] ss:$0 sm:$0xff] }
 0xa34   :  { %7043 = vmatpush3.xpose.msk.msra.mxu0 %vm159_vm1, %v1295_v51 }
 0xa35   :  { %7044 = vmatprep.subr.msk.mxu0 %vm159_vm1, %v1294_v27 }
 0xa38   :  { %7045 = vmatpush3.xpose.msk.msra.mxu0 %vm159_vm1, %v1294_v27 }
 0xa39   :  { %7046 = vmatprep.subr.msk.mxu0 %vm159_vm1, %v1293_v21 }
 0xa3c   :  { %7047 = vmatpush3.xpose.msk.msra.mxu0 %vm159_vm1, %v1293_v21 }
 0xa3d   :  { %7048 = vmatprep.subr.msk.mxu0 %vm159_vm1, %v1292_v24 }
 0xa40   :  { %7049 = vmatpush3.xpose.msk.msra.mxu0 %vm159_vm1, %v1292_v24 }
 0xab8   :  { %v1258_v57 = vpop.xlane.xlu0 %1257 }
 0xab9   :  { %v1260_v60 = vmul.f32 0.0625, %v1258_v57 }
 0xaba   :  { %v1255_v15 = vpop.xlane.xlu1 %1254 }
 0xabb   :  { %v1259_v36 = vmul.f32 0.0625, %v1255_v15  ;;  %v1262_v41 = vsub.f32 %v1250_v53, %v1260_v60  ;;  %v6110_v60 = vld [vmem:[#allocation2 + $0x2c8] ss:$0 sm:$0xff] }
 0xabd   :  { %v1261_v33 = vsub.f32 %v1249_v56, %v1259_v36  ;;  %v1264_v25 = vmul.f32 %v1262_v41, %v1262_v41 }
 0xabf   :  { %v1263_v37 = vmul.f32 %v1261_v33, %v1261_v33  ;;  %v1268_v30 = vsel %vm1025_vm9, %v1264_v25, 0.0 }
 0xac1   :  { %v1265_v32 = vsel %vm159_vm1, %v1263_v37, 0.0 }
 0xac2   :  { %1266 = vadd.xlane.f32.xlu1 %v1265_v32 }
 0xac6   :  { %1269 = vadd.xlane.f32.xlu1 %v1268_v30 }
 0xb4b   :  { %v1267_v17 = vpop.xlane.xlu1 %1266 }
 0xb4c   :  { %v1271_v11 = vmul.f32 0.0625, %v1267_v17 }
 0xb4e   :  { %v1273_v19 = vadd.f32 1e-05, %v1271_v11 }
 0xb4f   :  { %v1270_v28 = vpop.xlane.xlu1 %1269 }
 0xb50   :  { %7765 = vrsqrt.f32 %v1273_v19  ;;  %v1272_v53 = vmul.f32 0.0625, %v1270_v28 }
 0xb52   :  { %v1274_v54 = vadd.f32 1e-05, %v1272_v53 }
 0xb54   :  { %7767 = vrsqrt.f32 %v1274_v54 }
 0xb5d   :  { %v7766_v56 = vpop.eup %7765 }
 0xb5e   :  { %v1277_v57 = vmul.f32 %v7766_v56, %v1261_v33 }
 0xb60   :  { %v1283_v15 = vmul.f32 %v6109_v13, %v1277_v57 }
 0xb61   :  { %v7768_v36 = vpop.eup %7767 }
 0xb62   :  { %v1278_v37 = vmul.f32 %v7768_v36, %v1262_v41  ;;  %v8246_v32 = vadd.f32 %v6110_v60, %v1283_v15 }
 0xb64   :  { %v1284_v25 = vmul.f32 %v6109_v13, %v1278_v37  ;;  %7050 = vmatprep.mubr.msk.f32.mxu0 %vm159_vm1, %v8246_v32 }
 0xb66   :  { %v8250_v30 = vadd.f32 %v6110_v60, %v1284_v25 }
 0xb68   :  { %7051 = vmatmul.mubr.msk.f32.vlgmr.msra.gmra.mxu0 %vm159_vm1, %v8250_v30 }
 0xb69   :  { %7079 = vmatprep.mubr.msk.f32.mxu0 %vm290_vm5, %v7980_v29 }
 0xc28   :  { %v7052_v33 = vpop.f32.mrf.mxu0 }
 0xc29   :  { %v8256_v38 = vadd.f32 %v7052_v33, %v6111_v23 }
 0xc2a   :  { %v1392_v51 = vpop.f32.mrf.mxu0 }
 0xc2b   :  { %1549 = vrot.lane.b32.xlu0 %v8256_v38, %s7924_s21  ;;  %1405 = vrot.lane.b32.xlu1 %v8256_v38, %s7923_s0  ;;  %v8262_v41 = vadd.f32 %v6111_v23, %v1392_v51 }
 0xc2f   :  { %1403 = vrot.lane.b32.xlu1 %v8262_v41, %s7923_s0 }
 0xc9d   :  { %v1550_v27 = vpop.permute.xlu0 %1549  ;;  %v1406_v21 = vpop.permute.xlu1 %1405 }
 0xc9e   :  { %7053 = vmatprep.subr.msk.mxu1 %vm327_vm6, %v1406_v21  ;;  %7075 = vmatprep.subr.msk.mxu0 %vm327_vm6, %v1550_v27 }
 0xc9f   :  { %7054 = vmatpush3.msk.msra.mxu1 %vm327_vm6, %v1406_v21  ;;  %7076 = vmatpush3.msk.msra.mxu0 %vm327_vm6, %v1550_v27 }
 0xca1   :  { %v1404_v29 = vpop.permute.xlu1 %1403 }
 0xca2   :  { %7055 = vmatprep.subr.mxu1 %v1404_v29 }
 0xca3   :  { %7056 = vmatpush3.msra.mxu1 %v1404_v29 }
 0xca4   :  { %7058 = vmatmul.mubr.msk.f32.vlgmr.msra.gmra.mxu1 %vm290_vm5, %v8000_v39 }
 0xca5   :  { %7060 = vmatprep.mubr.msk.f32.mxu1 %vm290_vm5, %v8002_v40 }
 0xca8   :  { %7061 = vmatmul.mubr.msk.f32.gmra.mxu1 %vm290_vm5, %v8010_v42 }
 0xca9   :  { %7063 = vmatprep.mubr.msk.f32.mxu1 %vm290_vm5, %v8012_v43 }
 0xcac   :  { %7064 = vmatmul.mubr.msk.f32.gmra.mxu1 %vm290_vm5, %v8018_v44 }
 0xcad   :  { %7066 = vmatprep.mubr.msk.f32.mxu1 %vm290_vm5, %v8020_v45 }
 0xcb0   :  { %7067 = vmatmul.mubr.msk.f32.gmra.mxu1 %vm290_vm5, %v8026_v46 }
 0xcb1   :  { %7069 = vmatprep.mubr.msk.f32.mxu1 %vm290_vm5, %v8028_v47 }
 0xcb4   :  { %7070 = vmatmul.mubr.msk.f32.gmra.mxu1 %vm290_vm5, %v8034_v48 }
 0xcb5   :  { %7072 = vmatprep.mubr.msk.f32.mxu1 %vm290_vm5, %v8036_v49 }
 0xcb8   :  { %7073 = vmatmul.mubr.msk.f32.gmra.mxu1 %vm290_vm5, %v8042_v50 }
 0xcb9   :  { %7121 = vmatprep.mubr.msk.f32.mxu1 %vm159_vm1, %v8262_v41 }
 0xd64   :  { %v7059_v24 = vpop.f32.mrf.mxu1 }
 0xd66   :  { %v1476_v17 = vpop.f32.mrf.mxu1 }
 0xd68   :  { %v7062_v11 = vpop.f32.mrf.mxu1 }
 0xd69   :  { %v1538_v29 = vmul.f32 %v7062_v11, %v8085_v16 }
 0xd6a   :  { %v1486_v19 = vpop.f32.mrf.mxu1 }
 0xd6c   :  { %v7065_v28 = vpop.f32.mrf.mxu1 }
 0xd6d   :  { %v1540_v27 = vmul.f32 %v7065_v28, %v8075_v12  ;;  %v1536_v28 = vmul.f32 %v7059_v24, %v8095_v20 }
 0xd6e   :  { %v1496_v53 = vpop.f32.mrf.mxu1 }
 0xd6f   :  { %v1539_v21 = vmul.f32 %v1496_v53, %v8080_v14  ;;  %v1535_v53 = vmul.f32 %v1476_v17, %v8100_v22 }
 0xd70   :  { %v7068_v54 = vpop.f32.mrf.mxu1 }
 0xd71   :  { %v1542_v33 = vmul.f32 %v7068_v54, %v8065_v8  ;;  %v1537_v54 = vmul.f32 %v1486_v19, %v8090_v18 }
 0xd72   :  { %v1506_v56 = vpop.f32.mrf.mxu1 }
 0xd73   :  { %v1541_v51 = vmul.f32 %v1506_v56, %v8070_v10 }
 0xd74   :  { %v7071_v13 = vpop.f32.mrf.mxu1 }
 0xd75   :  { %v1544_v25 = vmul.f32 %v7071_v13, %v8055_v4 }
 0xd76   :  { %v1516_v57 = vpop.f32.mrf.mxu1 }
 0xd77   :  { %v1543_v23 = vmul.f32 %v1516_v57, %v8060_v6 }
 0xd78   :  { %v7074_v60 = vpop.f32.mrf.mxu1 }
 0xd79   :  { %v1546_v15 = vmul.f32 %v7074_v60, %v8048_v61 }
 0xd7a   :  { %v1526_v36 = vpop.f32.mrf.mxu1 }
 0xd7b   :  { %v1545_v37 = vmul.f32 %v1526_v36, %v8050_v63  ;;  %7097 = vmatprep.subr.msk.mxu1 %vm159_vm1, %v1546_v15 }
 0xd7c   :  { %7098 = vmatpush3.xpose.msk.msra.mxu1 %vm159_vm1, %v1546_v15 }
 0xd7d   :  { %7099 = vmatprep.subr.msk.mxu1 %vm159_vm1, %v1545_v37 }
 0xd80   :  { %7100 = vmatpush3.xpose.msk.msra.mxu1 %vm159_vm1, %v1545_v37 }
 0xd81   :  { %7101 = vmatprep.subr.msk.mxu1 %vm159_vm1, %v1544_v25 }
 0xd84   :  { %7102 = vmatpush3.xpose.msk.msra.mxu1 %vm159_vm1, %v1544_v25 }
 0xd85   :  { %7103 = vmatprep.subr.msk.mxu1 %vm159_vm1, %v1543_v23 }
 0xd88   :  { %7104 = vmatpush3.xpose.msk.msra.mxu1 %vm159_vm1, %v1543_v23 }
 0xd89   :  { %7105 = vmatprep.subr.msk.mxu1 %vm159_vm1, %v1542_v33 }
 0xd8c   :  { %7106 = vmatpush3.xpose.msk.msra.mxu1 %vm159_vm1, %v1542_v33  ;;  %v2394_v33 = vld [vmem:[#allocation2 + $0x380] sm:$0xff] }
 0xd8d   :  { %7107 = vmatprep.subr.msk.mxu1 %vm159_vm1, %v1541_v51 }
 0xd90   :  { %7108 = vmatpush3.xpose.msk.msra.mxu1 %vm159_vm1, %v1541_v51  ;;  %v144_v51 = vld [vmem:[#allocation2 + $0x28] sm:$0xff] }
 0xd91   :  { %7109 = vmatprep.subr.msk.mxu1 %vm159_vm1, %v1540_v27 }
 0xd94   :  { %7110 = vmatpush3.xpose.msk.msra.mxu1 %vm159_vm1, %v1540_v27  ;;  %v145_v27 = vmul.f32 %v144_v51, %v7996_v35  ;;  %v2498_v51 = vld [vmem:[#allocation2 + $0x158] sm:$0xff] }
 0xd95   :  { %7111 = vmatprep.subr.msk.mxu1 %vm159_vm1, %v1539_v21 }
 0xd98   :  { %7112 = vmatpush3.xpose.msk.msra.mxu1 %vm159_vm1, %v1539_v21  ;;  %v2393_v21 = vld [vmem:[#allocation2 + $0x378] sm:$0xff] }
 0xd99   :  { %7113 = vmatprep.subr.msk.mxu1 %vm159_vm1, %v1538_v29 }
 0xd9c   :  { %7114 = vmatpush3.xpose.msk.msra.mxu1 %vm159_vm1, %v1538_v29  ;;  %v146_v29 = vld [vmem:[#allocation2 + $0x30] sm:$0xff] }
 0xd9d   :  { %7115 = vmatprep.subr.msk.mxu1 %vm159_vm1, %v1537_v54 }
 0xda0   :  { %7116 = vmatpush3.xpose.msk.msra.mxu1 %vm159_vm1, %v1537_v54  ;;  %v8417_v54 = vadd.f32 %v146_v29, %v145_v27  ;;  %v2499_v27 = vld [vmem:[#allocation2 + $0x160] sm:$0xff]  ;;  %v2501_v29 = vld [vmem:[#allocation2 + $0x170] sm:$0xff] }
 0xda1   :  { %7117 = vmatprep.subr.msk.mxu1 %vm159_vm1, %v1536_v28 }
 0xda4   :  { %7118 = vmatpush3.xpose.msk.msra.mxu1 %vm159_vm1, %v1536_v28  ;;  %v1988_v28 = vld [vmem:[#allocation2 + $0x308] sm:$0xff] }
 0xda5   :  { %7119 = vmatprep.subr.msk.mxu1 %vm159_vm1, %v1535_v53 }
 0xda8   :  { %7120 = vmatpush3.xpose.msk.msra.mxu1 %vm159_vm1, %v1535_v53 }
 0xdab   :  { %7122 = vmatmul.mubr.msk.f32.vlgmr.msra.gmra.mxu1 %vm159_vm1, %v8256_v38 }
 0xe6b   :  { %v7123_v11 = vpop.f32.mrf.mxu1 }
 0xe6c   :  { %v1807_v19 = vmul.f32 0.70710677, %v7123_v11 }
 0xe6d   :  { %v1797_v56 = vpop.f32.mrf.mxu1 }
 0xe6e   :  { %v1806_v13 = vmul.f32 0.70710677, %v1797_v56  ;;  %v1809_v24 = vadd.f32 %v1807_v19, %v8110_v26  ;;  %v6164_v56 = vld [vmem:[#allocation2 + $0x318] ss:$0 sm:$0xff] }
 0xe70   :  { %v1813_v57 = vsel %vm736_vm7, %v1809_v24, -inf  ;;  %v1808_v60 = vadd.f32 %v1806_v13, %v8112_v31 }
 0xe71   :  { %1814 = vmax.xlane.f32.xlu0 %v1813_v57 }
 0xe72   :  { %v1810_v17 = vsel %vm732_vm8, %v1808_v60, -inf }
 0xe73   :  { %1811 = vmax.xlane.f32.xlu1 %v1810_v17 }
 0xe84   :  { %1547 = vrot.lane.b32.xlu1 %v8262_v41, %s7924_s21 }
 0xefa   :  { %v1815_v38 = vpop.xlane.xlu0 %1814 }
 0xefb   :  { %v1817_v26 = vsub.f32 %v1809_v24, %v1815_v38 }
 0xefc   :  { %v1812_v15 = vpop.xlane.xlu1 %1811 }
 0xefd   :  { %v1816_v37 = vsub.f32 %v1808_v60, %v1812_v15 }
 0xeff   :  { %v1818_v31 = vmul.f32 1.442695, %v1816_v37 }
 0xf00   :  { %v1548_v36 = vpop.permute.xlu1 %1547 }
 0xf01   :  { %7077 = vmatprep.subr.mxu0 %v1548_v36  ;;  %7769 = vpow2.f32 %v1818_v31 }
 0xf02   :  { %7078 = vmatpush3.msra.mxu0 %v1548_v36 }
 0xf03   :  { %7080 = vmatmul.mubr.msk.f32.vlgmr.msra.gmra.mxu0 %vm290_vm5, %v8000_v39  ;;  %7124 = vmatprep.subr.mxu0 %v8120_v52  ;;  %v1820_v39 = vmul.f32 1.442695, %v1817_v26 }
 0xf04   :  { %7125 = vmatpush3.msra.mxu0 %v8120_v52  ;;  %7082 = vmatprep.mubr.msk.f32.mxu0 %vm290_vm5, %v8002_v40 }
 0xf05   :  { %7126 = vmatprep.subr.mxu0 %v8122_v55  ;;  %7771 = vpow2.f32 %v1820_v39 }
 0xf06   :  { %7127 = vmatpush3.msra.mxu0 %v8122_v55 }
 0xf07   :  { %7083 = vmatmul.mubr.msk.f32.gmra.mxu0 %vm290_vm5, %v8010_v42  ;;  %7128 = vmatprep.subr.mxu0 %v8130_v34 }
 0xf08   :  { %7129 = vmatpush3.msra.mxu0 %v8130_v34  ;;  %7085 = vmatprep.mubr.msk.f32.mxu0 %vm290_vm5, %v8012_v43  ;;  %v1989_v43 = vld [vmem:[#allocation2 + $0x310] sm:$0xff] }
 0xf09   :  { %7130 = vmatprep.subr.mxu0 %v8134_v58  ;;  %7178 = vmatprep.subr.msk.mxu1 %vm159_vm1, %v1989_v43 }
 0xf0a   :  { %7131 = vmatpush3.msra.mxu0 %v8134_v58  ;;  %7179 = vmatpush3.xpose.msk.msra.mxu1 %vm159_vm1, %v1989_v43 }
 0xf0b   :  { %7086 = vmatmul.mubr.msk.f32.gmra.mxu0 %vm290_vm5, %v8018_v44  ;;  %7132 = vmatprep.subr.mxu0 %v8142_v59 }
 0xf0c   :  { %7133 = vmatpush3.msra.mxu0 %v8142_v59  ;;  %7088 = vmatprep.mubr.msk.f32.mxu0 %vm290_vm5, %v8020_v45 }
 0xf0d   :  { %7134 = vmatprep.subr.mxu0 %v8146_v62  ;;  %7180 = vmatprep.subr.msk.mxu1 %vm159_vm1, %v1988_v28 }
 0xf0e   :  { %7135 = vmatpush3.msra.mxu0 %v8146_v62  ;;  %v7770_v40 = vpop.eup %7769  ;;  %7181 = vmatpush3.xpose.msk.msra.mxu1 %vm159_vm1, %v1988_v28  ;;  %v6175_v28 = vld [vmem:[#allocation2 + $0x340] ss:$0 sm:$0xff] }
 0xf0f   :  { %7089 = vmatmul.mubr.msk.f32.gmra.mxu0 %vm290_vm5, %v8026_v46  ;;  %7136 = vmatprep.subr.mxu0 %v8154_v0 }
 0xf10   :  { %7137 = vmatpush3.msra.mxu0 %v8154_v0  ;;  %7091 = vmatprep.mubr.msk.f32.mxu0 %vm290_vm5, %v8028_v47 }
 0xf11   :  { %7138 = vmatprep.subr.mxu0 %v8158_v2 }
 0xf12   :  { %7139 = vmatpush3.msra.mxu0 %v8158_v2  ;;  %v7772_v42 = vpop.eup %7771 }
 0xf13   :  { %7092 = vmatmul.mubr.msk.f32.gmra.mxu0 %vm290_vm5, %v8034_v48  ;;  %7140 = vmatprep.subr.mxu0 %v8166_v3 }
 0xf14   :  { %7141 = vmatpush3.msra.mxu0 %v8166_v3  ;;  %7094 = vmatprep.mubr.msk.f32.mxu0 %vm290_vm5, %v8036_v49 }
 0xf15   :  { %7142 = vmatprep.subr.mxu0 %v8170_v5 }
 0xf16   :  { %7143 = vmatpush3.msra.mxu0 %v8170_v5 }
 0xf17   :  { %7095 = vmatmul.mubr.msk.f32.gmra.mxu0 %vm290_vm5, %v8042_v50  ;;  %7144 = vmatprep.subr.mxu0 %v8178_v7 }
 0xf18   :  { %7145 = vmatpush3.msra.mxu0 %v8178_v7  ;;  %7148 = vmatprep.mubr.msk.f32.mxu0 %vm732_vm8, %v7770_v40 }
 0xf19   :  { %7146 = vmatprep.subr.mxu0 %v8182_v9 }
 0xf1a   :  { %7147 = vmatpush3.msra.mxu0 %v8182_v9 }
 0xf1b   :  { %7149 = vmatmul.mubr.msk.f32.vlgmr.msra.gmra.mxu0 %vm732_vm8, %v7772_v42 }
 0xfc3   :  { %v7081_v44 = vpop.f32.mrf.mxu0 }
 0xfc5   :  { %v1620_v45 = vpop.f32.mrf.mxu0 }
 0xfc6   :  { %v1679_v23 = vmul.f32 %v1620_v45, %v8100_v22  ;;  %v2395_v22 = vld [vmem:[#allocation2 + $0x388] sm:$0xff] }
 0xfc7   :  { %v7084_v46 = vpop.f32.mrf.mxu0 }
 0xfc9   :  { %v1630_v47 = vpop.f32.mrf.mxu0 }
 0xfcb   :  { %v7087_v48 = vpop.f32.mrf.mxu0 }
 0xfcd   :  { %v1640_v49 = vpop.f32.mrf.mxu0 }
 0xfcf   :  { %v7090_v50 = vpop.f32.mrf.mxu0 }
 0xfd0   :  { %v1686_v9 = vmul.f32 %v7090_v50, %v8065_v8  ;;  %v1681_v8 = vmul.f32 %v1630_v47, %v8090_v18  ;;  %v2397_v18 = vld [vmem:[#allocation2 + $0x398] sm:$0xff] }
 0xfd1   :  { %v1650_v52 = vpop.f32.mrf.mxu0 }
 0xfd3   :  { %v7093_v55 = vpop.f32.mrf.mxu0 }
 0xfd4   :  { %v1688_v3 = vmul.f32 %v7093_v55, %v8055_v4  ;;  %v1683_v4 = vmul.f32 %v1640_v49, %v8080_v14 }
 0xfd5   :  { %v1660_v34 = vpop.f32.mrf.mxu0 }
 0xfd6   :  { %v1687_v7 = vmul.f32 %v1660_v34, %v8060_v6  ;;  %v1682_v6 = vmul.f32 %v7084_v46, %v8085_v16  ;;  %v2398_v16 = vld [vmem:[#allocation2 + $0x3a0] sm:$0xff]  ;;  %v6184_v46 = vld [vmem:[#allocation2 + $0x3a8] ss:$0 sm:$0xff] }
 0xfd7   :  { %v7096_v58 = vpop.f32.mrf.mxu0 }
 0xfd8   :  { %v1690_v59 = vmul.f32 %v7096_v58, %v8048_v61  ;;  %v1685_v61 = vmul.f32 %v1650_v52, %v8070_v10  ;;  %v1680_v10 = vmul.f32 %v7081_v44, %v8095_v20  ;;  %v2396_v20 = vld [vmem:[#allocation2 + $0x390] sm:$0xff] }
 0xfd9   :  { %v1670_v62 = vpop.f32.mrf.mxu0 }
 0xfda   :  { %v1689_v0 = vmul.f32 %v1670_v62, %v8050_v63  ;;  %7151 = vmatprep.subr.mxu0 %v1690_v59  ;;  %v1684_v63 = vmul.f32 %v7087_v48, %v8075_v12  ;;  %v2217_v48 = vld [vmem:[#allocation2 + $0x338] sm:$0xff]  ;;  %v6169_v62 = vld [vmem:[#allocation2 + $0x348] ss:$0 sm:$0xff] }
 0xfdb   :  { %v7150_v2 = vpop.f32.mrf.mxu0  ;;  %7152 = vmatpush3.msra.mxu0 %v1690_v59 }
 0xfdc   :  { %7153 = vmatprep.subr.mxu0 %v1689_v0 }
 0xfdd   :  { %v1894_v5 = vpop.f32.mrf.mxu0  ;;  %7154 = vmatpush3.msra.mxu0 %v1689_v0 }
 0xfde   :  { %7773 = vrcp.f32 %v1894_v5  ;;  %7155 = vmatprep.subr.mxu0 %v1688_v3 }
 0xfdf   :  { %7156 = vmatpush3.msra.mxu0 %v1688_v3  ;;  %7775 = vrcp.f32 %v7150_v2  ;;  %v6170_v2 = vld [vmem:[#allocation2 + $0x350] ss:$0 sm:$0xff] }
 0xfe0   :  { %7157 = vmatprep.subr.mxu0 %v1687_v7 }
 0xfe1   :  { %7158 = vmatpush3.msra.mxu0 %v1687_v7 }
 0xfe2   :  { %7159 = vmatprep.subr.mxu0 %v1686_v9 }
 0xfe3   :  { %7160 = vmatpush3.msra.mxu0 %v1686_v9 }
 0xfe4   :  { %7161 = vmatprep.subr.mxu0 %v1685_v61 }
 0xfe5   :  { %7162 = vmatpush3.msra.mxu0 %v1685_v61 }
 0xfe6   :  { %7163 = vmatprep.subr.mxu0 %v1684_v63 }
 0xfe7   :  { %7164 = vmatpush3.msra.mxu0 %v1684_v63 }
 0xfe8   :  { %7165 = vmatprep.subr.mxu0 %v1683_v4 }
 0xfe9   :  { %7166 = vmatpush3.msra.mxu0 %v1683_v4  ;;  %v2216_v4 = vld [vmem:[#allocation2 + $0x330] sm:$0xff] }
 0xfea   :  { %7167 = vmatprep.subr.mxu0 %v1682_v6 }
 0xfeb   :  { %v7774_v41 = vpop.eup %7773  ;;  %7168 = vmatpush3.msra.mxu0 %v1682_v6 }
 0xfec   :  { %7169 = vmatprep.subr.mxu0 %v1681_v8  ;;  %v1905_v25 = vmul.f32 %v7774_v41, %v7770_v40  ;;  %v7776_v12 = vpop.eup %7775 }
 0xfed   :  { %7170 = vmatpush3.msra.mxu0 %v1681_v8  ;;  %v1906_v14 = vmul.f32 %v7776_v12, %v7772_v42  ;;  %v6171_v8 = vld [vmem:[#allocation2 + $0x328] ss:$0 sm:$0xff] }
 0xfee   :  { %7171 = vmatprep.subr.mxu0 %v1680_v10  ;;  %7175 = vmatprep.mubr.msk.f32.mxu0 %vm732_vm8, %v1905_v25 }
 0xfef   :  { %7172 = vmatpush3.msra.mxu0 %v1680_v10 }
 0xff0   :  { %7173 = vmatprep.subr.mxu0 %v1679_v23 }
 0xff1   :  { %7174 = vmatpush3.msra.mxu0 %v1679_v23 }
 0xff2   :  { %7176 = vmatmul.mubr.msk.f32.vlgmr.msra.gmra.mxu0 %vm732_vm8, %v1906_v14  ;;  %7197 = vmatprep.subr.mxu0 %v7920_v1 }
 0xff3   :  { %7198 = vmatpush3.xpose.msk.msra.mxu0 %vm159_vm1, %v2398_v16  ;;  %7209 = vmatprep.mubr.msk.f32.mxu0 %vm7921_vm0, %v7920_v1  ;;  %v2494_v16 = vld [vmem:[#allocation2 + $0x138] sm:$0xff] }
 0xff4   :  { %7199 = vmatprep.subr.mxu0 %v7920_v1 }
 0xff7   :  { %7200 = vmatpush3.xpose.msk.msra.mxu0 %vm159_vm1, %v2397_v18 }
 0xff8   :  { %7201 = vmatprep.subr.mxu0 %v7920_v1 }
 0xffb   :  { %7202 = vmatpush3.xpose.msk.msra.mxu0 %vm159_vm1, %v2396_v20  ;;  %v2495_v20 = vld [vmem:[#allocation2 + $0x140] sm:$0xff] }
 0xffc   :  { %7203 = vmatprep.subr.mxu0 %v7920_v1 }
 0xfff   :  { %7204 = vmatpush3.xpose.msk.msra.mxu0 %vm159_vm1, %v2395_v22  ;;  %v2496_v22 = vld [vmem:[#allocation2 + $0x148] sm:$0xff] }
0x1000   :  { %7205 = vmatprep.subr.mxu0 %v7920_v1 }
0x1003   :  { %7206 = vmatpush3.xpose.msk.msra.mxu0 %vm159_vm1, %v2394_v33  ;;  %v2497_v33 = vld [vmem:[#allocation2 + $0x150] sm:$0xff] }
0x1004   :  { %7207 = vmatprep.subr.mxu0 %v7920_v1 }
0x1007   :  { %7208 = vmatpush3.xpose.msk.msra.mxu0 %vm159_vm1, %v2393_v21  ;;  %v2500_v21 = vld [vmem:[#allocation2 + $0x168] sm:$0xff] }
0x1008   :  { %7259 = vmatprep.subr.mxu0 %v7920_v1 }
0x100a   :  { %7210 = vmatmul.mubr.msk.f32.vlgmr.msra.gmra.mxu0 %vm159_vm1, %v8417_v54 }
0x100b   :  { %7275 = vmatprep.mubr.msk.f32.mxu0 %vm7921_vm0, %v7920_v1 }
0x10b2   :  { %v7177_v35 = vpop.f32.mrf.mxu0 }
0x10b4   :  { %v1979_v53 = vpop.f32.mrf.mxu0 }
0x10b5   :  { %7182 = vmatprep.mubr.msk.f32.mxu1 %vm159_vm1, %v1979_v53 }
0x10b6   :  { %7183 = vmatmul.mubr.msk.f32.vlgmr.msra.gmra.mxu1 %vm159_vm1, %v7177_v35 }
0x10ca   :  { %v2490_v11 = vpop.f32.mrf.mxu0 }
0x10cb   :  { %v8436_v47 = vadd.f32 %v6184_v46, %v2490_v11 }
0x10cc   :  { %v7211_v19 = vpop.f32.mrf.mxu0 }
0x1176   :  { %v7184_v13 = vpop.f32.mrf.mxu1 }
0x1177   :  { %v2079_v24 = vadd.f32 %v7184_v13, %v6164_v56 }
0x1178   :  { %v2073_v57 = vpop.f32.mrf.mxu1 }
0x1179   :  { %v2074_v60 = vadd.f32 %v6164_v56, %v2073_v57  ;;  %v2083_v17 = vadd.f32 %v2079_v24, %v8250_v30 }
0x117b   :  { %v2089_v15 = vsel %vm1025_vm9, %v2083_v17, 0.0  ;;  %v2082_v36 = vadd.f32 %v2074_v60, %v8246_v32  ;;  %v2124_v32 = vld [vmem:[#allocation2 + $0x320] sm:$0xff] }
0x117c   :  { %2090 = vadd.xlane.f32.xlu1 %v2089_v15  ;;  %7185 = vmatprep.subr.msk.mxu1 %vm159_vm1, %v2124_v32 }
0x117d   :  { %v2086_v38 = vsel %vm159_vm1, %v2082_v36, 0.0  ;;  %7186 = vmatpush3.xpose.msk.msra.mxu1 %vm159_vm1, %v2124_v32  ;;  %v8498_v32 = vld [vmem:[#allocation2 + $0xa8] sm:$0xff] }
0x117e   :  { %2087 = vadd.xlane.f32.xlu0 %v2086_v38  ;;  %7190 = vmatprep.subr.msk.mxu1 %vm1161_vm10, %v2217_v48  ;;  %v8475_v38 = vld [vmem:[#allocation2 + $0xd0] sm:$0xff] }
0x1205   :  { %v2091_v37 = vpop.xlane.xlu1 %2090 }
0x1206   :  { %v2093_v26 = vmul.f32 0.0625, %v2091_v37 }
0x1207   :  { %v2088_v31 = vpop.xlane.xlu0 %2087 }
0x1208   :  { %v2092_v39 = vmul.f32 0.0625, %v2088_v31  ;;  %v2095_v40 = vsub.f32 %v2083_v17, %v2093_v26  ;;  %v8478_v31 = vld [vmem:[#allocation2 + $0xc8] sm:$0xff] }
0x120a   :  { %v2094_v42 = vsub.f32 %v2082_v36, %v2092_v39  ;;  %v2097_v45 = vmul.f32 %v2095_v40, %v2095_v40 }
0x120c   :  { %v2096_v43 = vmul.f32 %v2094_v42, %v2094_v42  ;;  %v2101_v30 = vsel %vm1025_vm9, %v2097_v45, 0.0 }
0x120e   :  { %v2098_v44 = vsel %vm159_vm1, %v2096_v43, 0.0 }
0x120f   :  { %2099 = vadd.xlane.f32.xlu0 %v2098_v44  ;;  %v8488_v44 = vld [vmem:[#allocation2 + $0xb8] sm:$0xff] }
0x1213   :  { %2102 = vadd.xlane.f32.xlu0 %v2101_v30  ;;  %v8493_v30 = vld [vmem:[#allocation2 + $0xb0] sm:$0xff] }
0x1229   :  { %2511 = vrot.lane.b32.xlu0 %v8436_v47, %s7923_s0 }
0x122d   :  { %2651 = vrot.lane.b32.xlu0 %v8436_v47, %s7924_s21 }
0x1298   :  { %v2100_v49 = vpop.xlane.xlu0 %2099 }
0x1299   :  { %v2104_v50 = vmul.f32 0.0625, %v2100_v49  ;;  %v8503_v49 = vld [vmem:[#allocation2 + $0xa0] sm:$0xff] }
0x129b   :  { %v2106_v52 = vadd.f32 1e-05, %v2104_v50 }
0x129c   :  { %v2103_v55 = vpop.xlane.xlu0 %2102 }
0x129d   :  { %7777 = vrsqrt.f32 %v2106_v52  ;;  %v2105_v34 = vmul.f32 0.0625, %v2103_v55  ;;  %v8508_v52 = vld [vmem:[#allocation2 + $0x98] sm:$0xff] }
0x129f   :  { %v2107_v58 = vadd.f32 1e-05, %v2105_v34 }
0x12a0   :  { %v2512_v6 = vpop.permute.xlu0 %2511 }
0x12a1   :  { %7779 = vrsqrt.f32 %v2107_v58 }
0x12a4   :  { %v2652_v18 = vpop.permute.xlu0 %2651 }
0x12aa   :  { %v7778_v59 = vpop.eup %7777 }
0x12ab   :  { %v2110_v0 = vmul.f32 %v7778_v59, %v2094_v42  ;;  %v8483_v42 = vld [vmem:[#allocation2 + $0xc0] sm:$0xff] }
0x12ad   :  { %v2116_v3 = vmul.f32 %v6169_v62, %v2110_v0 }
0x12ae   :  { %v7780_v5 = vpop.eup %7779 }
0x12af   :  { %v2111_v7 = vmul.f32 %v7780_v5, %v2095_v40  ;;  %v2122_v9 = vadd.f32 %v6170_v2, %v2116_v3 }
0x12b1   :  { %v2117_v61 = vmul.f32 %v6169_v62, %v2111_v7  ;;  %7187 = vmatprep.mubr.msk.f32.mxu1 %vm159_vm1, %v2122_v9 }
0x12b3   :  { %v8444_v63 = vadd.f32 %v6170_v2, %v2117_v61 }
0x12b5   :  { %7188 = vmatmul.mubr.msk.f32.vlgmr.msra.gmra.mxu1 %vm159_vm1, %v8444_v63 }
0x12b6   :  { %7191 = vmatpush3.xpose.msk.msra.mxu1 %vm1161_vm10, %v2217_v48 }
0x12b7   :  { %7192 = vmatprep.subr.msk.mxu1 %vm1161_vm10, %v2216_v4 }
0x12ba   :  { %7193 = vmatpush3.xpose.msk.msra.mxu1 %vm1161_vm10, %v2216_v4 }
0x12bb   :  { %7212 = vmatprep.subr.mxu1 %v2512_v6 }
0x1375   :  { %v7189_v41 = vpop.f32.mrf.mxu1 }
0x1376   :  { %v2211_v10 = vadd.f32 %v7189_v41, %v6171_v8 }
0x1377   :  { %v2205_v25 = vpop.f32.mrf.mxu1 }
0x1378   :  { %v2206_v12 = vadd.f32 %v6171_v8, %v2205_v25  ;;  %v2215_v14 = vmax.f32 %v2211_v10, 0.0 }
0x137a   :  { %v2214_v23 = vmax.f32 %v2206_v12, 0.0 }
0x137c   :  { %7194 = vmatprep.mubr.msk.f32.mxu1 %vm1161_vm10, %v2214_v23 }
0x137d   :  { %7195 = vmatmul.mubr.msk.f32.vlgmr.msra.gmra.mxu1 %vm1161_vm10, %v2215_v14 }
0x137e   :  { %7213 = vmatpush3.msra.mxu1 %v2512_v6  ;;  %7214 = vmatprep.mubr.msk.f32.mxu1 %vm1161_vm10, %v2494_v16 }
0x137f   :  { %7226 = vmatprep.subr.mxu1 %v2652_v18 }
0x1381   :  { %7215 = vmatmul.mubr.msk.f32.vlgmr.msra.gmra.mxu1 %vm1161_vm10, %v2495_v20 }
0x1382   :  { %7227 = vmatpush3.msra.mxu1 %v2652_v18  ;;  %7217 = vmatprep.mubr.msk.f32.mxu1 %vm1161_vm10, %v2496_v22  ;;  %v2879_v18 = vld [vmem:[#allocation2 + $0x208] sm:$0xff] }
0x1383   :  { %7240 = vmatprep.subr.mxu1 %v7920_v1 }
0x1385   :  { %7218 = vmatmul.mubr.msk.f32.gmra.mxu1 %vm1161_vm10, %v2497_v33 }
0x1386   :  { %7220 = vmatprep.mubr.msk.f32.mxu1 %vm1161_vm10, %v2498_v51 }
0x1389   :  { %7221 = vmatmul.mubr.msk.f32.gmra.mxu1 %vm1161_vm10, %v2499_v27 }
0x138a   :  { %7223 = vmatprep.mubr.msk.f32.mxu1 %vm1161_vm10, %v2500_v21 }
0x138d   :  { %7224 = vmatmul.mubr.msk.f32.gmra.mxu1 %vm1161_vm10, %v2501_v29 }
0x138e   :  { %7228 = vmatprep.mubr.msk.f32.mxu1 %vm1161_vm10, %v2494_v16  ;;  %v2880_v16 = vld [vmem:[#allocation2 + $0x210] sm:$0xff] }
0x138f   :  { %7260 = vmatpush3.msra.mxu0 %v2880_v16 }
0x1390   :  { %7261 = vmatprep.subr.mxu0 %v7920_v1 }
0x1391   :  { %7229 = vmatmul.mubr.msk.f32.vlgmr.msra.gmra.mxu1 %vm1161_vm10, %v2495_v20  ;;  %7262 = vmatpush3.msra.mxu0 %v2879_v18  ;;  %v2878_v20 = vld [vmem:[#allocation2 + $0x200] sm:$0xff] }
0x1392   :  { %7231 = vmatprep.mubr.msk.f32.mxu1 %vm1161_vm10, %v2496_v22  ;;  %7263 = vmatprep.subr.mxu0 %v7920_v1  ;;  %v2876_v22 = vld [vmem:[#allocation2 + $0x1f0] sm:$0xff] }
0x1393   :  { %7264 = vmatpush3.msra.mxu0 %v2878_v20 }
0x1394   :  { %7265 = vmatprep.subr.mxu0 %v7920_v1 }
0x1395   :  { %7232 = vmatmul.mubr.msk.f32.gmra.mxu1 %vm1161_vm10, %v2497_v33  ;;  %v2875_v33 = vld [vmem:[#allocation2 + $0x1e8] sm:$0xff] }
0x1396   :  { %7234 = vmatprep.mubr.msk.f32.mxu1 %vm1161_vm10, %v2498_v51  ;;  %v2874_v51 = vld [vmem:[#allocation2 + $0x1e0] sm:$0xff] }
0x1399   :  { %7235 = vmatmul.mubr.msk.f32.gmra.mxu1 %vm1161_vm10, %v2499_v27  ;;  %v2873_v27 = vld [vmem:[#allocation2 + $0x1d8] sm:$0xff] }
0x139a   :  { %7237 = vmatprep.mubr.msk.f32.mxu1 %vm1161_vm10, %v2500_v21 }
0x139d   :  { %7238 = vmatmul.mubr.msk.f32.gmra.mxu1 %vm1161_vm10, %v2501_v29 }
0x139e   :  { %7256 = vmatprep.mubr.msk.f32.mxu1 %vm7921_vm0, %v7920_v1 }
0x143d   :  { %v7196_v35 = vpop.f32.mrf.mxu1 }
0x143e   :  { %v8472_v53 = vadd.f32 %v7196_v35, %v6175_v28 }
0x143f   :  { %v2301_v11 = vpop.f32.mrf.mxu1 }
0x1440   :  { %v2302_v19 = vadd.f32 %v6175_v28, %v2301_v11  ;;  %v2311_v25 = vadd.f32 %v8472_v53, %v8444_v63  ;;  %v2877_v63 = vld [vmem:[#allocation2 + $0x1f8] sm:$0xff] }
0x1441   :  { %v7216_v56 = vpop.f32.mrf.mxu1  ;;  %7266 = vmatpush3.msra.mxu0 %v2877_v63  ;;  %v6182_v63 = vld [vmem:[#allocation2 + $0x368] ss:$0 sm:$0xff] }
0x1442   :  { %v2310_v13 = vadd.f32 %v2302_v19, %v2122_v9  ;;  %v2644_v50 = vmul.f32 %v7216_v56, %v8503_v49  ;;  %v2317_v12 = vsel %vm1025_vm9, %v2311_v25, 0.0  ;;  %7267 = vmatprep.subr.mxu0 %v7920_v1 }
0x1443   :  { %v2604_v24 = vpop.f32.mrf.mxu1  ;;  %7268 = vmatpush3.msra.mxu0 %v2876_v22 }
0x1444   :  { %v2314_v57 = vsel %vm159_vm1, %v2310_v13, 0.0  ;;  %v2643_v55 = vmul.f32 %v2604_v24, %v8508_v52  ;;  %7269 = vmatprep.subr.mxu0 %v7920_v1 }
0x1445   :  { %2315 = vadd.xlane.f32.xlu0 %v2314_v57  ;;  %v7219_v60 = vpop.f32.mrf.mxu1  ;;  %7270 = vmatpush3.msra.mxu0 %v2875_v33  ;;  %v6183_v33 = vld [vmem:[#allocation2 + $0x370] ss:$0 sm:$0xff] }
0x1446   :  { %v2646_v46 = vmul.f32 %v7219_v60, %v8493_v30  ;;  %7271 = vmatprep.subr.mxu0 %v7920_v1 }
0x1447   :  { %v2614_v17 = vpop.f32.mrf.mxu1  ;;  %7272 = vmatpush3.msra.mxu0 %v2874_v51 }
0x1448   :  { %v2645_v48 = vmul.f32 %v2614_v17, %v8498_v32  ;;  %7273 = vmatprep.subr.mxu0 %v7920_v1 }
0x1449   :  { %v7222_v15 = vpop.f32.mrf.mxu1  ;;  %7274 = vmatpush3.msra.mxu0 %v2873_v27 }
0x144a   :  { %v2648_v43 = vmul.f32 %v7222_v15, %v8483_v42  ;;  %7278 = vmatprep.subr.mxu0 %v7920_v1 }
0x144b   :  { %v2624_v36 = vpop.f32.mrf.mxu1 }
0x144c   :  { %v2647_v45 = vmul.f32 %v2624_v36, %v8488_v44 }
0x144d   :  { %v7225_v37 = vpop.f32.mrf.mxu1 }
0x144e   :  { %v2650_v26 = vmul.f32 %v7225_v37, %v8475_v38 }
0x144f   :  { %v2634_v39 = vpop.f32.mrf.mxu1 }
0x1450   :  { %7241 = vmatpush3.xpose.msk.msra.mxu1 %vm159_vm1, %v2650_v26  ;;  %v2649_v40 = vmul.f32 %v2634_v39, %v8478_v31 }
0x1451   :  { %7242 = vmatprep.subr.mxu1 %v7920_v1  ;;  %v8519_v34 = vpop.f32.mrf.mxu1 }
0x1453   :  { %v8521_v58 = vpop.f32.mrf.mxu1 }
0x1454   :  { %7243 = vmatpush3.xpose.msk.msra.mxu1 %vm159_vm1, %v2649_v40 }
0x1455   :  { %7244 = vmatprep.subr.mxu1 %v7920_v1  ;;  %v8523_v59 = vpop.f32.mrf.mxu1 }
0x1456   :  { %v2762_v26 = vmul.f32 %v8523_v59, %v8493_v30  ;;  %v2759_v30 = vmul.f32 %v8521_v58, %v8508_v52 }
0x1457   :  { %v8525_v62 = vpop.f32.mrf.mxu1 }
0x1458   :  { %7245 = vmatpush3.xpose.msk.msra.mxu1 %vm159_vm1, %v2648_v43  ;;  %v2761_v40 = vmul.f32 %v8525_v62, %v8498_v32 }
0x1459   :  { %7246 = vmatprep.subr.mxu1 %v7920_v1  ;;  %v8527_v0 = vpop.f32.mrf.mxu1 }
0x145a   :  { %v2764_v36 = vmul.f32 %v8527_v0, %v8483_v42  ;;  %v6181_v42 = vld [vmem:[#allocation2 + $0x360] ss:$0 sm:$0xff] }
0x145b   :  { %v8529_v2 = vpop.f32.mrf.mxu1 }
0x145c   :  { %7247 = vmatpush3.xpose.msk.msra.mxu1 %vm159_vm1, %v2647_v45  ;;  %v2763_v37 = vmul.f32 %v8529_v2, %v8488_v44  ;;  %v2760_v44 = vmul.f32 %v8519_v34, %v8503_v49 }
0x145d   :  { %7248 = vmatprep.subr.mxu1 %v7920_v1  ;;  %v7239_v3 = vpop.f32.mrf.mxu1 }
0x145e   :  { %v2766_v17 = vmul.f32 %v7239_v3, %v8475_v38 }
0x145f   :  { %v2750_v7 = vpop.f32.mrf.mxu1 }
0x1460   :  { %7249 = vmatpush3.xpose.msk.msra.mxu1 %vm159_vm1, %v2646_v46  ;;  %v2765_v15 = vmul.f32 %v2750_v7, %v8478_v31  ;;  %v6180_v31 = vld [vmem:[#allocation2 + $0x358] ss:$0 sm:$0xff]  ;;  %v3029_v7 = vld [vmem:[#allocation2 + $0x3b0] sm:$0xff] }
0x1461   :  { %7250 = vmatprep.subr.mxu1 %v7920_v1 }
0x1464   :  { %7251 = vmatpush3.xpose.msk.msra.mxu1 %vm159_vm1, %v2645_v48 }
0x1465   :  { %7252 = vmatprep.subr.mxu1 %v7920_v1 }
0x1468   :  { %7253 = vmatpush3.xpose.msk.msra.mxu1 %vm159_vm1, %v2644_v50 }
0x1469   :  { %7254 = vmatprep.subr.mxu1 %v7920_v1 }
0x146c   :  { %7255 = vmatpush3.xpose.msk.msra.mxu1 %vm159_vm1, %v2643_v55 }
0x146d   :  { %7297 = vmatprep.subr.mxu1 %v7920_v1 }
0x146f   :  { %7257 = vmatmul.mubr.msk.f32.vlgmr.msra.gmra.mxu1 %vm159_vm1, %v8436_v47  ;;  %v2864_v47 = vld [vmem:[#allocation2 + $0x228] sm:$0xff] }
0x1470   :  { %7301 = vmatprep.mubr.msk.f32.mxu1 %vm7921_vm0, %v7920_v1 }
0x14ce   :  { %v2316_v5 = vpop.xlane.xlu0 %2315 }
0x14cf   :  { %v2320_v61 = vmul.f32 0.0625, %v2316_v5  ;;  %v3030_v5 = vld [vmem:[#allocation2 + $0x3b8] sm:$0xff] }
0x14d0   :  { %7298 = vmatpush3.xpose.msk.msra.mxu1 %vm159_vm1, %v3030_v5  ;;  %v8646_v5 = vld [vmem:[#allocation2 + $0xf8] sm:$0xff] }
0x14d1   :  { %v8531_v41 = vsub.f32 %v2310_v13, %v2320_v61  ;;  %7299 = vmatprep.subr.mxu1 %v7920_v1 }
0x14d3   :  { %v2324_v23 = vmul.f32 %v8531_v41, %v8531_v41 }
0x14d4   :  { %7300 = vmatpush3.xpose.msk.msra.mxu1 %vm159_vm1, %v3029_v7  ;;  %v8650_v7 = vld [vmem:[#allocation2 + $0x1c0] sm:$0xff] }
0x14d5   :  { %v2326_v14 = vsel %vm159_vm1, %v2324_v23, 0.0 }
0x152f   :  { %v2859_v9 = vpop.f32.mrf.mxu1 }
0x1530   :  { %v2863_v4 = vmul.f32 0.70710677, %v2859_v9 }
0x1531   :  { %v7258_v6 = vpop.f32.mrf.mxu1 }
0x1532   :  { %v2865_v8 = vadd.f32 %v2864_v47, %v2863_v4 }
0x1534   :  { %v2867_v10 = vsel %vm2866_vm11, %v2865_v8, -inf }
0x1535   :  { %2868 = vmax.xlane.f32.xlu1 %v2867_v10 }
0x1539   :  { %2318 = vadd.xlane.f32.xlu1 %v2317_v12  ;;  %v3230_v12 = vld [vmem:[#allocation2 + $0x3f0] sm:$0xff] }
0x153a   :  { %7311 = vmatprep.subr.msk.mxu1 %vm159_vm1, %v3230_v12 }
0x153d   :  { %2327 = vadd.xlane.f32.xlu1 %v2326_v14 }
0x15be   :  { %v2869_v21 = vpop.xlane.xlu1 %2868 }
0x15bf   :  { %v2870_v29 = vsub.f32 %v2865_v8, %v2869_v21  ;;  %v3229_v21 = vld [vmem:[#allocation2 + $0x3e8] sm:$0xff] }
0x15c1   :  { %v2871_v28 = vmul.f32 1.442695, %v2870_v29 }
0x15c2   :  { %v2319_v35 = vpop.xlane.xlu1 %2318 }
0x15c3   :  { %7781 = vpow2.f32 %v2871_v28  ;;  %v2321_v53 = vmul.f32 0.0625, %v2319_v35  ;;  %v3228_v28 = vld [vmem:[#allocation2 + $0x3e0] sm:$0xff]  ;;  %v3227_v35 = vld [vmem:[#allocation2 + $0x3d8] sm:$0xff] }
0x15c5   :  { %v2323_v11 = vsub.f32 %v2311_v25, %v2321_v53 }
0x15c6   :  { %v2328_v19 = vpop.xlane.xlu1 %2327 }
0x15c7   :  { %v2332_v56 = vmul.f32 0.0625, %v2328_v19  ;;  %v2325_v13 = vmul.f32 %v2323_v11, %v2323_v11 }
0x15c9   :  { %v2334_v24 = vadd.f32 1e-05, %v2332_v56  ;;  %v2329_v57 = vsel %vm1025_vm9, %v2325_v13, 0.0 }
0x15ca   :  { %2330 = vadd.xlane.f32.xlu1 %v2329_v57 }
0x15cb   :  { %7783 = vrsqrt.f32 %v2334_v24 }
0x15d0   :  { %v7782_v60 = vpop.eup %7781 }
0x15d1   :  { %7276 = vmatmul.mubr.msk.f32.vlgmr.msra.gmra.mxu0 %vm2866_vm11, %v7782_v60 }
0x15d2   :  { %7279 = vmatpush3.msra.mxu0 %v2766_v17  ;;  %7294 = vmatprep.mubr.msk.f32.mxu0 %vm7921_vm0, %v7920_v1  ;;  %v6219_v17 = vld [vmem:[#allocation2 + $0x3c0] ss:$0 sm:$0xff] }
0x15d3   :  { %7280 = vmatprep.subr.mxu0 %v7920_v1 }
0x15d4   :  { %7281 = vmatpush3.msra.mxu0 %v2765_v15 }
0x15d5   :  { %7282 = vmatprep.subr.mxu0 %v7920_v1 }
0x15d6   :  { %7283 = vmatpush3.msra.mxu0 %v2764_v36 }
0x15d7   :  { %7284 = vmatprep.subr.mxu0 %v7920_v1 }
0x15d8   :  { %v7784_v38 = vpop.eup %7783  ;;  %7285 = vmatpush3.msra.mxu0 %v2763_v37 }
0x15d9   :  { %7286 = vmatprep.subr.mxu0 %v7920_v1  ;;  %v2338_v39 = vmul.f32 %v7784_v38, %v8531_v41 }
0x15da   :  { %7287 = vmatpush3.msra.mxu0 %v2762_v26 }
0x15db   :  { %7288 = vmatprep.subr.mxu0 %v7920_v1  ;;  %v2344_v43 = vmul.f32 %v6180_v31, %v2338_v39  ;;  %v3142_v39 = vld [vmem:[#allocation2 + $0x3c8] sm:$0xff] }
0x15dc   :  { %7289 = vmatpush3.msra.mxu0 %v2761_v40  ;;  %v8611_v40 = vld [vmem:[#allocation2 + $0x3f8] ss:$0 sm:$0xff] }
0x15dd   :  { %7290 = vmatprep.subr.mxu0 %v7920_v1  ;;  %v2350_v45 = vadd.f32 %v6181_v42, %v2344_v43 }
0x15de   :  { %7291 = vmatpush3.msra.mxu0 %v2760_v44 }
0x15df   :  { %7292 = vmatprep.subr.mxu0 %v7920_v1  ;;  %v2354_v46 = vsel %vm159_vm1, %v2350_v45, 0.0 }
0x15e0   :  { %7293 = vmatpush3.msra.mxu0 %v2759_v30  ;;  %2355 = vadd.xlane.f32.xlu1 %v2354_v46 }
0x15e1   :  { %7304 = vmatprep.subr.mxu0 %v7920_v1 }
0x1653   :  { %v2331_v32 = vpop.xlane.xlu1 %2330 }
0x1654   :  { %v2333_v48 = vmul.f32 0.0625, %v2331_v32 }
0x1656   :  { %v2335_v50 = vadd.f32 1e-05, %v2333_v48 }
0x1658   :  { %7785 = vrsqrt.f32 %v2335_v50 }
0x1665   :  { %v7786_v49 = vpop.eup %7785 }
0x1666   :  { %v2339_v55 = vmul.f32 %v7786_v49, %v2323_v11 }
0x1668   :  { %v2345_v34 = vmul.f32 %v6180_v31, %v2339_v55  ;;  %v3143_v31 = vld [vmem:[#allocation2 + $0x3d0] sm:$0xff] }
0x1669   :  { %v2356_v59 = vpop.xlane.xlu1 %2355 }
0x166a   :  { %v2360_v62 = vmul.f32 0.0625, %v2356_v59  ;;  %v2351_v0 = vadd.f32 %v6181_v42, %v2345_v34 }
0x166c   :  { %v2362_v52 = vsub.f32 %v2350_v45, %v2360_v62  ;;  %v2357_v58 = vsel %vm1025_vm9, %v2351_v0, 0.0 }
0x166d   :  { %2358 = vadd.xlane.f32.xlu1 %v2357_v58  ;;  %v8634_v58 = vld [vmem:[#allocation2 + $0x1d0] sm:$0xff] }
0x166e   :  { %v2364_v2 = vmul.f32 %v2362_v52, %v2362_v52 }
0x1670   :  { %v2366_v3 = vsel %vm159_vm1, %v2364_v2, 0.0  ;;  %v8638_v2 = vld [vmem:[#allocation2 + $0x1c8] sm:$0xff] }
0x1671   :  { %2367 = vadd.xlane.f32.xlu1 %v2366_v3  ;;  %v8641_v3 = vld [vmem:[#allocation2 + $0xf0] sm:$0xff] }
0x1691   :  { %v2950_v9 = vpop.f32.mrf.mxu0 }
0x1692   :  { %7787 = vrcp.f32 %v2950_v9 }
0x1693   :  { %v7277_v47 = vpop.f32.mrf.mxu0 }
0x1694   :  { %v6223_v47 = vld [vmem:[#allocation2 + $0x440] ss:$0 sm:$0xff] }
0x169f   :  { %v7788_v61 = vpop.eup %7787 }
0x16a0   :  { %v2955_v4 = vmul.f32 %v7788_v61, %v7782_v60  ;;  %v8602_v60 = vld [vmem:[#allocation2 + $0xd8] sm:$0xff] }
0x16a1   :  { %v8654_v61 = vld [vmem:[#allocation2 + $0x1b8] sm:$0xff] }
0x16a2   :  { %7295 = vmatmul.mubr.msk.f32.vlgmr.msra.gmra.mxu0 %vm2866_vm11, %v2955_v4 }
0x16a3   :  { %7308 = vmatprep.mubr.msk.f32.mxu0 %vm7921_vm0, %v7920_v1  ;;  %7305 = vmatpush3.xpose.msk.msra.mxu0 %vm159_vm1, %v3143_v31  ;;  %v8753_v31 = vld [vmem:[#allocation2 + $0x90] sm:$0xff] }
0x16a4   :  { %7306 = vmatprep.subr.mxu0 %v7920_v1 }
0x16a7   :  { %7307 = vmatpush3.xpose.msk.msra.mxu0 %vm159_vm1, %v3142_v39 }
0x16f6   :  { %v2359_v6 = vpop.xlane.xlu1 %2358 }
0x16f7   :  { %v2361_v8 = vmul.f32 0.0625, %v2359_v6  ;;  %v8657_v6 = vld [vmem:[#allocation2 + $0x100] sm:$0xff] }
0x16f9   :  { %v2363_v41 = vsub.f32 %v2351_v0, %v2361_v8  ;;  %v8625_v0 = vld [vmem:[#allocation2 + $0xe0] sm:$0xff]  ;;  %v6224_v8 = vld [vmem:[#allocation2 + $0x448] ss:$0 sm:$0xff] }
0x16fa   :  { %v2368_v23 = vpop.xlane.xlu1 %2367 }
0x16fb   :  { %v2365_v10 = vmul.f32 %v2363_v41, %v2363_v41  ;;  %v2372_v14 = vmul.f32 0.0625, %v2368_v23 }
0x16fd   :  { %v2369_v25 = vsel %vm1025_vm9, %v2365_v10, 0.0  ;;  %v2374_v16 = vadd.f32 1e-05, %v2372_v14  ;;  %v8666_v10 = vld [vmem:[#allocation2 + $0x1b0] sm:$0xff] }
0x16fe   :  { %2370 = vadd.xlane.f32.xlu1 %v2369_v25  ;;  %v8675_v14 = vld [vmem:[#allocation2 + $0x110] sm:$0xff] }
0x16ff   :  { %7789 = vrsqrt.f32 %v2374_v16  ;;  %v8680_v16 = vld [vmem:[#allocation2 + $0x118] sm:$0xff] }
0x170c   :  { %v7790_v18 = vpop.eup %7789 }
0x170d   :  { %v2378_v20 = vmul.f32 %v7790_v18, %v2362_v52  ;;  %v8630_v52 = vld [vmem:[#allocation2 + $0xe8] sm:$0xff]  ;;  %v8684_v18 = vld [vmem:[#allocation2 + $0x1a0] sm:$0xff] }
0x170f   :  { %v2384_v22 = vmul.f32 %v6182_v63, %v2378_v20  ;;  %v8694_v20 = vld [vmem:[#allocation2 + $0x120] sm:$0xff] }
0x1711   :  { %v8586_v27 = vadd.f32 %v6183_v33, %v2384_v22  ;;  %v8707_v22 = vld [vmem:[#allocation2 + $0x198] sm:$0xff] }
0x1762   :  { %v3025_v51 = vpop.f32.mrf.mxu0 }
0x1763   :  { %7302 = vmatmul.mubr.msk.f32.vlgmr.msra.gmra.mxu1 %vm159_vm1, %v3025_v51  ;;  %v8715_v51 = vld [vmem:[#allocation2 + $0x190] sm:$0xff] }
0x1764   :  { %v7296_v29 = vpop.f32.mrf.mxu0  ;;  %7319 = vmatprep.mubr.msk.f32.mxu1 %vm159_vm1, %v8586_v27  ;;  %7312 = vmatpush3.xpose.msk.msra.mxu1 %vm159_vm1, %v3230_v12  ;;  %v8670_v12 = vld [vmem:[#allocation2 + $0x1a8] sm:$0xff] }
0x1765   :  { %7313 = vmatprep.subr.msk.mxu1 %vm159_vm1, %v3229_v21  ;;  %v8729_v29 = vld [vmem:[#allocation2 + $0x180] sm:$0xff] }
0x1768   :  { %7314 = vmatpush3.xpose.msk.msra.mxu1 %vm159_vm1, %v3229_v21  ;;  %v8725_v21 = vld [vmem:[#allocation2 + $0x188] sm:$0xff] }
0x1769   :  { %7315 = vmatprep.subr.msk.mxu1 %vm159_vm1, %v3228_v28 }
0x176c   :  { %7316 = vmatpush3.xpose.msk.msra.mxu1 %vm159_vm1, %v3228_v28  ;;  %v8737_v28 = vld [vmem:[#allocation2 + $0x178] sm:$0xff] }
0x176d   :  { %7317 = vmatprep.subr.msk.mxu1 %vm159_vm1, %v3227_v35 }
0x1770   :  { %7318 = vmatpush3.xpose.msk.msra.mxu1 %vm159_vm1, %v3227_v35 }
0x1787   :  { %v2371_v53 = vpop.xlane.xlu1 %2370 }
0x1788   :  { %v2373_v11 = vmul.f32 0.0625, %v2371_v53 }
0x178a   :  { %v2375_v19 = vadd.f32 1e-05, %v2373_v11 }
0x178c   :  { %7791 = vrsqrt.f32 %v2375_v19 }
0x1799   :  { %v7792_v56 = vpop.eup %7791 }
0x179a   :  { %v2379_v13 = vmul.f32 %v7792_v56, %v2363_v41  ;;  %v8662_v41 = vld [vmem:[#allocation2 + $0x108] sm:$0xff] }
0x179c   :  { %v2385_v24 = vmul.f32 %v6182_v63, %v2379_v13  ;;  %v8698_v63 = vld [vmem:[#allocation2 + $0x128] sm:$0xff] }
0x179e   :  { %v8598_v57 = vadd.f32 %v6183_v33, %v2385_v24  ;;  %v8710_v33 = vld [vmem:[#allocation2 + $0x130] sm:$0xff] }
0x17a0   :  { %7320 = vmatmul.mubr.msk.f32.vlgmr.msra.gmra.mxu1 %vm159_vm1, %v8598_v57 }
0x17a1   :  { %7348 = vmatprep.mubr.msk.f32.mxu1 %vm290_vm5, %v8602_v60 }
0x1823   :  { %v3111_v15 = vpop.f32.mrf.mxu1 }
0x1824   :  { %v3112_v36 = vadd.f32 %v6219_v17, %v3111_v15 }
0x1825   :  { %v7303_v37 = vpop.f32.mrf.mxu1 }
0x1826   :  { %v3115_v38 = vadd.f32 %v3112_v36, %v8417_v54 }
0x1828   :  { %v3118_v26 = vsel %vm159_vm1, %v3115_v38, 0.0 }
0x1829   :  { %3119 = vadd.xlane.f32.xlu0 %v3118_v26 }
0x183f   :  { %3232 = vrot.lane.b32.xlu0 %v8611_v40, %s7923_s0 }
0x1860   :  { %v7321_v54 = vpop.f32.mrf.mxu1 }
0x1862   :  { %v3319_v48 = vpop.f32.mrf.mxu1 }
0x18b2   :  { %v3120_v42 = vpop.xlane.xlu0 %3119 }
0x18b3   :  { %v3121_v43 = vmul.f32 0.0625, %v3120_v42 }
0x18b5   :  { %v3122_v44 = vsub.f32 %v3115_v38, %v3121_v43  ;;  %v8758_v43 = vld [vmem:[#allocation2 + $0x88] sm:$0xff] }
0x18b6   :  { %v3233_v45 = vpop.permute.xlu0 %3232 }
0x18b7   :  { %v8615_v30 = vadd.f32 %v7321_v54, %v3233_v45  ;;  %v3123_v46 = vmul.f32 %v3122_v44, %v3122_v44  ;;  %v3320_v50 = vadd.f32 %v3319_v48, %v3233_v45  ;;  %v8763_v54 = vld [vmem:[#allocation2 + $0x80] sm:$0xff] }
0x18b9   :  { %7322 = vmatprep.subr.msk.mxu0 %vm327_vm6, %v8615_v30  ;;  %v3124_v32 = vsel %vm159_vm1, %v3123_v46, 0.0 }
0x18ba   :  { %3125 = vadd.xlane.f32.xlu1 %v3124_v32  ;;  %v8773_v32 = vld [vmem:[#allocation2 + $0x70] sm:$0xff] }
0x18cb   :  { %3471 = vrot.lane.b32.xlu1 %v8615_v30, %s7923_s0 }
0x18cf   :  { %3469 = vrot.lane.b32.xlu1 %v3320_v50, %s7923_s0 }
0x1943   :  { %v3126_v49 = vpop.xlane.xlu1 %3125 }
0x1944   :  { %v3127_v55 = vmul.f32 0.0625, %v3126_v49 }
0x1946   :  { %v3128_v34 = vadd.f32 1e-05, %v3127_v55  ;;  %v8783_v55 = vld [vmem:[#allocation2 + $0x60] sm:$0xff] }
0x1947   :  { %v3472_v59 = vpop.permute.xlu1 %3471 }
0x1948   :  { %7793 = vrsqrt.f32 %v3128_v34  ;;  %7344 = vmatprep.subr.msk.mxu1 %vm327_vm6, %v3472_v59 }
0x1949   :  { %7345 = vmatpush3.msk.msra.mxu1 %vm327_vm6, %v3472_v59  ;;  %v8788_v59 = vld [vmem:[#allocation2 + $0x58] sm:$0xff] }
0x194b   :  { %v3470_v62 = vpop.permute.xlu1 %3469 }
0x194c   :  { %7346 = vmatprep.subr.mxu1 %v3470_v62 }
0x194d   :  { %7347 = vmatpush3.msra.mxu1 %v3470_v62 }
0x194e   :  { %7349 = vmatmul.mubr.msk.f32.vlgmr.msra.gmra.mxu1 %vm290_vm5, %v8625_v0  ;;  %7393 = vmatprep.subr.mxu1 %v7920_v1 }
0x194f   :  { %7351 = vmatprep.mubr.msk.f32.mxu1 %vm290_vm5, %v8630_v52  ;;  %7394 = vmatpush3.msra.mxu1 %v8634_v58 }
0x1950   :  { %7395 = vmatprep.subr.mxu1 %v7920_v1 }
0x1951   :  { %7396 = vmatpush3.msra.mxu1 %v8638_v2 }
0x1952   :  { %7352 = vmatmul.mubr.msk.f32.gmra.mxu1 %vm290_vm5, %v8641_v3  ;;  %7397 = vmatprep.subr.mxu1 %v7920_v1 }
0x1953   :  { %7354 = vmatprep.mubr.msk.f32.mxu1 %vm290_vm5, %v8646_v5  ;;  %7398 = vmatpush3.msra.mxu1 %v8650_v7 }
0x1954   :  { %7399 = vmatprep.subr.mxu1 %v7920_v1 }
0x1955   :  { %v7794_v9 = vpop.eup %7793  ;;  %7400 = vmatpush3.msra.mxu1 %v8654_v61 }
0x1956   :  { %v3130_v4 = vmul.f32 %v7794_v9, %v3122_v44  ;;  %7355 = vmatmul.mubr.msk.f32.gmra.mxu1 %vm290_vm5, %v8657_v6  ;;  %7401 = vmatprep.subr.mxu1 %v7920_v1  ;;  %v8793_v9 = vld [vmem:[#allocation2 + $0x50] sm:$0xff] }
0x1957   :  { %7357 = vmatprep.mubr.msk.f32.mxu1 %vm290_vm5, %v8662_v41  ;;  %7402 = vmatpush3.msra.mxu1 %v8666_v10 }
0x1958   :  { %v3135_v25 = vmul.f32 %v6223_v47, %v3130_v4  ;;  %7403 = vmatprep.subr.mxu1 %v7920_v1  ;;  %v8798_v4 = vld [vmem:[#allocation2 + $0x48] sm:$0xff] }
0x1959   :  { %7404 = vmatpush3.msra.mxu1 %v8670_v12 }
0x195a   :  { %v8673_v23 = vadd.f32 %v6224_v8, %v3135_v25  ;;  %7358 = vmatmul.mubr.msk.f32.gmra.mxu1 %vm290_vm5, %v8675_v14  ;;  %7405 = vmatprep.subr.mxu1 %v7920_v1  ;;  %v8803_v25 = vld [vmem:[#allocation2 + $0x40] sm:$0xff] }
0x195b   :  { %7360 = vmatprep.mubr.msk.f32.mxu1 %vm290_vm5, %v8680_v16  ;;  %7406 = vmatpush3.msra.mxu1 %v8684_v18  ;;  %9230 = vst [vmem:[#allocation5_spill] sm:$0xff] %v8803_v25 }
0x195c   :  { %7309 = vmatmul.mubr.msk.f32.vlgmr.msra.gmra.mxu0 %vm159_vm1, %v8673_v23  ;;  %7407 = vmatprep.subr.mxu1 %v7920_v1 }
0x195d   :  { %7323 = vmatpush3.msk.msra.mxu0 %vm327_vm6, %v8615_v30  ;;  %7326 = vmatprep.mubr.msk.f32.mxu0 %vm290_vm5, %v8602_v60  ;;  %v8768_v30 = vld [vmem:[#allocation2 + $0x78] sm:$0xff] }
0x195e   :  { %7324 = vmatprep.subr.mxu0 %v3320_v50  ;;  %7361 = vmatmul.mubr.msk.f32.gmra.mxu1 %vm290_vm5, %v8694_v20 }
0x195f   :  { %7325 = vmatpush3.msra.mxu0 %v3320_v50  ;;  %7363 = vmatprep.mubr.msk.f32.mxu1 %vm290_vm5, %v8698_v63  ;;  %v8778_v50 = vld [vmem:[#allocation2 + $0x68] sm:$0xff] }
0x1960   :  { %7327 = vmatmul.mubr.msk.f32.vlgmr.msra.gmra.mxu0 %vm290_vm5, %v8625_v0  ;;  %7366 = vmatprep.subr.mxu0 %v7920_v1 }
0x1961   :  { %7329 = vmatprep.mubr.msk.f32.mxu0 %vm290_vm5, %v8630_v52  ;;  %7408 = vmatpush3.msra.mxu1 %v8707_v22 }
0x1962   :  { %7364 = vmatmul.mubr.msk.f32.gmra.mxu1 %vm290_vm5, %v8710_v33  ;;  %7409 = vmatprep.subr.mxu1 %v7920_v1 }
0x1963   :  { %7410 = vmatpush3.msra.mxu1 %v8715_v51  ;;  %7417 = vmatprep.mubr.msk.f32.mxu1 %vm7921_vm0, %v7920_v1 }
0x1964   :  { %7330 = vmatmul.mubr.msk.f32.gmra.mxu0 %vm290_vm5, %v8641_v3  ;;  %7411 = vmatprep.subr.mxu1 %v7920_v1 }
0x1965   :  { %7332 = vmatprep.mubr.msk.f32.mxu0 %vm290_vm5, %v8646_v5  ;;  %7412 = vmatpush3.msra.mxu1 %v8725_v21 }
0x1966   :  { %7413 = vmatprep.subr.mxu1 %v7920_v1 }
0x1967   :  { %7414 = vmatpush3.msra.mxu1 %v8729_v29 }
0x1968   :  { %7333 = vmatmul.mubr.msk.f32.gmra.mxu0 %vm290_vm5, %v8657_v6  ;;  %7415 = vmatprep.subr.mxu1 %v7920_v1 }
0x1969   :  { %7335 = vmatprep.mubr.msk.f32.mxu0 %vm290_vm5, %v8662_v41  ;;  %7416 = vmatpush3.msra.mxu1 %v8737_v28 }
0x196a   :  { %7420 = vmatprep.subr.mxu1 %v7920_v1 }
0x196c   :  { %7336 = vmatmul.mubr.msk.f32.gmra.mxu0 %vm290_vm5, %v8675_v14 }
0x196d   :  { %7338 = vmatprep.mubr.msk.f32.mxu0 %vm290_vm5, %v8680_v16 }
0x1970   :  { %7339 = vmatmul.mubr.msk.f32.gmra.mxu0 %vm290_vm5, %v8694_v20 }
0x1971   :  { %7341 = vmatprep.mubr.msk.f32.mxu0 %vm290_vm5, %v8698_v63 }
0x1974   :  { %7342 = vmatmul.mubr.msk.f32.gmra.mxu0 %vm290_vm5, %v8710_v33 }
0x1975   :  { %7390 = vmatprep.mubr.msk.f32.mxu0 %vm7921_vm0, %v7920_v1 }
0x1a1c   :  { %v3223_v35 = vpop.f32.mrf.mxu0 }
0x1a1e   :  { %v7310_v53 = vpop.f32.mrf.mxu0 }
0x1a20   :  { %v7328_v11 = vpop.f32.mrf.mxu0 }
0x1a21   :  { %v3457_v53 = vmul.f32 %v8803_v25, %v7328_v11 }
0x1a22   :  { %v3397_v19 = vpop.f32.mrf.mxu0 }
0x1a24   :  { %v7331_v56 = vpop.f32.mrf.mxu0 }
0x1a25   :  { %v3459_v47 = vmul.f32 %v8793_v9, %v7331_v56  ;;  %v8808_v56 = vld [vmem:[#allocation2 + $0x38] sm:$0xff] }
0x1a26   :  { %v3407_v13 = vpop.f32.mrf.mxu0  ;;  %9231 = vst [vmem:[#allocation6_spill] sm:$0xff] %v8808_v56 }
0x1a27   :  { %v3458_v8 = vmul.f32 %v8798_v4, %v3407_v13  ;;  %v3224_v13 = vadd.f32 %v8611_v40, %v3223_v35 }
0x1a28   :  { %v7334_v24 = vpop.f32.mrf.mxu0 }
0x1a29   :  { %v3461_v34 = vmul.f32 %v8783_v55, %v7334_v24  ;;  %v3456_v24 = vmul.f32 %v8808_v56, %v3397_v19 }
0x1a2a   :  { %v3417_v17 = vpop.f32.mrf.mxu0 }
0x1a2b   :  { %v3460_v62 = vmul.f32 %v8788_v59, %v3417_v17  ;;  %v8817_v17 = vld [vmem:[#allocation2 + $0x230] sm:$0xff] }
0x1a2c   :  { %v7337_v15 = vpop.f32.mrf.mxu0  ;;  %9232 = vst [vmem:[#allocation7_spill] sm:$0xff] %v8817_v17 }
0x1a2d   :  { %v3463_v48 = vmul.f32 %v8773_v32, %v7337_v15 }
0x1a2e   :  { %v3427_v36 = vpop.f32.mrf.mxu0 }
0x1a2f   :  { %v3462_v49 = vmul.f32 %v8778_v50, %v3427_v36 }
0x1a30   :  { %v7340_v37 = vpop.f32.mrf.mxu0 }
0x1a31   :  { %v3465_v45 = vmul.f32 %v8763_v54, %v7340_v37 }
0x1a32   :  { %v3437_v38 = vpop.f32.mrf.mxu0 }
0x1a33   :  { %v3464_v46 = vmul.f32 %v8768_v30, %v3437_v38  ;;  %v7350_v38 = vpop.f32.mrf.mxu1 }
0x1a34   :  { %v7343_v26 = vpop.f32.mrf.mxu0 }
0x1a35   :  { %v3467_v39 = vmul.f32 %v8753_v31, %v7343_v26  ;;  %v3542_v26 = vpop.f32.mrf.mxu1 }
0x1a36   :  { %v3447_v42 = vpop.f32.mrf.mxu0 }
0x1a37   :  { %7367 = vmatpush3.xpose.msk.msra.mxu0 %vm159_vm1, %v3467_v39  ;;  %v3466_v44 = vmul.f32 %v8758_v43, %v3447_v42  ;;  %v7353_v40 = vpop.f32.mrf.mxu1 }
0x1a38   :  { %7368 = vmatprep.subr.mxu0 %v7920_v1 }
0x1a39   :  { %v3552_v35 = vpop.f32.mrf.mxu1 }
0x1a3b   :  { %7369 = vmatpush3.xpose.msk.msra.mxu0 %vm159_vm1, %v3466_v44  ;;  %v7356_v39 = vpop.f32.mrf.mxu1 }
0x1a3c   :  { %7370 = vmatprep.subr.mxu0 %v7920_v1 }
0x1a3d   :  { %v3562_v42 = vpop.f32.mrf.mxu1 }
0x1a3f   :  { %7371 = vmatpush3.xpose.msk.msra.mxu0 %vm159_vm1, %v3465_v45  ;;  %v7359_v44 = vpop.f32.mrf.mxu1 }
0x1a40   :  { %7372 = vmatprep.subr.mxu0 %v7920_v1 }
0x1a41   :  { %v3572_v45 = vpop.f32.mrf.mxu1 }
0x1a43   :  { %7373 = vmatpush3.xpose.msk.msra.mxu0 %vm159_vm1, %v3464_v46 }
0x1a44   :  { %7374 = vmatprep.subr.mxu0 %v7920_v1 }
0x1a47   :  { %7375 = vmatpush3.xpose.msk.msra.mxu0 %vm159_vm1, %v3463_v48 }
0x1a48   :  { %7376 = vmatprep.subr.mxu0 %v7920_v1 }
0x1a4b   :  { %7377 = vmatpush3.xpose.msk.msra.mxu0 %vm159_vm1, %v3462_v49 }
0x1a4c   :  { %7378 = vmatprep.subr.mxu0 %v7920_v1 }
0x1a4f   :  { %7379 = vmatpush3.xpose.msk.msra.mxu0 %vm159_vm1, %v3461_v34  ;;  %v7362_v34 = vpop.f32.mrf.mxu1 }
0x1a50   :  { %7380 = vmatprep.subr.mxu0 %v7920_v1 }
0x1a53   :  { %7381 = vmatpush3.xpose.msk.msra.mxu0 %vm159_vm1, %v3460_v62  ;;  %v3582_v62 = vpop.f32.mrf.mxu1 }
0x1a54   :  { %7382 = vmatprep.subr.mxu0 %v7920_v1 }
0x1a57   :  { %7383 = vmatpush3.xpose.msk.msra.mxu0 %vm159_vm1, %v3459_v47  ;;  %v7365_v47 = vpop.f32.mrf.mxu1 }
0x1a58   :  { %7384 = vmatprep.subr.mxu0 %v7920_v1 }
0x1a5b   :  { %7385 = vmatpush3.xpose.msk.msra.mxu0 %vm159_vm1, %v3458_v8  ;;  %v3592_v8 = vpop.f32.mrf.mxu1 }
0x1a5c   :  { %7386 = vmatprep.subr.mxu0 %v7920_v1 }
0x1a5f   :  { %7387 = vmatpush3.xpose.msk.msra.mxu0 %vm159_vm1, %v3457_v53  ;;  %v3612_v53 = vmul.f32 %v8753_v31, %v7365_v47  ;;  %v6276_v47 = vld [vmem:[#allocation2 + $0x410] ss:$0 sm:$0xff] }
0x1a60   :  { %7388 = vmatprep.subr.mxu0 %v7920_v1 }
0x1a63   :  { %7389 = vmatpush3.xpose.msk.msra.mxu0 %vm159_vm1, %v3456_v24 }
0x1a64   :  { %7447 = vmatprep.subr.mxu0 %v7920_v1 }
0x1a66   :  { %7391 = vmatmul.mubr.msk.f32.vlgmr.msra.gmra.mxu0 %vm159_vm1, %v3224_v13  ;;  %v3611_v13 = vmul.f32 %v8758_v43, %v3592_v8 }
0x1a67   :  { %7451 = vmatprep.mubr.msk.f32.mxu0 %vm7921_vm0, %v7920_v1 }
0x1b26   :  { %v3718_v11 = vpop.f32.mrf.mxu0 }
0x1b27   :  { %v3722_v15 = vmul.f32 0.70710677, %v3718_v11  ;;  %v3610_v11 = vmul.f32 %v8763_v54, %v7362_v34 }
0x1b28   :  { %v7392_v36 = vpop.f32.mrf.mxu0 }
0x1b29   :  { %v3724_v37 = vadd.f32 %v8817_v17, %v3722_v15  ;;  %v3609_v15 = vmul.f32 %v8768_v30, %v3582_v62  ;;  %v3608_v36 = vmul.f32 %v8773_v32, %v7359_v44  ;;  %v3604_v44 = vmul.f32 %v8793_v9, %v7353_v40  ;;  %v3880_v40 = vld [vmem:[#allocation2 + $0x408] sm:$0xff] }
0x1b2a   :  { %7448 = vmatpush3.xpose.msk.msra.mxu0 %vm159_vm1, %v3880_v40  ;;  %v6280_v40 = vld [vmem:[#allocation2 + $0x450] ss:$0 sm:$0xff] }
0x1b2b   :  { %v3725_v19 = vsel %vm732_vm8, %v3724_v37, -inf  ;;  %7449 = vmatprep.subr.mxu0 %v7920_v1 }
0x1b2c   :  { %3726 = vmax.xlane.f32.xlu1 %v3725_v19  ;;  %v3606_v19 = vmul.f32 %v8783_v55, %v7356_v39  ;;  %v3602_v39 = vmul.f32 %v8803_v25, %v7350_v38  ;;  %v3879_v38 = vld [vmem:[#allocation2 + $0x400] sm:$0xff] }
0x1b2e   :  { %7450 = vmatpush3.xpose.msk.msra.mxu0 %vm159_vm1, %v3879_v38 }
0x1b2f   :  { %7454 = vmatprep.subr.mxu0 %v7920_v1 }
0x1bb5   :  { %v3727_v46 = vpop.xlane.xlu1 %3726 }
0x1bb6   :  { %v3728_v48 = vsub.f32 %v3724_v37, %v3727_v46  ;;  %v3607_v37 = vmul.f32 %v8778_v50, %v3572_v45  ;;  %v3605_v46 = vmul.f32 %v8788_v59, %v3562_v42  ;;  %v3603_v45 = vmul.f32 %v8798_v4, %v3552_v35 }
0x1bb7   :  { %v3601_v42 = vmul.f32 %v8808_v56, %v3542_v26 }
0x1bb8   :  { %v3729_v49 = vmul.f32 1.442695, %v3728_v48 }
0x1bba   :  { %7795 = vpow2.f32 %v3729_v49 }
0x1bc7   :  { %v7796_v24 = vpop.eup %7795 }
0x1bc8   :  { %7418 = vmatmul.mubr.msk.f32.vlgmr.msra.gmra.mxu1 %vm732_vm8, %v7796_v24 }
0x1bc9   :  { %7421 = vmatpush3.msra.mxu1 %v3612_v53  ;;  %7444 = vmatprep.mubr.msk.f32.mxu1 %vm7921_vm0, %v7920_v1 }
0x1bca   :  { %7422 = vmatprep.subr.mxu1 %v7920_v1 }
0x1bcb   :  { %7423 = vmatpush3.msra.mxu1 %v3611_v13 }
0x1bcc   :  { %7424 = vmatprep.subr.mxu1 %v7920_v1 }
0x1bcd   :  { %7425 = vmatpush3.msra.mxu1 %v3610_v11 }
0x1bce   :  { %7426 = vmatprep.subr.mxu1 %v7920_v1 }
0x1bcf   :  { %7427 = vmatpush3.msra.mxu1 %v3609_v15 }
0x1bd0   :  { %7428 = vmatprep.subr.mxu1 %v7920_v1 }
0x1bd1   :  { %7429 = vmatpush3.msra.mxu1 %v3608_v36 }
0x1bd2   :  { %7430 = vmatprep.subr.mxu1 %v7920_v1 }
0x1bd3   :  { %7431 = vmatpush3.msra.mxu1 %v3607_v37 }
0x1bd4   :  { %7432 = vmatprep.subr.mxu1 %v7920_v1 }
0x1bd5   :  { %7433 = vmatpush3.msra.mxu1 %v3606_v19 }
0x1bd6   :  { %7434 = vmatprep.subr.mxu1 %v7920_v1 }
0x1bd7   :  { %7435 = vmatpush3.msra.mxu1 %v3605_v46 }
0x1bd8   :  { %7436 = vmatprep.subr.mxu1 %v7920_v1 }
0x1bd9   :  { %7437 = vmatpush3.msra.mxu1 %v3604_v44  ;;  %v3991_v44 = vld [vmem:[#allocation2 + $0x418] sm:$0xff] }
0x1bda   :  { %7438 = vmatprep.subr.mxu1 %v7920_v1 }
0x1bdb   :  { %7439 = vmatpush3.msra.mxu1 %v3603_v45 }
0x1bdc   :  { %7440 = vmatprep.subr.mxu1 %v7920_v1 }
0x1bdd   :  { %7441 = vmatpush3.msra.mxu1 %v3602_v39 }
0x1bde   :  { %7442 = vmatprep.subr.mxu1 %v7920_v1 }
0x1bdf   :  { %7443 = vmatpush3.msra.mxu1 %v3601_v42 }
0x1be0   :  { %7466 = vmatprep.subr.mxu1 %v7920_v1 }
0x1c88   :  { %v3800_v26 = vpop.f32.mrf.mxu1 }
0x1c89   :  { %7797 = vrcp.f32 %v3800_v26  ;;  %v6281_v26 = vld [vmem:[#allocation2 + $0x458] ss:$0 sm:$0xff] }
0x1c8a   :  { %v7419_v35 = vpop.f32.mrf.mxu1 }
0x1c96   :  { %v7798_v48 = vpop.eup %7797 }
0x1c97   :  { %v3805_v49 = vmul.f32 %v7798_v48, %v7796_v24 }
0x1c99   :  { %7445 = vmatmul.mubr.msk.f32.vlgmr.msra.gmra.mxu1 %vm732_vm8, %v3805_v49  ;;  %v4075_v49 = vld [vmem:[#allocation2 + $0x430] sm:$0xff] }
0x1c9a   :  { %7478 = vmatprep.mubr.msk.f32.mxu1 %vm7921_vm0, %v7920_v1 }
0x1d59   :  { %v3875_v34 = vpop.f32.mrf.mxu1 }
0x1d5a   :  { %7452 = vmatmul.mubr.msk.f32.vlgmr.msra.gmra.mxu0 %vm159_vm1, %v3875_v34  ;;  %v4074_v34 = vld [vmem:[#allocation2 + $0x428] sm:$0xff] }
0x1d5b   :  { %v7446_v62 = vpop.f32.mrf.mxu1  ;;  %7456 = vmatprep.mubr.msk.f32.mxu0 %vm7921_vm0, %v7920_v1  ;;  %7455 = vmatpush3.xpose.msk.msra.mxu0 %vm159_vm1, %v3991_v44 }
0x1d5c   :  { %7459 = vmatprep.subr.mxu0 %v7920_v1  ;;  %v6282_v62 = vld [vmem:[#allocation2 + $0x420] ss:$0 sm:$0xff] }
0x1e1a   :  { %v3961_v8 = vpop.f32.mrf.mxu0 }
0x1e1b   :  { %v3962_v53 = vadd.f32 %v6276_v47, %v3961_v8 }
0x1e1c   :  { %v7453_v13 = vpop.f32.mrf.mxu0 }
0x1e1d   :  { %v3965_v11 = vadd.f32 %v3962_v53, %v8673_v23 }
0x1e1f   :  { %v3968_v24 = vsel %vm159_vm1, %v3965_v11, 0.0 }
0x1e20   :  { %3969 = vadd.xlane.f32.xlu0 %v3968_v24  ;;  %v6285_v24 = vld [vmem:[#allocation2 + $0x438] ss:$0 sm:$0xff] }
0x1ea9   :  { %v3970_v15 = vpop.xlane.xlu0 %3969 }
0x1eaa   :  { %v3971_v36 = vmul.f32 0.0625, %v3970_v15 }
0x1eac   :  { %v3972_v37 = vsub.f32 %v3965_v11, %v3971_v36  ;;  %v8870_v11 = vld [vmem:[#allocation2 + $0x138] sm:$0xff] }
0x1eae   :  { %v3973_v19 = vmul.f32 %v3972_v37, %v3972_v37 }
0x1eb0   :  { %v3974_v46 = vsel %vm159_vm1, %v3973_v19, 0.0 }
0x1eb1   :  { %3975 = vadd.xlane.f32.xlu0 %v3974_v46 }
0x1f3a   :  { %v3976_v45 = vpop.xlane.xlu0 %3975 }
0x1f3b   :  { %v3977_v39 = vmul.f32 0.0625, %v3976_v45 }
0x1f3d   :  { %v3978_v42 = vadd.f32 1e-05, %v3977_v39 }
0x1f3f   :  { %7799 = vrsqrt.f32 %v3978_v42 }
0x1f4c   :  { %v7800_v23 = vpop.eup %7799 }
0x1f4d   :  { %v3980_v38 = vmul.f32 %v7800_v23, %v3972_v37 }
0x1f4f   :  { %v3985_v35 = vmul.f32 %v6280_v40, %v3980_v38  ;;  %v4192_v40 = vld [vmem:[#allocation2 + $0x498] sm:$0xff]  ;;  %v4191_v38 = vld [vmem:[#allocation2 + $0x490] sm:$0xff] }
0x1f50   :  { %7467 = vmatpush3.xpose.msk.msra.mxu1 %vm159_vm1, %v4192_v40  ;;  %v8910_v40 = vld [vmem:[#allocation2 + $0x158] sm:$0xff] }
0x1f51   :  { %v3990_v48 = vadd.f32 %v6281_v26, %v3985_v35  ;;  %7468 = vmatprep.subr.mxu1 %v7920_v1  ;;  %v4190_v26 = vld [vmem:[#allocation2 + $0x488] sm:$0xff]  ;;  %v4189_v35 = vld [vmem:[#allocation2 + $0x480] sm:$0xff] }
0x1f53   :  { %7457 = vmatmul.mubr.msk.f32.vlgmr.msra.gmra.mxu0 %vm159_vm1, %v3990_v48 }
0x1f54   :  { %7460 = vmatpush3.xpose.msk.msra.mxu0 %vm1161_vm10, %v4075_v49  ;;  %7463 = vmatprep.mubr.msk.f32.mxu0 %vm7921_vm0, %v7920_v1  ;;  %v4187_v49 = vld [vmem:[#allocation2 + $0x470] sm:$0xff] }
0x1f55   :  { %7461 = vmatprep.subr.mxu0 %v7920_v1  ;;  %7469 = vmatpush3.xpose.msk.msra.mxu1 %vm159_vm1, %v4191_v38  ;;  %v8914_v38 = vld [vmem:[#allocation2 + $0x160] sm:$0xff] }
0x1f56   :  { %7470 = vmatprep.subr.mxu1 %v7920_v1 }
0x1f58   :  { %7462 = vmatpush3.xpose.msk.msra.mxu0 %vm1161_vm10, %v4074_v34 }
0x1f59   :  { %7471 = vmatpush3.xpose.msk.msra.mxu1 %vm159_vm1, %v4190_v26  ;;  %v8918_v26 = vld [vmem:[#allocation2 + $0x168] sm:$0xff] }
0x1f5a   :  { %7472 = vmatprep.subr.mxu1 %v7920_v1 }
0x1f5d   :  { %7473 = vmatpush3.xpose.msk.msra.mxu1 %vm159_vm1, %v4189_v35  ;;  %v8922_v35 = vld [vmem:[#allocation2 + $0x170] sm:$0xff] }
0x1f5e   :  { %7474 = vmatprep.subr.mxu1 %v7920_v1 }
0x2013   :  { %v4069_v47 = vpop.f32.mrf.mxu0 }
0x2014   :  { %v4070_v8 = vadd.f32 %v6282_v62, %v4069_v47 }
0x2015   :  { %v7458_v53 = vpop.f32.mrf.mxu0 }
0x2016   :  { %v4073_v13 = vmax.f32 %v4070_v8, 0.0  ;;  %v6289_v53 = vld [vmem:[#allocation2 + $0x460] ss:$0 sm:$0xff] }
0x2018   :  { %7464 = vmatmul.mubr.msk.f32.vlgmr.msra.gmra.mxu0 %vm1161_vm10, %v4073_v13 }
0x2019   :  { %7483 = vmatprep.mubr.msk.f32.mxu0 %vm1161_vm10, %v8870_v11 }
0x20d8   :  { %v4156_v15 = vpop.f32.mrf.mxu0 }
0x20d9   :  { %v4157_v36 = vadd.f32 %v6285_v24, %v4156_v15  ;;  %v6290_v24 = vld [vmem:[#allocation2 + $0x468] ss:$0 sm:$0xff] }
0x20da   :  { %v7465_v37 = vpop.f32.mrf.mxu0 }
0x20db   :  { %v4160_v19 = vadd.f32 %v4157_v36, %v3990_v48  ;;  %v4188_v48 = vld [vmem:[#allocation2 + $0x478] sm:$0xff]  ;;  %v6291_v37 = vld [vmem:[#allocation2 + $0x4a0] ss:$0 sm:$0xff] }
0x20dc   :  { %7475 = vmatpush3.xpose.msk.msra.mxu1 %vm159_vm1, %v4188_v48 }
0x20dd   :  { %v4163_v46 = vsel %vm159_vm1, %v4160_v19, 0.0  ;;  %7476 = vmatprep.subr.mxu1 %v7920_v1 }
0x20de   :  { %4164 = vadd.xlane.f32.xlu0 %v4163_v46 }
0x20e0   :  { %7477 = vmatpush3.xpose.msk.msra.mxu1 %vm159_vm1, %v4187_v49 }
0x20e1   :  { %7509 = vmatprep.subr.mxu1 %v7920_v1 }
0x2167   :  { %v4165_v44 = vpop.xlane.xlu0 %4164 }
0x2168   :  { %v4166_v45 = vmul.f32 0.0625, %v4165_v44 }
0x216a   :  { %v4167_v39 = vsub.f32 %v4160_v19, %v4166_v45 }
0x216c   :  { %v4168_v42 = vmul.f32 %v4167_v39, %v4167_v39 }
0x216e   :  { %v4169_v23 = vsel %vm159_vm1, %v4168_v42, 0.0  ;;  %v8902_v42 = vld [vmem:[#allocation2 + $0x148] sm:$0xff] }
0x216f   :  { %4170 = vadd.xlane.f32.xlu1 %v4169_v23  ;;  %v8906_v23 = vld [vmem:[#allocation2 + $0x150] sm:$0xff] }
0x21f8   :  { %v4171_v34 = vpop.xlane.xlu1 %4170 }
0x21f9   :  { %v4172_v62 = vmul.f32 0.0625, %v4171_v34 }
0x21fb   :  { %v4173_v47 = vadd.f32 1e-05, %v4172_v62 }
0x21fd   :  { %7801 = vrsqrt.f32 %v4173_v47 }
0x220a   :  { %v7802_v8 = vpop.eup %7801 }
0x220b   :  { %v4175_v13 = vmul.f32 %v7802_v8, %v4167_v39  ;;  %v8898_v39 = vld [vmem:[#allocation2 + $0x140] sm:$0xff] }
0x220d   :  { %v4180_v15 = vmul.f32 %v6289_v53, %v4175_v13  ;;  %v8928_v13 = vld [vmem:[#allocation2 + $0xd0] sm:$0xff] }
0x220f   :  { %v8888_v36 = vadd.f32 %v6290_v24, %v4180_v15 }
0x2211   :  { %7479 = vmatmul.mubr.msk.f32.vlgmr.msra.gmra.mxu1 %vm159_vm1, %v8888_v36 }
0x2212   :  { %7525 = vmatprep.mubr.msk.f32.mxu1 %vm7921_vm0, %v7920_v1 }
0x22d1   :  { %v4284_v19 = vpop.f32.mrf.mxu1 }
0x22d2   :  { %v8894_v46 = vadd.f32 %v6291_v37, %v4284_v19  ;;  %v8933_v37 = vld [vmem:[#allocation2 + $0xc8] sm:$0xff]  ;;  %v8938_v19 = vld [vmem:[#allocation2 + $0xc0] sm:$0xff] }
0x22d3   :  { %v7480_v44 = vpop.f32.mrf.mxu1 }
0x22d4   :  { %4289 = vrot.lane.b32.xlu0 %v8894_v46, %s7923_s0 }
0x2346   :  { %v4290_v45 = vpop.permute.xlu0 %4289 }
0x2347   :  { %7481 = vmatprep.subr.mxu0 %v4290_v45 }
0x2348   :  { %7482 = vmatpush3.msra.mxu0 %v4290_v45  ;;  %v8943_v45 = vld [vmem:[#allocation2 + $0xb8] sm:$0xff] }
0x2349   :  { %7484 = vmatmul.mubr.msk.f32.vlgmr.msra.gmra.mxu0 %vm1161_vm10, %v8898_v39 }
0x234a   :  { %7486 = vmatprep.mubr.msk.f32.mxu0 %vm1161_vm10, %v8902_v42 }
0x234d   :  { %7487 = vmatmul.mubr.msk.f32.gmra.mxu0 %vm1161_vm10, %v8906_v23 }
0x234e   :  { %7489 = vmatprep.mubr.msk.f32.mxu0 %vm1161_vm10, %v8910_v40 }
0x2351   :  { %7490 = vmatmul.mubr.msk.f32.gmra.mxu0 %vm1161_vm10, %v8914_v38 }
0x2352   :  { %7492 = vmatprep.mubr.msk.f32.mxu0 %vm1161_vm10, %v8918_v26 }
0x2355   :  { %7493 = vmatmul.mubr.msk.f32.gmra.mxu0 %vm1161_vm10, %v8922_v35 }
0x2356   :  { %7497 = vmatprep.mubr.msk.f32.mxu0 %vm1161_vm10, %v8870_v11 }
0x2409   :  { %v7485_v48 = vpop.f32.mrf.mxu0 }
0x240b   :  { %v4358_v49 = vpop.f32.mrf.mxu0 }
0x240d   :  { %v7488_v34 = vpop.f32.mrf.mxu0 }
0x240f   :  { %v4368_v62 = vpop.f32.mrf.mxu0 }
0x2411   :  { %v7491_v47 = vpop.f32.mrf.mxu0 }
0x2412   :  { %v4402_v44 = vmul.f32 %v8938_v19, %v7491_v47  ;;  %v8953_v47 = vld [vmem:[#allocation2 + $0xa8] sm:$0xff] }
0x2413   :  { %v4378_v8 = vpop.f32.mrf.mxu0 }
0x2415   :  { %v7494_v53 = vpop.f32.mrf.mxu0 }
0x2416   :  { %v4404_v24 = vmul.f32 %v8928_v13, %v7494_v53  ;;  %v4401_v53 = vmul.f32 %v8943_v45, %v4378_v8  ;;  %v8958_v8 = vld [vmem:[#allocation2 + $0xa0] sm:$0xff] }
0x2417   :  { %v4388_v15 = vpop.f32.mrf.mxu0 }
0x2418   :  { %7510 = vmatpush3.xpose.msk.msra.mxu1 %vm159_vm1, %v4404_v24  ;;  %v4403_v11 = vmul.f32 %v8933_v37, %v4388_v15  ;;  %v8948_v24 = vld [vmem:[#allocation2 + $0xb0] sm:$0xff] }
0x2419   :  { %7511 = vmatprep.subr.mxu1 %v7920_v1  ;;  %v4400_v15 = vmul.f32 %v8948_v24, %v7488_v34  ;;  %v8963_v34 = vld [vmem:[#allocation2 + $0x98] sm:$0xff] }
0x241c   :  { %7512 = vmatpush3.xpose.msk.msra.mxu1 %vm159_vm1, %v4403_v11  ;;  %v4399_v11 = vmul.f32 %v8953_v47, %v4368_v62 }
0x241d   :  { %7513 = vmatprep.subr.mxu1 %v7920_v1 }
0x2420   :  { %7514 = vmatpush3.xpose.msk.msra.mxu1 %vm159_vm1, %v4402_v44  ;;  %v4398_v44 = vmul.f32 %v8958_v8, %v7485_v48 }
0x2421   :  { %7515 = vmatprep.subr.mxu1 %v7920_v1 }
0x2424   :  { %7516 = vmatpush3.xpose.msk.msra.mxu1 %vm159_vm1, %v4401_v53  ;;  %v4397_v53 = vmul.f32 %v8963_v34, %v4358_v49 }
0x2425   :  { %7517 = vmatprep.subr.mxu1 %v7920_v1 }
0x2428   :  { %7518 = vmatpush3.xpose.msk.msra.mxu1 %vm159_vm1, %v4400_v15 }
0x2429   :  { %7519 = vmatprep.subr.mxu1 %v7920_v1 }
0x242c   :  { %7520 = vmatpush3.xpose.msk.msra.mxu1 %vm159_vm1, %v4399_v11  ;;  %v7871_v11 = vld [vmem:[#allocation2 + $0x228] sm:$0xff] }
0x242d   :  { %7521 = vmatprep.subr.mxu1 %v7920_v1 }
0x2430   :  { %7522 = vmatpush3.xpose.msk.msra.mxu1 %vm159_vm1, %v4398_v44 }
0x2431   :  { %7523 = vmatprep.subr.mxu1 %v7920_v1 }
0x2434   :  { %7524 = vmatpush3.xpose.msk.msra.mxu1 %vm159_vm1, %v4397_v53 }
0x2435   :  { %7566 = vmatprep.subr.mxu1 %v7920_v1 }
0x2437   :  { %7526 = vmatmul.mubr.msk.f32.vlgmr.msra.gmra.mxu1 %vm159_vm1, %v8894_v46 }
0x2438   :  { %7570 = vmatprep.mubr.msk.f32.mxu1 %vm7921_vm0, %v7920_v1 }
0x24f7   :  { %v4613_v62 = vpop.f32.mrf.mxu1 }
0x24f8   :  { %v4617_v48 = vmul.f32 0.70710677, %v4613_v62  ;;  %v7872_v62 = vld [vmem:[#allocation2 + $0x210] sm:$0xff] }
0x24f9   :  { %v7527_v15 = vpop.f32.mrf.mxu1 }
0x24fa   :  { %v4618_v44 = vadd.f32 %v7871_v11, %v4617_v48 }
0x24fc   :  { %v4619_v17 = vsel %vm2866_vm11, %v4618_v44, -inf }
0x24fd   :  { %4620 = vmax.xlane.f32.xlu1 %v4619_v17  ;;  %v7873_v17 = vld [vmem:[#allocation2 + $0x208] sm:$0xff] }
0x250e   :  { %4405 = vrot.lane.b32.xlu1 %v8894_v46, %s7924_s21  ;;  %v7875_v46 = vld [vmem:[#allocation2 + $0x1f8] sm:$0xff] }
0x2586   :  { %v4621_v49 = vpop.xlane.xlu1 %4620 }
0x2587   :  { %v4622_v53 = vsub.f32 %v4618_v44, %v4621_v49 }
0x2589   :  { %v4623_v25 = vmul.f32 1.442695, %v4622_v53 }
0x258a   :  { %v4406_v56 = vpop.permute.xlu1 %4405 }
0x258b   :  { %7495 = vmatprep.subr.mxu0 %v4406_v56  ;;  %7803 = vpow2.f32 %v4623_v25  ;;  %v7876_v25 = vld [vmem:[#allocation2 + $0x1f0] sm:$0xff] }
0x258c   :  { %7496 = vmatpush3.msra.mxu0 %v4406_v56  ;;  %v7874_v56 = vld [vmem:[#allocation2 + $0x200] sm:$0xff] }
0x258d   :  { %7498 = vmatmul.mubr.msk.f32.vlgmr.msra.gmra.mxu0 %vm1161_vm10, %v8898_v39  ;;  %7528 = vmatprep.subr.mxu0 %v7920_v1  ;;  %v7877_v39 = vld [vmem:[#allocation2 + $0x1e8] sm:$0xff] }
0x258e   :  { %7529 = vmatpush3.msra.mxu0 %v7872_v62  ;;  %7500 = vmatprep.mubr.msk.f32.mxu0 %vm1161_vm10, %v8902_v42  ;;  %v7878_v42 = vld [vmem:[#allocation2 + $0x1e0] sm:$0xff] }
0x258f   :  { %7530 = vmatprep.subr.mxu0 %v7920_v1 }
0x2590   :  { %7531 = vmatpush3.msra.mxu0 %v7873_v17 }
0x2591   :  { %7501 = vmatmul.mubr.msk.f32.gmra.mxu0 %vm1161_vm10, %v8906_v23  ;;  %7532 = vmatprep.subr.mxu0 %v7920_v1 }
0x2592   :  { %7533 = vmatpush3.msra.mxu0 %v7874_v56  ;;  %7503 = vmatprep.mubr.msk.f32.mxu0 %vm1161_vm10, %v8910_v40  ;;  %v7879_v40 = vld [vmem:[#allocation2 + $0x1d8] sm:$0xff] }
0x2593   :  { %7534 = vmatprep.subr.mxu0 %v7920_v1 }
0x2594   :  { %7535 = vmatpush3.msra.mxu0 %v7875_v46 }
0x2595   :  { %7504 = vmatmul.mubr.msk.f32.gmra.mxu0 %vm1161_vm10, %v8914_v38  ;;  %7536 = vmatprep.subr.mxu0 %v7920_v1  ;;  %v4774_v38 = vld [vmem:[#allocation2 + $0x4b0] sm:$0xff] }
0x2596   :  { %7537 = vmatpush3.msra.mxu0 %v7876_v25  ;;  %7506 = vmatprep.mubr.msk.f32.mxu0 %vm1161_vm10, %v8918_v26  ;;  %v4773_v26 = vld [vmem:[#allocation2 + $0x4a8] sm:$0xff] }
0x2597   :  { %7538 = vmatprep.subr.mxu0 %v7920_v1  ;;  %7567 = vmatpush3.xpose.msk.msra.mxu1 %vm159_vm1, %v4774_v38  ;;  %v4973_v38 = vld [vmem:[#allocation2 + $0x4e0] sm:$0xff] }
0x2598   :  { %7539 = vmatpush3.msra.mxu0 %v7877_v39  ;;  %v7804_v23 = vpop.eup %7803  ;;  %7568 = vmatprep.subr.mxu1 %v7920_v1 }
0x2599   :  { %7507 = vmatmul.mubr.msk.f32.gmra.mxu0 %vm1161_vm10, %v8922_v35  ;;  %7540 = vmatprep.subr.mxu0 %v7920_v1 }
0x259a   :  { %7541 = vmatpush3.msra.mxu0 %v7878_v42  ;;  %7544 = vmatprep.mubr.msk.f32.mxu0 %vm7921_vm0, %v7920_v1 }
0x259b   :  { %7542 = vmatprep.subr.mxu0 %v7920_v1  ;;  %7569 = vmatpush3.xpose.msk.msra.mxu1 %vm159_vm1, %v4773_v26  ;;  %v4971_v26 = vld [vmem:[#allocation2 + $0x4d0] sm:$0xff] }
0x259c   :  { %7543 = vmatpush3.msra.mxu0 %v7879_v40 }
0x259d   :  { %7545 = vmatmul.mubr.msk.f32.vlgmr.msra.gmra.mxu0 %vm2866_vm11, %v7804_v23  ;;  %7547 = vmatprep.subr.mxu0 %v7920_v1 }
0x259e   :  { %7563 = vmatprep.mubr.msk.f32.mxu0 %vm7921_vm0, %v7920_v1 }
0x264d   :  { %v7499_v35 = vpop.f32.mrf.mxu0 }
0x264f   :  { %v4474_v48 = vpop.f32.mrf.mxu0 }
0x2651   :  { %v7502_v15 = vpop.f32.mrf.mxu0 }
0x2653   :  { %v4484_v11 = vpop.f32.mrf.mxu0 }
0x2655   :  { %v7505_v44 = vpop.f32.mrf.mxu0 }
0x2656   :  { %v4518_v25 = vmul.f32 %v8938_v19, %v7505_v44  ;;  %v4514_v19 = vmul.f32 %v8958_v8, %v7499_v35 }
0x2657   :  { %v4494_v49 = vpop.f32.mrf.mxu0 }
0x2658   :  { %v4517_v42 = vmul.f32 %v8943_v45, %v4494_v49  ;;  %v4513_v45 = vmul.f32 %v8963_v34, %v4474_v48 }
0x2659   :  { %v7508_v53 = vpop.f32.mrf.mxu0 }
0x265a   :  { %v4520_v62 = vmul.f32 %v8928_v13, %v7508_v53  ;;  %v4516_v13 = vmul.f32 %v8948_v24, %v7502_v15 }
0x265b   :  { %v4504_v17 = vpop.f32.mrf.mxu0 }
0x265c   :  { %v4519_v56 = vmul.f32 %v8933_v37, %v4504_v17  ;;  %7548 = vmatpush3.msra.mxu0 %v4520_v62  ;;  %v4515_v37 = vmul.f32 %v8953_v47, %v4484_v11  ;;  %v4974_v47 = vld [vmem:[#allocation2 + $0x4e8] sm:$0xff] }
0x265d   :  { %v4694_v46 = vpop.f32.mrf.mxu0  ;;  %7549 = vmatprep.subr.mxu0 %v7920_v1  ;;  %7580 = vmatprep.subr.msk.mxu1 %vm159_vm1, %v4974_v47 }
0x265e   :  { %7805 = vrcp.f32 %v4694_v46  ;;  %7550 = vmatpush3.msra.mxu0 %v4519_v56  ;;  %v4886_v46 = vld [vmem:[#allocation2 + $0x4c0] sm:$0xff] }
0x265f   :  { %v7546_v39 = vpop.f32.mrf.mxu0  ;;  %7551 = vmatprep.subr.mxu0 %v7920_v1 }
0x2660   :  { %7552 = vmatpush3.msra.mxu0 %v4518_v25  ;;  %v9046_v25 = vld [vmem:[#allocation2 + $0x4f0] ss:$0 sm:$0xff] }
0x2661   :  { %7553 = vmatprep.subr.mxu0 %v7920_v1 }
0x2662   :  { %7554 = vmatpush3.msra.mxu0 %v4517_v42 }
0x2663   :  { %7555 = vmatprep.subr.mxu0 %v7920_v1 }
0x2664   :  { %7556 = vmatpush3.msra.mxu0 %v4516_v13 }
0x2665   :  { %7557 = vmatprep.subr.mxu0 %v7920_v1 }
0x2666   :  { %7558 = vmatpush3.msra.mxu0 %v4515_v37 }
0x2667   :  { %7559 = vmatprep.subr.mxu0 %v7920_v1 }
0x2668   :  { %7560 = vmatpush3.msra.mxu0 %v4514_v19 }
0x2669   :  { %7561 = vmatprep.subr.mxu0 %v7920_v1 }
0x266a   :  { %7562 = vmatpush3.msra.mxu0 %v4513_v45 }
0x266b   :  { %v7806_v24 = vpop.eup %7805  ;;  %7573 = vmatprep.subr.mxu0 %v7920_v1 }
0x266c   :  { %v4699_v40 = vmul.f32 %v7806_v24, %v7804_v23  ;;  %v4972_v23 = vld [vmem:[#allocation2 + $0x4d8] sm:$0xff] }
0x266e   :  { %7564 = vmatmul.mubr.msk.f32.vlgmr.msra.gmra.mxu0 %vm2866_vm11, %v4699_v40 }
0x266f   :  { %7577 = vmatprep.mubr.msk.f32.mxu0 %vm7921_vm0, %v7920_v1 }
0x272e   :  { %v4769_v8 = vpop.f32.mrf.mxu0 }
0x272f   :  { %7571 = vmatmul.mubr.msk.f32.vlgmr.msra.gmra.mxu1 %vm159_vm1, %v4769_v8 }
0x2730   :  { %7581 = vmatpush3.xpose.msk.msra.mxu1 %vm159_vm1, %v4974_v47  ;;  %v7565_v34 = vpop.f32.mrf.mxu0  ;;  %7588 = vmatprep.mubr.msk.f32.mxu1 %vm159_vm1, %v8586_v27  ;;  %v6326_v27 = vld [vmem:[#allocation2 + $0x4b8] ss:$0 sm:$0xff] }
0x2731   :  { %7582 = vmatprep.subr.msk.mxu1 %vm159_vm1, %v4973_v38  ;;  %v6330_v47 = vld [vmem:[#allocation2 + $0x538] ss:$0 sm:$0xff] }
0x2734   :  { %7583 = vmatpush3.xpose.msk.msra.mxu1 %vm159_vm1, %v4973_v38  ;;  %v6331_v38 = vld [vmem:[#allocation2 + $0x540] ss:$0 sm:$0xff] }
0x2735   :  { %7584 = vmatprep.subr.msk.mxu1 %vm159_vm1, %v4972_v23 }
0x2738   :  { %7585 = vmatpush3.xpose.msk.msra.mxu1 %vm159_vm1, %v4972_v23 }
0x2739   :  { %7586 = vmatprep.subr.msk.mxu1 %vm159_vm1, %v4971_v26 }
0x273c   :  { %7587 = vmatpush3.xpose.msk.msra.mxu1 %vm159_vm1, %v4971_v26 }
0x273f   :  { %7589 = vmatmul.mubr.msk.f32.vlgmr.msra.gmra.mxu1 %vm159_vm1, %v8598_v57  ;;  %v4887_v57 = vld [vmem:[#allocation2 + $0x4c8] sm:$0xff] }
0x2740   :  { %7617 = vmatprep.mubr.msk.f32.mxu1 %vm290_vm5, %v8602_v60  ;;  %7574 = vmatpush3.xpose.msk.msra.mxu0 %vm159_vm1, %v4887_v57 }
0x2741   :  { %7575 = vmatprep.subr.mxu0 %v7920_v1 }
0x2744   :  { %7576 = vmatpush3.xpose.msk.msra.mxu0 %vm159_vm1, %v4886_v46 }
0x27ef   :  { %v4855_v35 = vpop.f32.mrf.mxu1 }
0x27f0   :  { %v4856_v48 = vadd.f32 %v6326_v27, %v4855_v35 }
0x27f1   :  { %v7572_v15 = vpop.f32.mrf.mxu1 }
0x27f2   :  { %v4859_v11 = vadd.f32 %v4856_v48, %v8888_v36 }
0x27f4   :  { %v4862_v44 = vsel %vm159_vm1, %v4859_v11, 0.0 }
0x27f5   :  { %4863 = vadd.xlane.f32.xlu1 %v4862_v44 }
0x27ff   :  { %v7590_v13 = vpop.f32.mrf.mxu1 }
0x2801   :  { %v5057_v45 = vpop.f32.mrf.mxu1 }
0x287e   :  { %v4864_v49 = vpop.xlane.xlu1 %4863 }
0x287f   :  { %v4865_v53 = vmul.f32 0.0625, %v4864_v49 }
0x2881   :  { %v4866_v62 = vsub.f32 %v4859_v11, %v4865_v53 }
0x2883   :  { %v4867_v17 = vmul.f32 %v4866_v62, %v4866_v62 }
0x2885   :  { %v4868_v56 = vsel %vm159_vm1, %v4867_v17, 0.0 }
0x2886   :  { %4869 = vadd.xlane.f32.xlu0 %v4868_v56 }
0x289c   :  { %4976 = vrot.lane.b32.xlu0 %v9046_v25, %s7923_s0 }
0x290f   :  { %v4870_v36 = vpop.xlane.xlu0 %4869 }
0x2910   :  { %v4871_v39 = vmul.f32 0.0625, %v4870_v36 }
0x2912   :  { %v4872_v42 = vadd.f32 1e-05, %v4871_v39 }
0x2913   :  { %v4977_v37 = vpop.permute.xlu0 %4976 }
0x2914   :  { %7807 = vrsqrt.f32 %v4872_v42  ;;  %v5063_v19 = vadd.f32 %v7590_v13, %v4977_v37  ;;  %v5058_v24 = vadd.f32 %v5057_v45, %v4977_v37  ;;  %v7880_v13 = vld [vmem:[#allocation2 + $0x90] sm:$0xff]  ;;  %v7881_v45 = vld [vmem:[#allocation2 + $0x88] sm:$0xff] }
0x2916   :  { %5209 = vrot.lane.b32.xlu1 %v5063_v19, %s7923_s0  ;;  %7591 = vmatprep.subr.msk.mxu0 %vm327_vm6, %v5063_v19 }
0x291a   :  { %5207 = vrot.lane.b32.xlu1 %v5058_v24, %s7923_s0 }
0x2921   :  { %v7808_v40 = vpop.eup %7807 }
0x2922   :  { %v4874_v8 = vmul.f32 %v7808_v40, %v4866_v62  ;;  %v7882_v40 = vld [vmem:[#allocation2 + $0x80] sm:$0xff] }
0x2924   :  { %v4879_v34 = vmul.f32 %v6330_v47, %v4874_v8  ;;  %v7883_v8 = vld [vmem:[#allocation2 + $0x78] sm:$0xff] }
0x2926   :  { %v9053_v23 = vadd.f32 %v6331_v38, %v4879_v34  ;;  %v7884_v34 = vld [vmem:[#allocation2 + $0x70] sm:$0xff] }
0x2928   :  { %7578 = vmatmul.mubr.msk.f32.vlgmr.msra.gmra.mxu0 %vm159_vm1, %v9053_v23 }
0x2929   :  { %7592 = vmatpush3.msk.msra.mxu0 %vm327_vm6, %v5063_v19  ;;  %7595 = vmatprep.mubr.msk.f32.mxu0 %vm290_vm5, %v8602_v60 }
0x292a   :  { %7593 = vmatprep.subr.mxu0 %v5058_v24 }
0x292b   :  { %7594 = vmatpush3.msra.mxu0 %v5058_v24 }
0x292c   :  { %7596 = vmatmul.mubr.msk.f32.vlgmr.msra.gmra.mxu0 %vm290_vm5, %v8625_v0  ;;  %7635 = vmatprep.subr.mxu0 %v7920_v1 }
0x292d   :  { %7598 = vmatprep.mubr.msk.f32.mxu0 %vm290_vm5, %v8630_v52 }
0x2930   :  { %7599 = vmatmul.mubr.msk.f32.gmra.mxu0 %vm290_vm5, %v8641_v3 }
0x2931   :  { %7601 = vmatprep.mubr.msk.f32.mxu0 %vm290_vm5, %v8646_v5 }
0x2934   :  { %7602 = vmatmul.mubr.msk.f32.gmra.mxu0 %vm290_vm5, %v8657_v6 }
0x2935   :  { %7604 = vmatprep.mubr.msk.f32.mxu0 %vm290_vm5, %v8662_v41 }
0x2938   :  { %7605 = vmatmul.mubr.msk.f32.gmra.mxu0 %vm290_vm5, %v8675_v14 }
0x2939   :  { %7607 = vmatprep.mubr.msk.f32.mxu0 %vm290_vm5, %v8680_v16 }
0x293c   :  { %7608 = vmatmul.mubr.msk.f32.gmra.mxu0 %vm290_vm5, %v8694_v20 }
0x293d   :  { %7610 = vmatprep.mubr.msk.f32.mxu0 %vm290_vm5, %v8698_v63 }
0x2940   :  { %7611 = vmatmul.mubr.msk.f32.gmra.mxu0 %vm290_vm5, %v8710_v33 }
0x2941   :  { %7659 = vmatprep.mubr.msk.f32.mxu0 %vm7921_vm0, %v7920_v1 }
0x2988   :  { %v5210_v60 = vpop.permute.xlu1 %5209 }
0x2989   :  { %7613 = vmatprep.subr.msk.mxu1 %vm327_vm6, %v5210_v60 }
0x298a   :  { %7614 = vmatpush3.msk.msra.mxu1 %vm327_vm6, %v5210_v60 }
0x298c   :  { %v5208_v26 = vpop.permute.xlu1 %5207 }
0x298d   :  { %7615 = vmatprep.subr.mxu1 %v5208_v26 }
0x298e   :  { %7616 = vmatpush3.msra.mxu1 %v5208_v26  ;;  %v7885_v26 = vld [vmem:[#allocation2 + $0x68] sm:$0xff] }
0x298f   :  { %7618 = vmatmul.mubr.msk.f32.vlgmr.msra.gmra.mxu1 %vm290_vm5, %v8625_v0  ;;  %7662 = vmatprep.subr.mxu1 %v7920_v1 }
0x2990   :  { %7620 = vmatprep.mubr.msk.f32.mxu1 %vm290_vm5, %v8630_v52  ;;  %7663 = vmatpush3.msra.mxu1 %v8634_v58 }
0x2991   :  { %7664 = vmatprep.subr.mxu1 %v7920_v1 }
0x2992   :  { %7665 = vmatpush3.msra.mxu1 %v8638_v2 }
0x2993   :  { %7621 = vmatmul.mubr.msk.f32.gmra.mxu1 %vm290_vm5, %v8641_v3  ;;  %7666 = vmatprep.subr.mxu1 %v7920_v1 }
0x2994   :  { %7623 = vmatprep.mubr.msk.f32.mxu1 %vm290_vm5, %v8646_v5  ;;  %7667 = vmatpush3.msra.mxu1 %v8650_v7 }
0x2995   :  { %7668 = vmatprep.subr.mxu1 %v7920_v1 }
0x2996   :  { %7669 = vmatpush3.msra.mxu1 %v8654_v61 }
0x2997   :  { %7624 = vmatmul.mubr.msk.f32.gmra.mxu1 %vm290_vm5, %v8657_v6  ;;  %7670 = vmatprep.subr.mxu1 %v7920_v1 }
0x2998   :  { %7626 = vmatprep.mubr.msk.f32.mxu1 %vm290_vm5, %v8662_v41  ;;  %7671 = vmatpush3.msra.mxu1 %v8666_v10 }
0x2999   :  { %7672 = vmatprep.subr.mxu1 %v7920_v1 }
0x299a   :  { %7673 = vmatpush3.msra.mxu1 %v8670_v12 }
0x299b   :  { %7627 = vmatmul.mubr.msk.f32.gmra.mxu1 %vm290_vm5, %v8675_v14  ;;  %7674 = vmatprep.subr.mxu1 %v7920_v1 }
0x299c   :  { %7629 = vmatprep.mubr.msk.f32.mxu1 %vm290_vm5, %v8680_v16  ;;  %7675 = vmatpush3.msra.mxu1 %v8684_v18 }
0x299d   :  { %7676 = vmatprep.subr.mxu1 %v7920_v1 }
0x299e   :  { %7677 = vmatpush3.msra.mxu1 %v8707_v22 }
0x299f   :  { %7630 = vmatmul.mubr.msk.f32.gmra.mxu1 %vm290_vm5, %v8694_v20  ;;  %7678 = vmatprep.subr.mxu1 %v7920_v1 }
0x29a0   :  { %7632 = vmatprep.mubr.msk.f32.mxu1 %vm290_vm5, %v8698_v63  ;;  %7679 = vmatpush3.msra.mxu1 %v8715_v51 }
0x29a1   :  { %7680 = vmatprep.subr.mxu1 %v7920_v1 }
0x29a2   :  { %7681 = vmatpush3.msra.mxu1 %v8725_v21 }
0x29a3   :  { %7633 = vmatmul.mubr.msk.f32.gmra.mxu1 %vm290_vm5, %v8710_v33  ;;  %7682 = vmatprep.subr.mxu1 %v7920_v1 }
0x29a4   :  { %7683 = vmatpush3.msra.mxu1 %v8729_v29  ;;  %7686 = vmatprep.mubr.msk.f32.mxu1 %vm7921_vm0, %v7920_v1 }
0x29a5   :  { %7684 = vmatprep.subr.mxu1 %v7920_v1 }
0x29a6   :  { %7685 = vmatpush3.msra.mxu1 %v8737_v28 }
0x29a7   :  { %7689 = vmatprep.subr.mxu1 %v7920_v1 }
0x29e8   :  { %v4967_v0 = vpop.f32.mrf.mxu0 }
0x29ea   :  { %v7579_v52 = vpop.f32.mrf.mxu0 }
0x29eb   :  { %v7886_v52 = vld [vmem:[#allocation2 + $0x60] sm:$0xff] }
0x29ec   :  { %v7597_v58 = vpop.f32.mrf.mxu0 }
0x29ee   :  { %v5135_v2 = vpop.f32.mrf.mxu0 }
0x29f0   :  { %v7600_v3 = vpop.f32.mrf.mxu0 }
0x29f1   :  { %v5197_v28 = vmul.f32 %v8793_v9, %v7600_v3 }
0x29f2   :  { %v5145_v5 = vpop.f32.mrf.mxu0 }
0x29f4   :  { %v7603_v7 = vpop.f32.mrf.mxu0 }
0x29f5   :  { %v5199_v21 = vmul.f32 %v8783_v55, %v7603_v7 }
0x29f6   :  { %v5155_v61 = vpop.f32.mrf.mxu0 }
0x29f7   :  { %v5198_v29 = vmul.f32 %v8788_v59, %v5155_v61  ;;  %v7889_v61 = vld [vmem:[#allocation2 + $0x48] sm:$0xff] }
0x29f8   :  { %v7606_v6 = vpop.f32.mrf.mxu0 }
0x29f9   :  { %v5201_v33 = vmul.f32 %v8773_v32, %v7606_v6 }
0x29fa   :  { %v5165_v41 = vpop.f32.mrf.mxu0 }
0x29fb   :  { %v5200_v51 = vmul.f32 %v8778_v50, %v5165_v41  ;;  %v4968_v50 = vadd.f32 %v9046_v25, %v4967_v0  ;;  %v7890_v41 = vld [vmem:[#allocation2 + $0x40] sm:$0xff] }
0x29fc   :  { %v7609_v10 = vpop.f32.mrf.mxu0 }
0x29fd   :  { %v5203_v63 = vmul.f32 %v8763_v54, %v7609_v10 }
0x29fe   :  { %v5175_v12 = vpop.f32.mrf.mxu0 }
0x29ff   :  { %v5202_v22 = vmul.f32 %v8768_v30, %v5175_v12  ;;  %v9234_v30 = vld [vmem:[#allocation6_spill] sm:$0xff]  ;;  %v7891_v12 = vld [vmem:[#allocation2 + $0x38] sm:$0xff] }
0x2a00   :  { %v7612_v14 = vpop.f32.mrf.mxu0  ;;  %v5194_v32 = vmul.f32 %v9234_v30, %v5135_v2  ;;  %v7887_v2 = vld [vmem:[#allocation2 + $0x58] sm:$0xff] }
0x2a01   :  { %v5205_v16 = vmul.f32 %v8753_v31, %v7612_v14  ;;  %v5196_v31 = vmul.f32 %v8798_v4, %v5145_v5  ;;  %v9235_v4 = vld [vmem:[#allocation7_spill] sm:$0xff]  ;;  %v7888_v5 = vld [vmem:[#allocation2 + $0x50] sm:$0xff] }
0x2a02   :  { %v5185_v18 = vpop.f32.mrf.mxu0 }
0x2a03   :  { %7636 = vmatpush3.xpose.msk.msra.mxu0 %vm159_vm1, %v5205_v16  ;;  %v5204_v20 = vmul.f32 %v8758_v43, %v5185_v18  ;;  %v9233_v43 = vld [vmem:[#allocation5_spill] sm:$0xff]  ;;  %v5617_v16 = vld [vmem:[#allocation2 + $0x500] sm:$0xff] }
0x2a04   :  { %7637 = vmatprep.subr.mxu0 %v7920_v1  ;;  %v5195_v54 = vmul.f32 %v9233_v43, %v7597_v58  ;;  %v5616_v18 = vld [vmem:[#allocation2 + $0x4f8] sm:$0xff] }
0x2a07   :  { %7638 = vmatpush3.xpose.msk.msra.mxu0 %vm159_vm1, %v5204_v20 }
0x2a08   :  { %7639 = vmatprep.subr.mxu0 %v7920_v1 }
0x2a0b   :  { %7640 = vmatpush3.xpose.msk.msra.mxu0 %vm159_vm1, %v5203_v63 }
0x2a0c   :  { %7641 = vmatprep.subr.mxu0 %v7920_v1 }
0x2a0f   :  { %7642 = vmatpush3.xpose.msk.msra.mxu0 %vm159_vm1, %v5202_v22 }
0x2a10   :  { %7643 = vmatprep.subr.mxu0 %v7920_v1 }
0x2a13   :  { %7644 = vmatpush3.xpose.msk.msra.mxu0 %vm159_vm1, %v5201_v33 }
0x2a14   :  { %7645 = vmatprep.subr.mxu0 %v7920_v1 }
0x2a17   :  { %7646 = vmatpush3.xpose.msk.msra.mxu0 %vm159_vm1, %v5200_v51  ;;  %v7892_v51 = vld [vmem:[#allocation2 + $0x8] sm:$0xff] }
0x2a18   :  { %7647 = vmatprep.subr.mxu0 %v7920_v1 }
0x2a1b   :  { %7648 = vmatpush3.xpose.msk.msra.mxu0 %vm159_vm1, %v5199_v21  ;;  %v7893_v21 = vld [vmem:[#allocation2] sm:$0xff] }
0x2a1c   :  { %7649 = vmatprep.subr.mxu0 %v7920_v1 }
0x2a1f   :  { %7650 = vmatpush3.xpose.msk.msra.mxu0 %vm159_vm1, %v5198_v29 }
0x2a20   :  { %7651 = vmatprep.subr.mxu0 %v7920_v1 }
0x2a23   :  { %7652 = vmatpush3.xpose.msk.msra.mxu0 %vm159_vm1, %v5197_v28 }
0x2a24   :  { %7653 = vmatprep.subr.mxu0 %v7920_v1 }
0x2a27   :  { %7654 = vmatpush3.xpose.msk.msra.mxu0 %vm159_vm1, %v5196_v31  ;;  %v6383_v31 = vld [vmem:[#allocation2 + $0x508] ss:$0 sm:$0xff] }
0x2a28   :  { %7655 = vmatprep.subr.mxu0 %v7920_v1 }
0x2a2b   :  { %7656 = vmatpush3.xpose.msk.msra.mxu0 %vm159_vm1, %v5195_v54 }
0x2a2c   :  { %7657 = vmatprep.subr.mxu0 %v7920_v1 }
0x2a2f   :  { %7658 = vmatpush3.xpose.msk.msra.mxu0 %vm159_vm1, %v5194_v32 }
0x2a30   :  { %7716 = vmatprep.subr.mxu0 %v7920_v1 }
0x2a32   :  { %7660 = vmatmul.mubr.msk.f32.vlgmr.msra.gmra.mxu0 %vm159_vm1, %v4968_v50 }
0x2a33   :  { %7720 = vmatprep.mubr.msk.f32.mxu0 %vm7921_vm0, %v7920_v1  ;;  %7717 = vmatpush3.xpose.msk.msra.mxu0 %vm159_vm1, %v5617_v16 }
0x2a34   :  { %7718 = vmatprep.subr.mxu0 %v7920_v1 }
0x2a37   :  { %7719 = vmatpush3.xpose.msk.msra.mxu0 %vm159_vm1, %v5616_v18 }
0x2a38   :  { %7723 = vmatprep.subr.mxu0 %v7920_v1 }
0x2a4f   :  { %v7619_v48 = vpop.f32.mrf.mxu1 }
0x2a50   :  { %v5340_v10 = vmul.f32 %v7890_v41, %v7619_v48 }
0x2a51   :  { %v5280_v15 = vpop.f32.mrf.mxu1 }
0x2a52   :  { %v5339_v14 = vmul.f32 %v7891_v12, %v5280_v15 }
0x2a53   :  { %v7622_v11 = vpop.f32.mrf.mxu1 }
0x2a54   :  { %v5342_v7 = vmul.f32 %v7888_v5, %v7622_v11 }
0x2a55   :  { %v5290_v44 = vpop.f32.mrf.mxu1 }
0x2a56   :  { %v5341_v6 = vmul.f32 %v7889_v61, %v5290_v44  ;;  %v6387_v44 = vld [vmem:[#allocation2 + $0x548] ss:$0 sm:$0xff] }
0x2a57   :  { %v7625_v49 = vpop.f32.mrf.mxu1 }
0x2a58   :  { %v5344_v58 = vmul.f32 %v7886_v52, %v7625_v49 }
0x2a59   :  { %v5300_v53 = vpop.f32.mrf.mxu1 }
0x2a5a   :  { %v5343_v3 = vmul.f32 %v7887_v2, %v5300_v53  ;;  %v6388_v53 = vld [vmem:[#allocation2 + $0x550] ss:$0 sm:$0xff] }
0x2a5b   :  { %v7628_v62 = vpop.f32.mrf.mxu1 }
0x2a5c   :  { %v5346_v60 = vmul.f32 %v7884_v34, %v7628_v62 }
0x2a5d   :  { %v5310_v17 = vpop.f32.mrf.mxu1 }
0x2a5e   :  { %v5345_v0 = vmul.f32 %v7885_v26, %v5310_v17 }
0x2a5f   :  { %v7631_v25 = vpop.f32.mrf.mxu1 }
0x2a60   :  { %v5348_v47 = vmul.f32 %v7882_v40, %v7631_v25 }
0x2a61   :  { %v5320_v36 = vpop.f32.mrf.mxu1 }
0x2a62   :  { %v5347_v38 = vmul.f32 %v7883_v8, %v5320_v36 }
0x2a63   :  { %v7634_v39 = vpop.f32.mrf.mxu1 }
0x2a64   :  { %v5350_v37 = vmul.f32 %v7880_v13, %v7634_v39  ;;  %v6392_v13 = vld [vmem:[#allocation2 + $0x530] ss:$0 sm:$0xff] }
0x2a65   :  { %v5330_v42 = vpop.f32.mrf.mxu1 }
0x2a66   :  { %v5349_v24 = vmul.f32 %v7881_v45, %v5330_v42 }
0x2af2   :  { %v5456_v55 = vpop.f32.mrf.mxu0 }
0x2af3   :  { %v5460_v59 = vmul.f32 0.70710677, %v5456_v55 }
0x2af4   :  { %v7661_v9 = vpop.f32.mrf.mxu0 }
0x2af5   :  { %v5461_v27 = vadd.f32 %v5460_v59, %v9235_v4 }
0x2af7   :  { %v5462_v35 = vsel %vm732_vm8, %v5461_v27, -inf }
0x2af8   :  { %5463 = vmax.xlane.f32.xlu0 %v5462_v35  ;;  %v5728_v35 = vld [vmem:[#allocation2 + $0x510] sm:$0xff] }
0x2b81   :  { %v5464_v56 = vpop.xlane.xlu0 %5463 }
0x2b82   :  { %v5465_v57 = vsub.f32 %v5461_v27, %v5464_v56  ;;  %v5812_v56 = vld [vmem:[#allocation2 + $0x528] sm:$0xff] }
0x2b84   :  { %v5466_v46 = vmul.f32 1.442695, %v5465_v57  ;;  %v5811_v57 = vld [vmem:[#allocation2 + $0x520] sm:$0xff] }
0x2b86   :  { %7809 = vpow2.f32 %v5466_v46  ;;  %v6389_v46 = vld [vmem:[#allocation2 + $0x518] ss:$0 sm:$0xff] }
0x2b93   :  { %v7810_v19 = vpop.eup %7809 }
0x2b94   :  { %7687 = vmatmul.mubr.msk.f32.vlgmr.msra.gmra.mxu1 %vm732_vm8, %v7810_v19 }
0x2b95   :  { %7690 = vmatpush3.msra.mxu1 %v5350_v37  ;;  %7713 = vmatprep.mubr.msk.f32.mxu1 %vm7921_vm0, %v7920_v1 }
0x2b96   :  { %7691 = vmatprep.subr.mxu1 %v7920_v1 }
0x2b97   :  { %7692 = vmatpush3.msra.mxu1 %v5349_v24 }
0x2b98   :  { %7693 = vmatprep.subr.mxu1 %v7920_v1 }
0x2b99   :  { %7694 = vmatpush3.msra.mxu1 %v5348_v47 }
0x2b9a   :  { %7695 = vmatprep.subr.mxu1 %v7920_v1 }
0x2b9b   :  { %7696 = vmatpush3.msra.mxu1 %v5347_v38 }
0x2b9c   :  { %7697 = vmatprep.subr.mxu1 %v7920_v1 }
0x2b9d   :  { %7698 = vmatpush3.msra.mxu1 %v5346_v60 }
0x2b9e   :  { %7699 = vmatprep.subr.mxu1 %v7920_v1 }
0x2b9f   :  { %7700 = vmatpush3.msra.mxu1 %v5345_v0 }
0x2ba0   :  { %7701 = vmatprep.subr.mxu1 %v7920_v1 }
0x2ba1   :  { %7702 = vmatpush3.msra.mxu1 %v5344_v58  ;;  %v6396_v58 = vld [vmem:[#allocation2 + $0x558] ss:$0 sm:$0xff] }
0x2ba2   :  { %7703 = vmatprep.subr.mxu1 %v7920_v1 }
0x2ba3   :  { %7704 = vmatpush3.msra.mxu1 %v5343_v3  ;;  %v6397_v3 = vld [vmem:[#allocation2 + $0x560] ss:$0 sm:$0xff] }
0x2ba4   :  { %7705 = vmatprep.subr.mxu1 %v7920_v1 }
0x2ba5   :  { %7706 = vmatpush3.msra.mxu1 %v5342_v7 }
0x2ba6   :  { %7707 = vmatprep.subr.mxu1 %v7920_v1 }
0x2ba7   :  { %7708 = vmatpush3.msra.mxu1 %v5341_v6 }
0x2ba8   :  { %7709 = vmatprep.subr.mxu1 %v7920_v1 }
0x2ba9   :  { %7710 = vmatpush3.msra.mxu1 %v5340_v10 }
0x2baa   :  { %7711 = vmatprep.subr.mxu1 %v7920_v1 }
0x2bab   :  { %7712 = vmatpush3.msra.mxu1 %v5339_v14 }
0x2bac   :  { %7735 = vmatprep.subr.mxu1 %v7920_v1 }
0x2c54   :  { %v5537_v20 = vpop.f32.mrf.mxu1 }
0x2c55   :  { %7811 = vrcp.f32 %v5537_v20 }
0x2c56   :  { %v7688_v63 = vpop.f32.mrf.mxu1 }
0x2c62   :  { %v7812_v22 = vpop.eup %7811 }
0x2c63   :  { %v5542_v33 = vmul.f32 %v7812_v22, %v7810_v19  ;;  %v6398_v22 = vld [vmem:[#allocation2 + $0x568] ss:$0 sm:$0xff] }
0x2c65   :  { %7714 = vmatmul.mubr.msk.f32.vlgmr.msra.gmra.mxu1 %vm732_vm8, %v5542_v33 }
0x2c66   :  { %7736 = vmatpush3.msra.mxu1 %v7892_v51  ;;  %7739 = vmatprep.mubr.msk.f32.mxu1 %vm7921_vm0, %v7920_v1  ;;  %v6399_v51 = vld [vmem:[#allocation2 + $0x570] ss:$0 sm:$0xff] }
0x2c67   :  { %7737 = vmatprep.subr.mxu1 %v7920_v1 }
0x2c68   :  { %7738 = vmatpush3.msra.mxu1 %v7893_v21 }
0x2d25   :  { %v5612_v29 = vpop.f32.mrf.mxu1 }
0x2d26   :  { %7721 = vmatmul.mubr.msk.f32.vlgmr.msra.gmra.mxu0 %vm159_vm1, %v5612_v29 }
0x2d27   :  { %v7715_v28 = vpop.f32.mrf.mxu1  ;;  %7725 = vmatprep.mubr.msk.f32.mxu0 %vm7921_vm0, %v7920_v1  ;;  %7724 = vmatpush3.xpose.msk.msra.mxu0 %vm159_vm1, %v5728_v35 }
0x2d28   :  { %7728 = vmatprep.subr.mxu0 %v7920_v1  ;;  %v6400_v28 = vld [vmem:[#allocation2 + $0x10] ss:$0 sm:$0xff] }
0x2de6   :  { %v5698_v43 = vpop.f32.mrf.mxu0 }
0x2de7   :  { %v5699_v54 = vadd.f32 %v6383_v31, %v5698_v43 }
0x2de8   :  { %v7722_v30 = vpop.f32.mrf.mxu0 }
0x2de9   :  { %v5702_v32 = vadd.f32 %v5699_v54, %v9053_v23 }
0x2deb   :  { %v5705_v50 = vsel %vm159_vm1, %v5702_v32, 0.0 }
0x2dec   :  { %5706 = vadd.xlane.f32.xlu1 %v5705_v50 }
0x2e75   :  { %v5707_v55 = vpop.xlane.xlu1 %5706 }
0x2e76   :  { %v5708_v59 = vmul.f32 0.0625, %v5707_v55 }
0x2e78   :  { %v5709_v9 = vsub.f32 %v5702_v32, %v5708_v59 }
0x2e7a   :  { %v5710_v4 = vmul.f32 %v5709_v9, %v5709_v9 }
0x2e7c   :  { %v5711_v27 = vsel %vm159_vm1, %v5710_v4, 0.0 }
0x2e7d   :  { %5712 = vadd.xlane.f32.xlu0 %v5711_v27 }
0x2f06   :  { %v5713_v48 = vpop.xlane.xlu0 %5712 }
0x2f07   :  { %v5714_v15 = vmul.f32 0.0625, %v5713_v48 }
0x2f09   :  { %v5715_v11 = vadd.f32 1e-05, %v5714_v15 }
0x2f0b   :  { %7813 = vrsqrt.f32 %v5715_v11 }
0x2f18   :  { %v7814_v23 = vpop.eup %7813 }
0x2f19   :  { %v5717_v49 = vmul.f32 %v7814_v23, %v5709_v9 }
0x2f1b   :  { %v5722_v62 = vmul.f32 %v6387_v44, %v5717_v49 }
0x2f1d   :  { %v5727_v17 = vadd.f32 %v6388_v53, %v5722_v62 }
0x2f1f   :  { %7726 = vmatmul.mubr.msk.f32.vlgmr.msra.gmra.mxu0 %vm159_vm1, %v5727_v17 }
0x2f20   :  { %7729 = vmatpush3.xpose.msk.msra.mxu0 %vm1161_vm10, %v5812_v56  ;;  %7732 = vmatprep.mubr.msk.f32.mxu0 %vm7921_vm0, %v7920_v1 }
0x2f21   :  { %7730 = vmatprep.subr.mxu0 %v7920_v1 }
0x2f24   :  { %7731 = vmatpush3.xpose.msk.msra.mxu0 %vm1161_vm10, %v5811_v57 }
0x2fdf   :  { %v5806_v25 = vpop.f32.mrf.mxu0 }
0x2fe0   :  { %v5807_v36 = vadd.f32 %v6389_v46, %v5806_v25 }
0x2fe1   :  { %v7727_v39 = vpop.f32.mrf.mxu0 }
0x2fe2   :  { %v5810_v42 = vmax.f32 %v5807_v36, 0.0 }
0x2fe4   :  { %7733 = vmatmul.mubr.msk.f32.vlgmr.msra.gmra.mxu0 %vm1161_vm10, %v5810_v42 }
0x30a4   :  { %v5893_v37 = vpop.f32.mrf.mxu0 }
0x30a5   :  { %v5894_v19 = vadd.f32 %v6392_v13, %v5893_v37 }
0x30a6   :  { %v7734_v45 = vpop.f32.mrf.mxu0 }
0x30a7   :  { %v5897_v24 = vadd.f32 %v5894_v19, %v5727_v17 }
0x30a9   :  { %v5900_v40 = vsel %vm159_vm1, %v5897_v24, 0.0 }
0x30aa   :  { %5901 = vadd.xlane.f32.xlu0 %v5900_v40 }
0x3133   :  { %v5902_v47 = vpop.xlane.xlu0 %5901 }
0x3134   :  { %v5903_v1 = vmul.f32 0.0625, %v5902_v47 }
0x3136   :  { %v5904_v8 = vsub.f32 %v5897_v24, %v5903_v1 }
0x3138   :  { %v5905_v38 = vmul.f32 %v5904_v8, %v5904_v8 }
0x313a   :  { %v5906_v34 = vsel %vm159_vm1, %v5905_v38, 0.0 }
0x313b   :  { %5907 = vadd.xlane.f32.xlu0 %v5906_v34 }
0x31c4   :  { %v5908_v60 = vpop.xlane.xlu0 %5907 }
0x31c5   :  { %v5909_v26 = vmul.f32 0.0625, %v5908_v60 }
0x31c7   :  { %v5910_v0 = vadd.f32 1e-05, %v5909_v26 }
0x31c9   :  { %7815 = vrsqrt.f32 %v5910_v0 }
0x31d6   :  { %v7816_v52 = vpop.eup %7815 }
0x31d7   :  { %v5912_v2 = vmul.f32 %v7816_v52, %v5904_v8 }
0x31d9   :  { %v5917_v5 = vmul.f32 %v6396_v58, %v5912_v2 }
0x31db   :  { %v5922_v7 = vadd.f32 %v6397_v3, %v5917_v5 }
0x31dd   :  { %v5925_v61 = vsel %vm159_vm1, %v5922_v7, 0.0 }
0x31de   :  { %5926 = vadd.xlane.f32.xlu1 %v5925_v61 }
0x3267   :  { %v5927_v6 = vpop.xlane.xlu1 %5926 }
0x3268   :  { %v5928_v41 = vmul.f32 0.0625, %v5927_v6 }
0x326a   :  { %v5929_v10 = vsub.f32 %v5922_v7, %v5928_v41 }
0x326c   :  { %v5930_v12 = vmul.f32 %v5929_v10, %v5929_v10 }
0x326e   :  { %v5931_v14 = vsel %vm159_vm1, %v5930_v12, 0.0 }
0x326f   :  { %5932 = vadd.xlane.f32.xlu0 %v5931_v14 }
0x32f8   :  { %v5933_v16 = vpop.xlane.xlu0 %5932 }
0x32f9   :  { %v5934_v18 = vmul.f32 0.0625, %v5933_v16 }
0x32fb   :  { %v5935_v20 = vadd.f32 1e-05, %v5934_v18 }
0x32fd   :  { %7817 = vrsqrt.f32 %v5935_v20 }
0x330a   :  { %v7818_v63 = vpop.eup %7817 }
0x330b   :  { %v5937_v33 = vmul.f32 %v7818_v63, %v5929_v10 }
0x330d   :  { %v5942_v21 = vmul.f32 %v6398_v22, %v5937_v33 }
0x330f   :  { %v5947_v29 = vadd.f32 %v6399_v51, %v5942_v21 }
0x3311   :  { %7740 = vmatmul.mubr.msk.f32.vlgmr.msra.gmra.mxu1 %vm159_vm1, %v5947_v29 }
0x33d1   :  { %v6022_v31 = vpop.f32.mrf.mxu1 }
0x33d2   :  { %v6023_v43 = vadd.f32 %v6400_v28, %v6022_v31 }
0x33d3   :  { %v7741_v54 = vpop.f32.mrf.mxu1 }
0x33d4   :  { %6026 = vst [vmem:[%s9226_s2] sm:$0xff] %v6023_v43 }
0x33d5   :  { %6031 = vsyncpa [#allocation3], 1 }

</bundles_post_ra>
